<compile_context>
chip_gen: v7x
topology: tpu7x:2x2x1
jax: 0.10.0
libtpu: 0.0.40
codegen_flags: <defaults>
</compile_context>

<pallas_src>
import functools

import jax
import jax.numpy as jnp
from jax.experimental import pallas as pl
from jax.experimental.pallas import tpu as pltpu

_LANE = 128


def _round_up(x, m):
    return ((x + m - 1) // m) * m


def _inverted_residual_kernel(
    x_ref, w_exp_ref, b_exp_ref, w_dw_ref, b_dw_ref, w_proj_ref, b_proj_ref,
    o_ref, pad_ref,
    *, stride, use_res, expand, H, W, hid,
):
    # One image per grid step (grid axis is "parallel": no cross-step state).
    x = x_ref[0].astype(jnp.float32)               # (H, W, Cin_p)
    cin = x.shape[-1]

    # ---- 1x1 expansion conv (BN scale pre-folded into weights) + bias + ReLU6 ----
    if expand:
        h = jnp.dot(x.reshape(H * W, cin), w_exp_ref[...],
                    preferred_element_type=jnp.float32)
        h = h + b_exp_ref[...]
        h = jnp.clip(h, 0.0, 6.0).reshape(H, W, hid)
    else:
        h = x                                      # no expansion layer (hid == cin)

    # ---- 3x3 depthwise conv (padding=1, groups=hid) + bias + ReLU6 ----
    # Zero only the 1-pixel border of the persistent VMEM scratch; the interior is
    # fully overwritten below.  (Done each step so it is correct on multi-core chips
    # where program_id does not start at 0 on every core.)
    zrow = jnp.zeros((1, W + 2, hid), jnp.float32)
    pad_ref[pl.ds(0, 1), :, :] = zrow
    pad_ref[pl.ds(H + 1, 1), :, :] = zrow
    zcol = jnp.zeros((H, 1, hid), jnp.float32)
    pad_ref[pl.ds(1, H), pl.ds(0, 1), :] = zcol
    pad_ref[pl.ds(1, H), pl.ds(W + 1, 1), :] = zcol
    pad_ref[pl.ds(1, H), pl.ds(1, W), :] = h

    Ho = H if stride == 1 else H // 2
    Wo = W if stride == 1 else W // 2

    acc = jnp.zeros((Ho, Wo, hid), jnp.float32)
    if stride == 1:
        # Load each padded row-slab once; dw taps are static slices of the value
        # (3 scratch loads total instead of 9 shifted ref loads).
        for dh in range(3):
            row = pad_ref[pl.ds(dh, Ho), :, :]      # (Ho, W+2, hid)
            for dw in range(3):
                acc = acc + row[:, dw:dw + Wo, :] * w_dw_ref[3 * dh + dw, :]
    else:
        # Stride-2 path kept simple (strided sublane reads); a W-parity deinterleave
        # of the scratch would make these dense — not needed for the tested config.
        for dh in range(3):
            for dw in range(3):
                patch = pad_ref[pl.ds(dh, Ho, 2), pl.ds(dw, Wo, 2), :]
                acc = acc + patch * w_dw_ref[3 * dh + dw, :]
    acc = jnp.clip(acc + b_dw_ref[...], 0.0, 6.0)

    # ---- 1x1 projection conv + bias (linear bottleneck: no ReLU) ----
    y = jnp.dot(acc.reshape(Ho * Wo, hid), w_proj_ref[...],
                preferred_element_type=jnp.float32)
    y = y + b_proj_ref[...]
    y = y.reshape(Ho, Wo, -1)

    if use_res:
        y = y + x

    o_ref[0] = y.astype(o_ref.dtype)


def make_params(key, inp, oup, expand_ratio, dtype=jnp.float32):
    """Deterministic synthetic parameters (BN as scale/bias, inference mode)."""
    hidden = int(round(inp * expand_ratio))
    ks = jax.random.split(key, 9)
    eps = 1e-5

    def bn(kg, kb, c):
        gamma = jax.random.uniform(kg, (1, c), dtype, 0.5, 1.5)
        beta = jax.random.uniform(kb, (1, c), dtype, -0.5, 0.5)
        mean = jnp.zeros((1, c), dtype)            # default running stats
        var = jnp.ones((1, c), dtype)
        scale = gamma / jnp.sqrt(var + eps)
        bias = beta - mean * scale
        return scale, bias

    params = {}
    if expand_ratio != 1:
        params['w_exp'] = 0.1 * jax.random.normal(ks[0], (inp, hidden), dtype)
        params['s_exp'], params['b_exp'] = bn(ks[1], ks[2], hidden)
    else:
        params['w_exp'] = jnp.zeros((inp, hidden), dtype)
        params['s_exp'] = jnp.zeros((1, hidden), dtype)
        params['b_exp'] = jnp.zeros((1, hidden), dtype)
    params['w_dw'] = 0.1 * jax.random.normal(ks[3], (9, hidden), dtype)   # (3*3, hidden)
    params['s_dw'], params['b_dw'] = bn(ks[4], ks[5], hidden)
    params['w_proj'] = 0.1 * jax.random.normal(ks[6], (hidden, oup), dtype)
    params['s_proj'], params['b_proj'] = bn(ks[7], ks[8], oup)
    return params, hidden


def prepare_params(params, *, inp, oup, expand_ratio, lane=_LANE):
    """Fold BN scales into weights and zero-pad all channel dims to lane multiples.

    Done once per block (outside the per-call hot path). Padded channels stay exactly
    zero through the whole block, so slicing the output afterwards is exact.
    """
    hidden = int(round(inp * expand_ratio))
    cin_p = _round_up(inp, lane)
    hid_p = _round_up(hidden, lane)
    oup_p = _round_up(oup, lane)

    def pad2(a, r, c):
        return jnp.pad(a, ((0, r - a.shape[0]), (0, c - a.shape[1])))

    w_exp = params['w_exp'] * params['s_exp']        # scale per output (hidden) column
    w_dw = params['w_dw'] * params['s_dw']           # scale per hidden channel
    w_proj = params['w_proj'] * params['s_proj']     # scale per output (oup) column

    return {
        'w_exp': pad2(w_exp, cin_p, hid_p),
        'b_exp': pad2(params['b_exp'], 1, hid_p),
        'w_dw': pad2(w_dw, 9, hid_p),
        'b_dw': pad2(params['b_dw'], 1, hid_p),
        'w_proj': pad2(w_proj, hid_p, oup_p),
        'b_proj': pad2(params['b_proj'], 1, oup_p),
    }


def inverted_residual_nhwc(x_nhwc, fp, *, inp, oup, stride, expand_ratio):
    """NHWC entry point (preferred for chaining blocks without per-call transposes)."""
    assert stride in (1, 2)
    use_res = (stride == 1) and (inp == oup)
    expand = expand_ratio != 1

    N, H, W, C = x_nhwc.shape
    assert C == inp
    if stride == 2:
        assert H % 2 == 0 and W % 2 == 0
    Ho = H if stride == 1 else H // 2
    Wo = W if stride == 1 else W // 2

    cin_p, hid_p = fp['w_exp'].shape
    oup_p = fp['w_proj'].shape[1]

    # Lane-pad input channels (zeros have no effect downstream).
    if cin_p != C:
        x_nhwc = jnp.pad(x_nhwc, ((0, 0), (0, 0), (0, 0), (0, cin_p - C)))

    kernel = functools.partial(
        _inverted_residual_kernel,
        stride=stride, use_res=use_res, expand=expand,
        H=H, W=W, hid=hid_p,
    )

    def full_spec(shape):
        nd = len(shape)
        return pl.BlockSpec(shape, lambda n, nd=nd: (0,) * nd)

    out = pl.pallas_call(
        kernel,
        out_shape=jax.ShapeDtypeStruct((N, Ho, Wo, oup_p), x_nhwc.dtype),
        grid=(N,),
        in_specs=[
            pl.BlockSpec((1, H, W, cin_p), lambda n: (n, 0, 0, 0)),
            full_spec(fp['w_exp'].shape),
            full_spec(fp['b_exp'].shape),
            full_spec(fp['w_dw'].shape),
            full_spec(fp['b_dw'].shape),
            full_spec(fp['w_proj'].shape),
            full_spec(fp['b_proj'].shape),
        ],
        out_specs=pl.BlockSpec((1, Ho, Wo, oup_p), lambda n: (n, 0, 0, 0)),
        scratch_shapes=[pltpu.VMEM((H + 2, W + 2, hid_p), jnp.float32)],
        compiler_params=pltpu.CompilerParams(
            dimension_semantics=("parallel",)),      # independent per image -> 2 TCs on v7x
    )(x_nhwc, fp['w_exp'], fp['b_exp'], fp['w_dw'], fp['b_dw'],
      fp['w_proj'], fp['b_proj'])

    return out[..., :oup]


def inverted_residual(x_nchw, folded_params, *, inp, oup, stride, expand_ratio):
    """PyTorch-parity wrapper (NCHW in / NCHW out). For real networks, convert the
    layout once and chain `inverted_residual_nhwc` instead."""
    x = jnp.transpose(x_nchw, (0, 2, 3, 1))        # NCHW -> NHWC
    y = inverted_residual_nhwc(x, folded_params, inp=inp, oup=oup,
                               stride=stride, expand_ratio=expand_ratio)
    return jnp.transpose(y, (0, 3, 1, 2))          # NHWC -> NCHW


def reference(x_nchw, params, *, inp, oup, stride, expand_ratio):
    """Pure-JAX reference replicating the PyTorch forward (inference-mode BN)."""
    hidden = int(round(inp * expand_ratio))
    use_res = (stride == 1) and (inp == oup)
    x = jnp.transpose(x_nchw, (0, 2, 3, 1)).astype(jnp.float32)
    N, H, W, _ = x.shape
    Ho = H if stride == 1 else H // 2
    Wo = W if stride == 1 else W // 2

    h = x
    if expand_ratio != 1:
        h = jnp.einsum('nhwc,cd->nhwd', h, params['w_exp'])
        h = jnp.clip(h * params['s_exp'][0] + params['b_exp'][0], 0.0, 6.0)

    hp = jnp.pad(h, ((0, 0), (1, 1), (1, 1), (0, 0)))
    wdw = params['w_dw'].reshape(3, 3, hidden)
    acc = jnp.zeros((N, Ho, Wo, hidden), jnp.float32)
    for dh in range(3):
        for dw in range(3):
            patch = hp[:, dh:dh + stride * (Ho - 1) + 1:stride,
                       dw:dw + stride * (Wo - 1) + 1:stride, :]
            acc = acc + patch * wdw[dh, dw]
    acc = jnp.clip(acc * params['s_dw'][0] + params['b_dw'][0], 0.0, 6.0)

    y = jnp.einsum('nhwc,cd->nhwd', acc, params['w_proj'])
    y = y * params['s_proj'][0] + params['b_proj'][0]
    if use_res:
        y = y + x
    return jnp.transpose(y, (0, 3, 1, 2)).astype(x_nchw.dtype)


if __name__ == "__main__":
    # Small shapes: batch=2, inp=oup=4, H=W=16, stride=1, expand_ratio=2
    # -> hidden_dim=8, residual connection active.
    N, inp, oup, H, W = 2, 4, 4, 16, 16
    stride, expand_ratio = 1, 2

    key = jax.random.PRNGKey(0)
    kx, kp = jax.random.split(key)
    x = jax.random.normal(kx, (N, inp, H, W), jnp.float32)   # NCHW like PyTorch
    params, hidden = make_params(kp, inp, oup, expand_ratio)

    folded = prepare_params(params, inp=inp, oup=oup, expand_ratio=expand_ratio)

    out = inverted_residual(x, folded, inp=inp, oup=oup,
                            stride=stride, expand_ratio=expand_ratio)
    out = jax.block_until_ready(out)

    ref = reference(x, params, inp=inp, oup=oup,
                    stride=stride, expand_ratio=expand_ratio)

    assert out.shape == (N, oup, H, W), out.shape
    max_err = float(jnp.max(jnp.abs(out - ref)))
    assert jnp.allclose(out, ref, atol=1e-4, rtol=1e-4), max_err
    print("KERNEL_OK")
</pallas_src>

<mosaic_0001>
module attributes {stable_mosaic.version = 11 : i64} {
  func.func @_inverted_residual_kernel(%arg0: i32, %arg1: memref<1x16x16x128xf32, #tpu.memory_space<vmem>>, %arg2: memref<128x128xf32, #tpu.memory_space<vmem>>, %arg3: memref<1x128xf32, #tpu.memory_space<vmem>>, %arg4: memref<9x128xf32, #tpu.memory_space<vmem>>, %arg5: memref<1x128xf32, #tpu.memory_space<vmem>>, %arg6: memref<128x128xf32, #tpu.memory_space<vmem>>, %arg7: memref<1x128xf32, #tpu.memory_space<vmem>>, %arg8: memref<1x16x16x128xf32, #tpu.memory_space<vmem>>, %arg9: memref<18x18x128xf32, #tpu.memory_space<vmem>>) attributes {dimension_semantics = [#tpu.dimension_semantics<parallel>], iteration_bounds = array<i64: 2>, scalar_prefetch = 0 : i64, scratch_operands = 1 : i64, tpu.core_type = #tpu.core_type<tc>, window_params = [{transform_indices = @transform_0, window_bounds = array<i64: 1, 16, 16, 128>}, {pipeline_mode = #tpu.pipeline_mode<synchronous>, transform_indices = @transform_1, window_bounds = array<i64: 128, 128>}, {pipeline_mode = #tpu.pipeline_mode<synchronous>, transform_indices = @transform_2, window_bounds = array<i64: 1, 128>}, {pipeline_mode = #tpu.pipeline_mode<synchronous>, transform_indices = @transform_3, window_bounds = array<i64: 9, 128>}, {pipeline_mode = #tpu.pipeline_mode<synchronous>, transform_indices = @transform_4, window_bounds = array<i64: 1, 128>}, {pipeline_mode = #tpu.pipeline_mode<synchronous>, transform_indices = @transform_5, window_bounds = array<i64: 128, 128>}, {pipeline_mode = #tpu.pipeline_mode<synchronous>, transform_indices = @transform_6, window_bounds = array<i64: 1, 128>}, {transform_indices = @transform_7, window_bounds = array<i64: 1, 16, 16, 128>}]} {
    %c0 = arith.constant 0 : index
    %c0_0 = arith.constant 0 : index
    %c0_1 = arith.constant 0 : index
    %c0_2 = arith.constant 0 : index
    %0 = vector.load %arg1[%c0, %c0_0, %c0_1, %c0_2] : memref<1x16x16x128xf32, #tpu.memory_space<vmem>>, vector<1x16x16x128xf32>
    %1 = vector.shape_cast %0 : vector<1x16x16x128xf32> to vector<16x16x128xf32>
    %2 = vector.shape_cast %1 : vector<16x16x128xf32> to vector<256x128xf32>
    %c0_3 = arith.constant 0 : index
    %c0_4 = arith.constant 0 : index
    %3 = vector.load %arg2[%c0_3, %c0_4] : memref<128x128xf32, #tpu.memory_space<vmem>>, vector<128x128xf32>
    %cst = arith.constant dense<0.000000e+00> : vector<256x128xf32>
    %4 = tpu.matmul %2, %3, %cst {dimension_numbers = #tpu.dot_dimension_numbers<[1], [0], [0], [1], [0, 0, 1, 1], [], []>} : vector<256x128xf32>, vector<128x128xf32>, vector<256x128xf32> -> vector<256x128xf32>
    %c0_5 = arith.constant 0 : index
    %c0_6 = arith.constant 0 : index
    %5 = vector.load %arg3[%c0_5, %c0_6] : memref<1x128xf32, #tpu.memory_space<vmem>>, vector<1x128xf32>
    %6 = vector.broadcast %5 : vector<1x128xf32> to vector<256x128xf32>
    %7 = arith.addf %4, %6 : vector<256x128xf32>
    %cst_7 = arith.constant 0.000000e+00 : f32
    %cst_8 = arith.constant 6.000000e+00 : f32
    %8 = vector.broadcast %cst_7 : f32 to vector<256x128xf32>
    %9 = arith.maximumf %8, %7 : vector<256x128xf32>
    %10 = vector.broadcast %cst_8 : f32 to vector<256x128xf32>
    %11 = arith.minimumf %10, %9 : vector<256x128xf32>
    %12 = vector.shape_cast %11 : vector<256x128xf32> to vector<16x16x128xf32>
    %cst_9 = arith.constant 0.000000e+00 : f32
    %13 = vector.broadcast %cst_9 : f32 to vector<1x18x128xf32>
    %c0_10 = arith.constant 0 : index
    %c0_11 = arith.constant 0 : index
    %c0_12 = arith.constant 0 : index
    %14 = vector.load %arg9[%c0_10, %c0_11, %c0_12] : memref<18x18x128xf32, #tpu.memory_space<vmem>>, vector<1x18x128xf32>
    tpu.vector_store %arg9[%c0_10, %c0_11, %c0_12], %13 {strides = array<i32>} : memref<18x18x128xf32, #tpu.memory_space<vmem>>, vector<1x18x128xf32>,
    %c17 = arith.constant 17 : index
    %c0_13 = arith.constant 0 : index
    %c0_14 = arith.constant 0 : index
    %15 = vector.load %arg9[%c17, %c0_13, %c0_14] : memref<18x18x128xf32, #tpu.memory_space<vmem>>, vector<1x18x128xf32>
    tpu.vector_store %arg9[%c17, %c0_13, %c0_14], %13 {strides = array<i32>} : memref<18x18x128xf32, #tpu.memory_space<vmem>>, vector<1x18x128xf32>,
    %cst_15 = arith.constant 0.000000e+00 : f32
    %16 = vector.broadcast %cst_15 : f32 to vector<16x1x128xf32>
    %c1 = arith.constant 1 : index
    %c0_16 = arith.constant 0 : index
    %c0_17 = arith.constant 0 : index
    %17 = vector.load %arg9[%c1, %c0_16, %c0_17] : memref<18x18x128xf32, #tpu.memory_space<vmem>>, vector<16x1x128xf32>
    tpu.vector_store %arg9[%c1, %c0_16, %c0_17], %16 {strides = array<i32>} : memref<18x18x128xf32, #tpu.memory_space<vmem>>, vector<16x1x128xf32>,
    %c1_18 = arith.constant 1 : index
    %c17_19 = arith.constant 17 : index
    %c0_20 = arith.constant 0 : index
    %18 = vector.load %arg9[%c1_18, %c17_19, %c0_20] : memref<18x18x128xf32, #tpu.memory_space<vmem>>, vector<16x1x128xf32>
    tpu.vector_store %arg9[%c1_18, %c17_19, %c0_20], %16 {strides = array<i32>} : memref<18x18x128xf32, #tpu.memory_space<vmem>>, vector<16x1x128xf32>,
    %c1_21 = arith.constant 1 : index
    %c1_22 = arith.constant 1 : index
    %c0_23 = arith.constant 0 : index
    %19 = vector.load %arg9[%c1_21, %c1_22, %c0_23] : memref<18x18x128xf32, #tpu.memory_space<vmem>>, vector<16x16x128xf32>
    tpu.vector_store %arg9[%c1_21, %c1_22, %c0_23], %12 {strides = array<i32>} : memref<18x18x128xf32, #tpu.memory_space<vmem>>, vector<16x16x128xf32>,
    %cst_24 = arith.constant 0.000000e+00 : f32
    %20 = vector.broadcast %cst_24 : f32 to vector<16x16x128xf32>
    %c0_25 = arith.constant 0 : index
    %c0_26 = arith.constant 0 : index
    %c0_27 = arith.constant 0 : index
    %21 = vector.load %arg9[%c0_25, %c0_26, %c0_27] : memref<18x18x128xf32, #tpu.memory_space<vmem>>, vector<16x18x128xf32>
    %22 = vector.extract_strided_slice %21 {offsets = [0, 0, 0], sizes = [16, 16, 128], strides = [1, 1, 1]} : vector<16x18x128xf32> to vector<16x16x128xf32>
    %c0_28 = arith.constant 0 : index
    %c0_29 = arith.constant 0 : index
    %23 = vector.load %arg4[%c0_28, %c0_29] : memref<9x128xf32, #tpu.memory_space<vmem>>, vector<1x128xf32>
    %24 = vector.shape_cast %23 : vector<1x128xf32> to vector<128xf32>
    %25 = vector.shape_cast %24 : vector<128xf32> to vector<1x1x128xf32>
    %26 = vector.broadcast %25 : vector<1x1x128xf32> to vector<16x16x128xf32>
    %27 = arith.mulf %22, %26 : vector<16x16x128xf32>
    %28 = arith.addf %20, %27 : vector<16x16x128xf32>
    %29 = vector.extract_strided_slice %21 {offsets = [0, 1, 0], sizes = [16, 16, 128], strides = [1, 1, 1]} : vector<16x18x128xf32> to vector<16x16x128xf32>
    %c1_30 = arith.constant 1 : index
    %c0_31 = arith.constant 0 : index
    %30 = vector.load %arg4[%c1_30, %c0_31] : memref<9x128xf32, #tpu.memory_space<vmem>>, vector<1x128xf32>
    %31 = vector.shape_cast %30 : vector<1x128xf32> to vector<128xf32>
    %32 = vector.shape_cast %31 : vector<128xf32> to vector<1x1x128xf32>
    %33 = vector.broadcast %32 : vector<1x1x128xf32> to vector<16x16x128xf32>
    %34 = arith.mulf %29, %33 : vector<16x16x128xf32>
    %35 = arith.addf %28, %34 : vector<16x16x128xf32>
    %36 = vector.extract_strided_slice %21 {offsets = [0, 2, 0], sizes = [16, 16, 128], strides = [1, 1, 1]} : vector<16x18x128xf32> to vector<16x16x128xf32>
    %c2 = arith.constant 2 : index
    %c0_32 = arith.constant 0 : index
    %37 = vector.load %arg4[%c2, %c0_32] : memref<9x128xf32, #tpu.memory_space<vmem>>, vector<1x128xf32>
    %38 = vector.shape_cast %37 : vector<1x128xf32> to vector<128xf32>
    %39 = vector.shape_cast %38 : vector<128xf32> to vector<1x1x128xf32>
    %40 = vector.broadcast %39 : vector<1x1x128xf32> to vector<16x16x128xf32>
    %41 = arith.mulf %36, %40 : vector<16x16x128xf32>
    %42 = arith.addf %35, %41 : vector<16x16x128xf32>
    %c1_33 = arith.constant 1 : index
    %c0_34 = arith.constant 0 : index
    %c0_35 = arith.constant 0 : index
    %43 = vector.load %arg9[%c1_33, %c0_34, %c0_35] : memref<18x18x128xf32, #tpu.memory_space<vmem>>, vector<16x18x128xf32>
    %44 = vector.extract_strided_slice %43 {offsets = [0, 0, 0], sizes = [16, 16, 128], strides = [1, 1, 1]} : vector<16x18x128xf32> to vector<16x16x128xf32>
    %c3 = arith.constant 3 : index
    %c0_36 = arith.constant 0 : index
    %45 = vector.load %arg4[%c3, %c0_36] : memref<9x128xf32, #tpu.memory_space<vmem>>, vector<1x128xf32>
    %46 = vector.shape_cast %45 : vector<1x128xf32> to vector<128xf32>
    %47 = vector.shape_cast %46 : vector<128xf32> to vector<1x1x128xf32>
    %48 = vector.broadcast %47 : vector<1x1x128xf32> to vector<16x16x128xf32>
    %49 = arith.mulf %44, %48 : vector<16x16x128xf32>
    %50 = arith.addf %42, %49 : vector<16x16x128xf32>
    %51 = vector.extract_strided_slice %43 {offsets = [0, 1, 0], sizes = [16, 16, 128], strides = [1, 1, 1]} : vector<16x18x128xf32> to vector<16x16x128xf32>
    %c4 = arith.constant 4 : index
    %c0_37 = arith.constant 0 : index
    %52 = vector.load %arg4[%c4, %c0_37] : memref<9x128xf32, #tpu.memory_space<vmem>>, vector<1x128xf32>
    %53 = vector.shape_cast %52 : vector<1x128xf32> to vector<128xf32>
    %54 = vector.shape_cast %53 : vector<128xf32> to vector<1x1x128xf32>
    %55 = vector.broadcast %54 : vector<1x1x128xf32> to vector<16x16x128xf32>
    %56 = arith.mulf %51, %55 : vector<16x16x128xf32>
    %57 = arith.addf %50, %56 : vector<16x16x128xf32>
    %58 = vector.extract_strided_slice %43 {offsets = [0, 2, 0], sizes = [16, 16, 128], strides = [1, 1, 1]} : vector<16x18x128xf32> to vector<16x16x128xf32>
    %c5 = arith.constant 5 : index
    %c0_38 = arith.constant 0 : index
    %59 = vector.load %arg4[%c5, %c0_38] : memref<9x128xf32, #tpu.memory_space<vmem>>, vector<1x128xf32>
    %60 = vector.shape_cast %59 : vector<1x128xf32> to vector<128xf32>
    %61 = vector.shape_cast %60 : vector<128xf32> to vector<1x1x128xf32>
    %62 = vector.broadcast %61 : vector<1x1x128xf32> to vector<16x16x128xf32>
    %63 = arith.mulf %58, %62 : vector<16x16x128xf32>
    %64 = arith.addf %57, %63 : vector<16x16x128xf32>
    %c2_39 = arith.constant 2 : index
    %c0_40 = arith.constant 0 : index
    %c0_41 = arith.constant 0 : index
    %65 = vector.load %arg9[%c2_39, %c0_40, %c0_41] : memref<18x18x128xf32, #tpu.memory_space<vmem>>, vector<16x18x128xf32>
    %66 = vector.extract_strided_slice %65 {offsets = [0, 0, 0], sizes = [16, 16, 128], strides = [1, 1, 1]} : vector<16x18x128xf32> to vector<16x16x128xf32>
    %c6 = arith.constant 6 : index
    %c0_42 = arith.constant 0 : index
    %67 = vector.load %arg4[%c6, %c0_42] : memref<9x128xf32, #tpu.memory_space<vmem>>, vector<1x128xf32>
    %68 = vector.shape_cast %67 : vector<1x128xf32> to vector<128xf32>
    %69 = vector.shape_cast %68 : vector<128xf32> to vector<1x1x128xf32>
    %70 = vector.broadcast %69 : vector<1x1x128xf32> to vector<16x16x128xf32>
    %71 = arith.mulf %66, %70 : vector<16x16x128xf32>
    %72 = arith.addf %64, %71 : vector<16x16x128xf32>
    %73 = vector.extract_strided_slice %65 {offsets = [0, 1, 0], sizes = [16, 16, 128], strides = [1, 1, 1]} : vector<16x18x128xf32> to vector<16x16x128xf32>
    %c7 = arith.constant 7 : index
    %c0_43 = arith.constant 0 : index
    %74 = vector.load %arg4[%c7, %c0_43] : memref<9x128xf32, #tpu.memory_space<vmem>>, vector<1x128xf32>
    %75 = vector.shape_cast %74 : vector<1x128xf32> to vector<128xf32>
    %76 = vector.shape_cast %75 : vector<128xf32> to vector<1x1x128xf32>
    %77 = vector.broadcast %76 : vector<1x1x128xf32> to vector<16x16x128xf32>
    %78 = arith.mulf %73, %77 : vector<16x16x128xf32>
    %79 = arith.addf %72, %78 : vector<16x16x128xf32>
    %80 = vector.extract_strided_slice %65 {offsets = [0, 2, 0], sizes = [16, 16, 128], strides = [1, 1, 1]} : vector<16x18x128xf32> to vector<16x16x128xf32>
    %c8 = arith.constant 8 : index
    %c0_44 = arith.constant 0 : index
    %81 = vector.load %arg4[%c8, %c0_44] : memref<9x128xf32, #tpu.memory_space<vmem>>, vector<1x128xf32>
    %82 = vector.shape_cast %81 : vector<1x128xf32> to vector<128xf32>
    %83 = vector.shape_cast %82 : vector<128xf32> to vector<1x1x128xf32>
    %84 = vector.broadcast %83 : vector<1x1x128xf32> to vector<16x16x128xf32>
    %85 = arith.mulf %80, %84 : vector<16x16x128xf32>
    %86 = arith.addf %79, %85 : vector<16x16x128xf32>
    %c0_45 = arith.constant 0 : index
    %c0_46 = arith.constant 0 : index
    %87 = vector.load %arg5[%c0_45, %c0_46] : memref<1x128xf32, #tpu.memory_space<vmem>>, vector<1x128xf32>
    %88 = vector.shape_cast %87 : vector<1x128xf32> to vector<1x1x128xf32>
    %89 = vector.broadcast %88 : vector<1x1x128xf32> to vector<16x16x128xf32>
    %90 = arith.addf %86, %89 : vector<16x16x128xf32>
    %cst_47 = arith.constant 0.000000e+00 : f32
    %cst_48 = arith.constant 6.000000e+00 : f32
    %91 = vector.broadcast %cst_47 : f32 to vector<16x16x128xf32>
    %92 = arith.maximumf %91, %90 : vector<16x16x128xf32>
    %93 = vector.broadcast %cst_48 : f32 to vector<16x16x128xf32>
    %94 = arith.minimumf %93, %92 : vector<16x16x128xf32>
    %95 = vector.shape_cast %94 : vector<16x16x128xf32> to vector<256x128xf32>
    %c0_49 = arith.constant 0 : index
    %c0_50 = arith.constant 0 : index
    %96 = vector.load %arg6[%c0_49, %c0_50] : memref<128x128xf32, #tpu.memory_space<vmem>>, vector<128x128xf32>
    %cst_51 = arith.constant dense<0.000000e+00> : vector<256x128xf32>
    %97 = tpu.matmul %95, %96, %cst_51 {dimension_numbers = #tpu.dot_dimension_numbers<[1], [0], [0], [1], [0, 0, 1, 1], [], []>} : vector<256x128xf32>, vector<128x128xf32>, vector<256x128xf32> -> vector<256x128xf32>
    %c0_52 = arith.constant 0 : index
    %c0_53 = arith.constant 0 : index
    %98 = vector.load %arg7[%c0_52, %c0_53] : memref<1x128xf32, #tpu.memory_space<vmem>>, vector<1x128xf32>
    %99 = vector.broadcast %98 : vector<1x128xf32> to vector<256x128xf32>
    %100 = arith.addf %97, %99 : vector<256x128xf32>
    %101 = vector.shape_cast %100 : vector<256x128xf32> to vector<16x16x128xf32>
    %102 = arith.addf %101, %1 : vector<16x16x128xf32>
    %c0_54 = arith.constant 0 : index
    %c0_55 = arith.constant 0 : index
    %c0_56 = arith.constant 0 : index
    %c0_57 = arith.constant 0 : index
    %103 = vector.load %arg8[%c0_54, %c0_55, %c0_56, %c0_57] : memref<1x16x16x128xf32, #tpu.memory_space<vmem>>, vector<1x16x16x128xf32>
    %104 = vector.shape_cast %103 : vector<1x16x16x128xf32> to vector<16x16x128xf32>
    %105 = vector.shape_cast %102 : vector<16x16x128xf32> to vector<1x16x16x128xf32>
    tpu.vector_store %arg8[%c0_54, %c0_55, %c0_56, %c0_57], %105 {strides = array<i32>} : memref<1x16x16x128xf32, #tpu.memory_space<vmem>>, vector<1x16x16x128xf32>,
    return
  }
  func.func @transform_0(%arg0: i32) -> (i32, i32, i32, i32) {
    %c0_i32 = arith.constant 0 : i32
    %c0_i32_0 = arith.constant 0 : i32
    %c0_i32_1 = arith.constant 0 : i32
    %c0_i32_2 = arith.constant 0 : i32
    return %arg0, %c0_i32, %c0_i32_0, %c0_i32_1 : i32, i32, i32, i32
  }
  func.func @transform_1(%arg0: i32) -> (i32, i32) {
    %c0_i32 = arith.constant 0 : i32
    %c0_i32_0 = arith.constant 0 : i32
    %c0_i32_1 = arith.constant 0 : i32
    return %c0_i32, %c0_i32_0 : i32, i32
  }
  func.func @transform_2(%arg0: i32) -> (i32, i32) {
    %c0_i32 = arith.constant 0 : i32
    %c0_i32_0 = arith.constant 0 : i32
    %c0_i32_1 = arith.constant 0 : i32
    return %c0_i32, %c0_i32_0 : i32, i32
  }
  func.func @transform_3(%arg0: i32) -> (i32, i32) {
    %c0_i32 = arith.constant 0 : i32
    %c0_i32_0 = arith.constant 0 : i32
    %c0_i32_1 = arith.constant 0 : i32
    return %c0_i32, %c0_i32_0 : i32, i32
  }
  func.func @transform_4(%arg0: i32) -> (i32, i32) {
    %c0_i32 = arith.constant 0 : i32
    %c0_i32_0 = arith.constant 0 : i32
    %c0_i32_1 = arith.constant 0 : i32
    return %c0_i32, %c0_i32_0 : i32, i32
  }
  func.func @transform_5(%arg0: i32) -> (i32, i32) {
    %c0_i32 = arith.constant 0 : i32
    %c0_i32_0 = arith.constant 0 : i32
    %c0_i32_1 = arith.constant 0 : i32
    return %c0_i32, %c0_i32_0 : i32, i32
  }
  func.func @transform_6(%arg0: i32) -> (i32, i32) {
    %c0_i32 = arith.constant 0 : i32
    %c0_i32_0 = arith.constant 0 : i32
    %c0_i32_1 = arith.constant 0 : i32
    return %c0_i32, %c0_i32_0 : i32, i32
  }
  func.func @transform_7(%arg0: i32) -> (i32, i32, i32, i32) {
    %c0_i32 = arith.constant 0 : i32
    %c0_i32_0 = arith.constant 0 : i32
    %c0_i32_1 = arith.constant 0 : i32
    %c0_i32_2 = arith.constant 0 : i32
    return %arg0, %c0_i32, %c0_i32_0, %c0_i32_1 : i32, i32, i32, i32
  }
}

</mosaic_0001>

<bundles_post_ra>
// kernel: tpu_custom_call.1
= control target key start
LH: loop header
LB: loop body
LE: loop exit
PB: predicated region body
PF: predicated region fallthrough
CT: control target
= control target key end

     0   :  { %12 = vsyncpa [#allocation4], 0  ;;  %s5663_s0 = inlined_call_operand.hbm [shape: f32[2,16,16,128], index: 0, kind: input, shape index: {}]   ;;  %s5664_s1 = inlined_call_operand.hbm [shape: f32[128,128], index: 1, kind: input, shape index: {}]   ;;  %s5665_s2 = inlined_call_operand.vmem [shape: f32[1,128], index: 2, kind: input, shape index: {}]   ;;  %s5666_s3 = inlined_call_operand.hbm [shape: f32[9,128], index: 3, kind: input, shape index: {}]   ;;  %s5667_s4 = inlined_call_operand.vmem [shape: f32[1,128], index: 4, kind: input, shape index: {}]   ;;  %s5668_s5 = inlined_call_operand.hbm [shape: f32[128,128], index: 5, kind: input, shape index: {}]   ;;  %s5669_s6 = inlined_call_operand.vmem [shape: f32[1,128], index: 6, kind: input, shape index: {}]   ;;  %s5670_s7 = inlined_call_operand.hbm [shape: f32[2,16,16,128], index: 7, kind: output, shape index: {}]  }
   0x1   :  { %14 = vsyncpa [#allocation4 + $0x1], 0 }
   0x2   :  { %15 = vsyncpa [#allocation7], 0 }
   0x3   :  { %16 = vsyncpa [#allocation10], 0 }
   0x4   :  { %17 = vsyncpa [#allocation5], 0 }
   0x5   :  { %19 = vsyncpa [#allocation5 + $0x1], 0  ;;  %s3842_s24 = smov 0   ;;  %s3844_s25 = smov 0  }
   0x6   :  { %s3846_s26 = smov 0   ;;  %s3848_s27 = smov 0  }
   0x7 LB: > { %s3863_s28 = sadd.s32 4294967295, %s3790_s27   ;;  %s3112_s29 = sadd.s32 4294967294, %s3790_s27   ;;  %s3790_s27 = sphi %s3848_s27, %s5696_s27   ;;  %s3786_s26 = sphi %s3846_s26, %s5695_s26   ;;  %s3782_s25 = sphi %s3844_s25, %s5694_s25   ;;  %s3778_s24 = sphi %s3842_s24, %s5693_s24  }
   0x8   : > { %p45_p0 = scmp.ne.s32.totalorder %s3782_s25, %s3778_s24  ;;  %p5671_p1 = scmp.eq.s32.totalorder %s3863_s28, 0 }
   0x9   : > { %p201_p3 = scmp.eq.s32.totalorder %s3112_s29, 1  ;;  %p3113_p5 = scmp.ge.s32.totalorder %s3790_s27, 1 }
   0xa   : > { %p3872_p4 = por %p5671_p1, %p45_p0  ;;  %p208_p7 = scmp.lt.s32.totalorder %s3790_s27, 3 }
   0xb   : > { %p3877_p6 = por %p201_p3, %p45_p0  ;;  %s3792_s10 = smov [#allocation6]  }
   0xc   : > { %s5675_s30 = scalar_select %p3872_p4, 1, 0 }
   0xd   : > { %s5676_s8 = scalar_select %p3877_p6, 1, 0 }
   0xe   : > { %p3882_p8 = pnand %p3113_p5, %p208_p7  ;;  %s220_s11 = sshll.u32 %s3792_s10, 4  ;;  %s3886_s11 = int_to_ptr.vmem [resolvable:$true] %s220_s11 }
   0xf   : > { %5677 = sst [smem:[#allocation16_spill]] %s5676_s8  ;;  %s3793_s13 = smov [#allocation8]  }
  0x10   : > { %s5678_s9 = scalar_select %p3882_p8, 1, 0 }
  0x11   : > { %p3482_p9 = pneg %p3882_p8  ;;  %s236_s14 = sshll.u32 %s3793_s13, 4  ;;  %s3897_s14 = int_to_ptr.vmem [resolvable:$true] %s236_s14 }
  0x12   : > { %s3794_s15 = smov [#allocation9]   ;;  %s3602_s19 = scalar_lea.hbm %s5664_s1, 2048 }
  0x13   : > { %p3893_p11 = pnand %p3482_p9, %p5671_p1  ;;  %s3899_s16 = sshll.u32 %s3794_s15, 4  ;;  %s253_s16 = int_to_ptr.vmem [resolvable:$true] %s3899_s16 }
  0x14   : > { %p3603_p12 = scmp.ne.s32.totalorder %s5664_s1, %s3602_s19  ;;  %p3609_p5 = scmp.lt.u32.totalorder %s3602_s19, %s5664_s1 }
  0x15   : > { %p3909_p13 = pneg %p3893_p11 }
  0x17   : > { %p3605_p0 = pnand %p3909_p13, %p3603_p12 }
  0x19   : > { %p3606_p3 = pneg %p3605_p0 }
  0x1b   : > { %p3611_p7 = pnand %p3609_p5, %p3606_p3 }
  0x1d   : > { %3614 = shalt.err (!%p3611_p7)
}
  0x1e   : > { %s3615_s10 = scalar_lea.vmem %s3886_s11, 2048  ;;  %p3623_p2 = scmp.lt.s32.totalorder %s3886_s11, %s3886_s11 }
  0x1f   : > { %p3616_p9 = scmp.ne.s32.totalorder %s3886_s11, %s3615_s10  ;;  %p3624_p6 = scmp.lt.s32.totalorder %s3615_s10, %s3615_s10 }
  0x21   : > { %p3618_p10 = pnand %p3616_p9, %p3909_p13  ;;  %p3625_p12 = por %p3624_p6, %p3623_p2 }
  0x23   : > { %p3619_p1 = pneg %p3618_p10 }
  0x25   : > { %p3626_p0 = pnand %p3625_p12, %p3619_p1 }
  0x27   : > { %3629 = shalt.err (!%p3626_p0)
}
  0x28   : > { %s3795_s13 = smov 128   ;;  %s3796_s15 = smov 8  }
  0x29   : > { %3485 = dma.hbm_to_vmem [thread:$0]  (!%p3893_p11), %s5664_s1, 2048, %s3886_s11, [#allocation7], %s3795_s13, %s3795_s13, %s3796_s15  }
  0x2a   : > { %s3630_s21 = scalar_lea.hbm %s5666_s3, 256 }
  0x2b   : > { %p3631_p1 = scmp.ne.s32.totalorder %s5666_s3, %s3630_s21  ;;  %p3637_p10 = scmp.lt.u32.totalorder %s3630_s21, %s5666_s3 }
  0x2d   : > { %p3633_p2 = pnand %p3631_p1, %p3909_p13 }
  0x2f   : > { %p3634_p6 = pneg %p3633_p2 }
  0x31   : > { %p3639_p3 = pnand %p3637_p10, %p3634_p6 }
  0x33   : > { %3642 = shalt.err (!%p3639_p3)
}
  0x34   : > { %s3643_s11 = scalar_lea.vmem %s3897_s14, 256  ;;  %p3651_p12 = scmp.lt.s32.totalorder %s3897_s14, %s3897_s14 }
  0x35   : > { %p3644_p5 = scmp.ne.s32.totalorder %s3897_s14, %s3643_s11  ;;  %p3652_p0 = scmp.lt.s32.totalorder %s3643_s11, %s3643_s11 }
  0x37   : > { %p3646_p7 = pnand %p3644_p5, %p3909_p13  ;;  %p3653_p1 = por %p3652_p0, %p3651_p12 }
  0x39   : > { %p3647_p9 = pneg %p3646_p7 }
  0x3b   : > { %p3654_p2 = pnand %p3653_p1, %p3647_p9 }
  0x3d   : > { %3657 = shalt.err (!%p3654_p2)
}
  0x3e   : > { %3488 = dma.hbm_to_vmem [thread:$0]  (!%p3893_p11), %s5666_s3, 256, %s3897_s14, [#allocation7], %s3795_s13, %s3795_s13, %s3796_s15  }
  0x3f   : > { %s3658_s20 = scalar_lea.hbm %s5668_s5, 2048 }
  0x40   : > { %p3659_p6 = scmp.ne.s32.totalorder %s5668_s5, %s3658_s20  ;;  %p3665_p5 = scmp.lt.u32.totalorder %s3658_s20, %s5668_s5 }
  0x42   : > { %p3661_p10 = pnand %p3659_p6, %p3909_p13 }
  0x44   : > { %p3662_p3 = pneg %p3661_p10 }
  0x46   : > { %p3667_p7 = pnand %p3665_p5, %p3662_p3 }
  0x48   : > { %3670 = shalt.err (!%p3667_p7)
}
  0x49   : > { %s3671_s11 = scalar_lea.vmem %s253_s16, 2048  ;;  %p3679_p1 = scmp.lt.s32.totalorder %s253_s16, %s253_s16 }
  0x4a   : > { %p3672_p9 = scmp.ne.s32.totalorder %s253_s16, %s3671_s11  ;;  %p3680_p2 = scmp.lt.s32.totalorder %s3671_s11, %s3671_s11 }
  0x4c   : > { %p3674_p12 = pnand %p3672_p9, %p3909_p13  ;;  %p3681_p4 = por %p3680_p2, %p3679_p1 }
  0x4e   : > { %p3675_p0 = pneg %p3674_p12 }
  0x50   : > { %p3682_p8 = pnand %p3681_p4, %p3675_p0 }
  0x52   : > { %3685 = shalt.err (!%p3682_p8)
}
  0x53   : > { %3491 = dma.hbm_to_vmem [thread:$0]  (!%p3893_p11), %s5668_s5, 2048, %s253_s16, [#allocation10], %s3795_s13, %s3795_s13, %s3796_s15  }
  0x54   : > { %s3982_s22 = sadd.s32 1, %s3790_s27   ;;  %s32_s17 = sadd.s32 1, %s3786_s26 }
  0x55   : > { %s29_s12 = ssub.s32 %s3790_s27, %s3982_s22  ;;  %p39_p8 = scmp.ne.s32.totalorder %s3786_s26, %s3782_s25 }
  0x56   : > { %p30_p4 = scmp.eq.s32.totalorder %s29_s12, 0  ;;  %p40_p13 = scmp.eq.s32.totalorder %s3790_s27, 0 }
  0x57   : > { %p3503_p6 = scmp.lt.s32.totalorder %s3790_s27, 2  ;;  %p5681_p3 = scmp.eq.s32.totalorder %s3863_s28, 1 }
  0x58   : > { %s3992_s18 = scalar_select %p30_p4, %s3786_s26, %s32_s17  }
  0x59   : > { %p41_p10 = por %p40_p13, %p39_p8  ;;  %p3996_p5 = por %p5681_p3, %p39_p8 }
  0x5a   : > { %s269_s20 = sand.u32 1, %s3786_s26   ;;  %s3144_s21 = sshll.u32 %s3790_s27, 12 }
  0x5b   : > { %s3118_s16 = sshll.u32 %s269_s20, 8  ;;  %s4005_s10 = scalar_lea.hbm %s5663_s0, %s3144_s21 }
  0x5c   : > { %s273_s11 = scalar_lea.vmem [#allocation3], %s3118_s16  ;;  %p4007_p11 = pnand %p3503_p6, %p41_p10 }
  0x5d   : > { %s280_s14 = sshll.u32 %s273_s11, 4  ;;  %s4013_s12 = scalar_lea.sflag [#allocation4], %s269_s20  ;;  %s4011_s14 = int_to_ptr.vmem [resolvable:$true] %s280_s14 }
  0x5e   : > { %s3686_s17 = scalar_lea.hbm %s4005_s10, 4096  ;;  %p3688_p9 = pneg %p4007_p11 }
  0x5f   : > { %p3687_p7 = scmp.ne.s32.totalorder %s4005_s10, %s3686_s17  ;;  %s3691_s23 = scalar_lea.hbm %s5663_s0, 8192 }
  0x60   : > { %p3692_p1 = scmp.lt.u32.totalorder %s4005_s10, %s5663_s0  ;;  %p3693_p2 = scmp.lt.u32.totalorder %s3691_s23, %s3686_s17 }
  0x61   : > { %p3689_p12 = pnand %p3688_p9, %p3687_p7  ;;  %p3695_p8 = scmp.lt.u32.totalorder %s3686_s17, %s4005_s10 }
  0x62   : > { %p3694_p4 = por %p3693_p2, %p3692_p1 }
  0x63   : > { %p3690_p0 = pneg %p3689_p12 }
  0x64   : > { %p3696_p13 = por %p3695_p8, %p3694_p4 }
  0x66   : > { %p3697_p6 = pnand %p3696_p13, %p3690_p0 }
  0x68   : > { %3700 = shalt.err (!%p3697_p6)
}
  0x69   : > { %s3701_s20 = scalar_lea.vmem %s4011_s14, 4096  ;;  %s3797_s21 = smov [#allocation3]  }
  0x6a   : > { %p3702_p10 = scmp.ne.s32.totalorder %s4011_s14, %s3701_s20  ;;  %s3706_s16 = sshll.u32 %s3797_s21, 4  ;;  %s3707_s16 = int_to_ptr.vmem [resolvable:$false] %s3706_s16 }
  0x6b   : > { %s3708_s29 = scalar_lea.vmem %s3707_s16, 8192  ;;  %p3709_p12 = scmp.lt.s32.totalorder %s4011_s14, %s3707_s16 }
  0x6c   : > { %p3704_p3 = pnand %p3702_p10, %p3688_p9  ;;  %p3710_p1 = scmp.lt.s32.totalorder %s3708_s29, %s3701_s20 }
  0x6e   : > { %p3705_p7 = pneg %p3704_p3  ;;  %p3711_p2 = por %p3710_p1, %p3709_p12 }
  0x70   : > { %p3712_p4 = pnand %p3711_p2, %p3705_p7 }
  0x72   : > { %3715 = shalt.err (!%p3712_p4)
}
  0x73   : > { %3495 = dma.hbm_to_vmem [thread:$0]  (!%p4007_p11), %s4005_s10, 4096, %s4011_s14, %s4013_s12, %s3795_s13, %s3795_s13, %s3796_s15  }
  0x74   : > { %p5684_p9 = scmp.ne.s32.totalorder %s5678_s9, 0 }
  0x75   : > { %s4047_s17 = sand.u32 (!%p5684_p9), 1, %s3782_s25   ;;  %p5685_p0 = scmp.ne.s32.totalorder (!%p5684_p9), %s5675_s30, 0 }
  0x76   : > { %292 = sbr.rel (%p5684_p9) target bundleno = 957 (0x3bd), region = 48  ;;  %s3122_s23 = sshll.u32 (!%p5684_p9), %s4047_s17, 8 }
  0x77   : > { %s295_s11 = scalar_lea.sflag (!%p5684_p9), [#allocation4], %s4047_s17  ;;  %s4053_s8 = scalar_lea.vmem (!%p5684_p9), [#allocation3], %s3122_s23 }
  0x7d   : > { %3761 = dma.done.wait (%p5685_p0), %s295_s11, 4096  }
  0x7e   : > { %3763 = vsyncadd (%p5685_p0), %s295_s11, 4294963200  ;;  %p5686_p11 = scmp.eq.s32.totalorder %s3863_s28, 0 }
  0x80   : > { %3765 = dma.done.wait (%p5686_p11), [#allocation7], 2304   ;;  %p5687_p8 = pmov %p5686_p11 }
  0x82   : > { %3767 = vsyncadd (%p5687_p8), [#allocation7], 4294964992  ;;  %p5688_p13 = pmov %p5687_p8 }
  0x83   : > { %p5689_p6 = pmov %p5687_p8 }
  0x84   : > { %3769 = dma.done.wait (%p5688_p13), [#allocation10], 2048  }
  0x85   : > { %3771 = vsyncadd (%p5689_p6), [#allocation10], 4294965248  ;;  %v373_v0 = vld [vmem:[#allocation6] sm:$0xff]  ;;  %v374_v1 = vld [vmem:[#allocation6 + $0x8] sm:$0xff]  ;;  %v3798_v56 = vmov 0.0   ;;  %vm975_vm0 = vcmask 1046528  }
  0x86   : > { %v375_v2 = vld [vmem:[#allocation6 + $0x10] sm:$0xff]  ;;  %v3402_v3 = vpack.c.bf16 %v374_v1, %v373_v0  ;;  %v376_v4 = vld [vmem:[#allocation6 + $0x18] sm:$0xff]  ;;  %v377_v6 = vld [vmem:[#allocation6 + $0x20] sm:$0xff]  ;;  %685 = vst [vmem:[#allocation2] sm:$0xff] %v3798_v56  ;;  %vm1221_vm1 = vcmask 1045504   ;;  %s5510_s30 = scalar_lea.vmem [#allocation11], %s3122_s23 }
  0x87   : > { %v3406_v5 = vpack.c.bf16 %v376_v4, %v375_v2  ;;  %v378_v7 = vld [vmem:[#allocation6 + $0x28] sm:$0xff]  ;;  %v341_v9 = vld [vmem:[%s4053_s8] sm:$0xff]  ;;  %v379_v10 = vld [vmem:[#allocation6 + $0x30] sm:$0xff]  ;;  %693 = vst [vmem:[#allocation2 + $0x18] sm:$0x1] %v3798_v56  ;;  %s3145_s23 = sshll.u32 %s3863_s28, 12 }
  0x88   : > { %3403 = vmatprep.subr.bf16.mxu0 %v3402_v3  ;;  %v3410_v8 = vpack.c.bf16 %v378_v7, %v377_v6  ;;  %v380_v11 = vld [vmem:[#allocation6 + $0x38] sm:$0xff]  ;;  %3274 = vmatprep.mubr.f32.mxu0 %v341_v9  ;;  %v381_v13 = vld [vmem:[#allocation6 + $0x40] sm:$0xff]  ;;  %v382_v14 = vld [vmem:[#allocation6 + $0x48] sm:$0xff]  ;;  %694 = vst [vmem:[#allocation2 + $0x30] sm:$0x1] %v3798_v56  ;;  %s3010_s9 = sshll.u32 %s5510_s30, 4  ;;  %s5614_s10 = scalar_lea.hbm %s5670_s7, %s3145_s23  ;;  %s5616_s9 = int_to_ptr.vmem [resolvable:$true] %s3010_s9 }
  0x89   : > { %3405 = vmatpush3.bf16.msra.mxu0 %v3402_v3  ;;  %v3414_v12 = vpack.c.bf16 %v380_v11, %v379_v10  ;;  %v3418_v15 = vpack.c.bf16 %v382_v14, %v381_v13  ;;  %v383_v16 = vld [vmem:[#allocation6 + $0x50] sm:$0xff]  ;;  %v384_v17 = vld [vmem:[#allocation6 + $0x58] sm:$0xff]  ;;  %v385_v19 = vld [vmem:[#allocation6 + $0x60] sm:$0xff]  ;;  %687 = vst [vmem:[#allocation2 + $0x10] sm:$0x3] %v3798_v56  ;;  %s2997_s28 = scalar_lea.sflag [#allocation5], %s4047_s17 }
  0x8a   : > { %3407 = vmatprep.subr.bf16.mxu0 %v3406_v5  ;;  %v3422_v18 = vpack.c.bf16 %v384_v17, %v383_v16  ;;  %v386_v20 = vld [vmem:[#allocation6 + $0x68] sm:$0xff]  ;;  %v387_v22 = vld [vmem:[#allocation6 + $0x70] sm:$0xff]  ;;  %v388_v23 = vld [vmem:[#allocation6 + $0x78] sm:$0xff]  ;;  %691 = vst [vmem:[#allocation2 + $0x1a8] sm:$0x3] %v3798_v56  ;;  %s3716_s14 = scalar_lea.vmem %s5616_s9, 4096 }
  0x8b   : > { %v3426_v21 = vpack.c.bf16 %v386_v20, %v385_v19  ;;  %v3430_v24 = vpack.c.bf16 %v388_v23, %v387_v22  ;;  %v342_v25 = vld [vmem:[%s4053_s8 + $0x8] sm:$0xff]  ;;  %v343_v26 = vld [vmem:[%s4053_s8 + $0x10] sm:$0xff]  ;;  %v344_v27 = vld [vmem:[%s4053_s8 + $0x18] sm:$0xff]  ;;  %695 = vst [vmem:[#allocation2 + $0x48] sm:$0x1] %v3798_v56  ;;  %p3717_p10 = scmp.ne.s32.totalorder %s5616_s9, %s3716_s14  ;;  %s3799_s12 = smov [#allocation11]  }
  0x8c   : > { %v345_v28 = vld [vmem:[%s4053_s8 + $0x20] sm:$0xff]  ;;  %v346_v29 = vld [vmem:[%s4053_s8 + $0x28] sm:$0xff]  ;;  %v347_v30 = vld [vmem:[%s4053_s8 + $0x30] sm:$0xff]  ;;  %696 = vst [vmem:[#allocation2 + $0x60] sm:$0x1] %v3798_v56  ;;  %s3720_s20 = sshll.u32 %s3799_s12, 4  ;;  %s3721_s20 = int_to_ptr.vmem [resolvable:$false] %s3720_s20 }
  0x8d   : > { %3409 = vmatpush3.bf16.msra.mxu0 %v3406_v5  ;;  %v348_v31 = vld [vmem:[%s4053_s8 + $0x38] sm:$0xff]  ;;  %v349_v32 = vld [vmem:[%s4053_s8 + $0x40] sm:$0xff]  ;;  %v350_v33 = vld [vmem:[%s4053_s8 + $0x48] sm:$0xff]  ;;  %697 = vst [vmem:[#allocation2 + $0x78] sm:$0x1] %v3798_v56  ;;  %p3718_p3 = pnand %p3717_p10, %p3996_p5  ;;  %s3722_s21 = scalar_lea.vmem %s3721_s20, 8192 }
  0x8e   : > { %3411 = vmatprep.subr.bf16.mxu0 %v3410_v8  ;;  %v351_v34 = vld [vmem:[%s4053_s8 + $0x50] sm:$0xff]  ;;  %v352_v35 = vld [vmem:[%s4053_s8 + $0x58] sm:$0xff]  ;;  %v353_v36 = vld [vmem:[%s4053_s8 + $0x60] sm:$0xff]  ;;  %698 = vst [vmem:[#allocation2 + $0x90] sm:$0x1] %v3798_v56  ;;  %p3723_p12 = scmp.lt.s32.totalorder %s5616_s9, %s3721_s20  ;;  %p3724_p1 = scmp.lt.s32.totalorder %s3722_s21, %s3716_s14 }
  0x8f   : > { %v354_v37 = vld [vmem:[%s4053_s8 + $0x68] sm:$0xff]  ;;  %v355_v38 = vld [vmem:[%s4053_s8 + $0x70] sm:$0xff]  ;;  %v356_v39 = vld [vmem:[%s4053_s8 + $0x78] sm:$0xff]  ;;  %699 = vst [vmem:[#allocation2 + $0xa8] sm:$0x1] %v3798_v56  ;;  %p3719_p7 = pneg %p3718_p3 }
  0x90   : > { %v357_v40 = vld [vmem:[%s4053_s8 + $0x80] sm:$0xff]  ;;  %v358_v41 = vld [vmem:[%s4053_s8 + $0x88] sm:$0xff]  ;;  %v359_v42 = vld [vmem:[%s4053_s8 + $0x90] sm:$0xff]  ;;  %700 = vst [vmem:[#allocation2 + $0xc0] sm:$0x1] %v3798_v56  ;;  %p3725_p2 = por %p3724_p1, %p3723_p12 }
  0x91   : > { %3413 = vmatpush3.bf16.msra.mxu0 %v3410_v8  ;;  %v360_v43 = vld [vmem:[%s4053_s8 + $0x98] sm:$0xff]  ;;  %v361_v44 = vld [vmem:[%s4053_s8 + $0xa0] sm:$0xff]  ;;  %v362_v45 = vld [vmem:[%s4053_s8 + $0xa8] sm:$0xff]  ;;  %701 = vst [vmem:[#allocation2 + $0xd8] sm:$0x1] %v3798_v56 }
  0x92   : > { %3415 = vmatprep.subr.bf16.mxu0 %v3414_v12  ;;  %v363_v46 = vld [vmem:[%s4053_s8 + $0xb0] sm:$0xff]  ;;  %v364_v47 = vld [vmem:[%s4053_s8 + $0xb8] sm:$0xff]  ;;  %v365_v48 = vld [vmem:[%s4053_s8 + $0xc0] sm:$0xff]  ;;  %702 = vst [vmem:[#allocation2 + $0xf0] sm:$0x1] %v3798_v56  ;;  %p3726_p4 = pnand %p3725_p2, %p3719_p7 }
  0x93   : > { %v366_v49 = vld [vmem:[%s4053_s8 + $0xc8] sm:$0xff]  ;;  %v367_v50 = vld [vmem:[%s4053_s8 + $0xd0] sm:$0xff]  ;;  %v368_v51 = vld [vmem:[%s4053_s8 + $0xd8] sm:$0xff]  ;;  %703 = vst [vmem:[#allocation2 + $0x108] sm:$0x1] %v3798_v56 }
  0x94   : > { %v369_v52 = vld [vmem:[%s4053_s8 + $0xe0] sm:$0xff]  ;;  %v370_v53 = vld [vmem:[%s4053_s8 + $0xe8] sm:$0xff]  ;;  %v371_v54 = vld [vmem:[%s4053_s8 + $0xf0] sm:$0xff]  ;;  %704 = vst [vmem:[#allocation2 + $0x120] sm:$0x1] %v3798_v56 }
  0x95   : > { %3417 = vmatpush3.bf16.msra.mxu0 %v3414_v12  ;;  %v372_v55 = vld [vmem:[%s4053_s8 + $0xf8] sm:$0xff]  ;;  %705 = vst [vmem:[#allocation2 + $0x138] sm:$0x1] %v3798_v56  ;;  %706 = vst [vmem:[#allocation2 + $0x150] sm:$0x1] %v3798_v56  ;;  %v2684_v57 = vld [vmem:[#allocation9] sm:$0xff] }
  0x96   : > { %3419 = vmatprep.subr.bf16.mxu0 %v3418_v15  ;;  %707 = vst [vmem:[#allocation2 + $0x168] sm:$0x1] %v3798_v56  ;;  %708 = vst [vmem:[#allocation2 + $0x180] sm:$0x1] %v3798_v56  ;;  %v2685_v58 = vld [vmem:[#allocation9 + $0x8] sm:$0xff]  ;;  %v2686_v60 = vld [vmem:[#allocation9 + $0x10] sm:$0xff] }
  0x97   : > { %709 = vst [vmem:[#allocation2 + $0x29] sm:$0x1] %v3798_v56  ;;  %710 = vst [vmem:[#allocation2 + $0x41] sm:$0x1] %v3798_v56  ;;  %v3434_v59 = vpack.c.bf16 %v2685_v58, %v2684_v57  ;;  %v2687_v61 = vld [vmem:[#allocation9 + $0x18] sm:$0xff]  ;;  %v2688_v63 = vld [vmem:[#allocation9 + $0x20] sm:$0xff] }
  0x98   : > { %711 = vst [vmem:[#allocation2 + $0x59] sm:$0x1] %v3798_v56  ;;  %712 = vst [vmem:[#allocation2 + $0x71] sm:$0x1] %v3798_v56  ;;  %v3438_v62 = vpack.c.bf16 %v2687_v61, %v2686_v60  ;;  %v2689_v0 = vld [vmem:[#allocation9 + $0x28] sm:$0xff]  ;;  %v2690_v2 = vld [vmem:[#allocation9 + $0x30] sm:$0xff] }
  0x99   : > { %3421 = vmatpush3.bf16.msra.mxu0 %v3418_v15  ;;  %713 = vst [vmem:[#allocation2 + $0x89] sm:$0x1] %v3798_v56  ;;  %714 = vst [vmem:[#allocation2 + $0xa1] sm:$0x1] %v3798_v56  ;;  %3435 = vmatprep.subr.bf16.mxu1 %v3434_v59  ;;  %v3442_v1 = vpack.c.bf16 %v2689_v0, %v2688_v63  ;;  %v2691_v3 = vld [vmem:[#allocation9 + $0x38] sm:$0xff]  ;;  %v2692_v5 = vld [vmem:[#allocation9 + $0x40] sm:$0xff] }
  0x9a   : > { %3423 = vmatprep.subr.bf16.mxu0 %v3422_v18  ;;  %715 = vst [vmem:[#allocation2 + $0xb9] sm:$0x1] %v3798_v56  ;;  %716 = vst [vmem:[#allocation2 + $0xd1] sm:$0x1] %v3798_v56  ;;  %3437 = vmatpush3.bf16.msra.mxu1 %v3434_v59  ;;  %v3446_v4 = vpack.c.bf16 %v2691_v3, %v2690_v2  ;;  %v2693_v6 = vld [vmem:[#allocation9 + $0x48] sm:$0xff]  ;;  %v2694_v8 = vld [vmem:[#allocation9 + $0x50] sm:$0xff] }
  0x9b   : > { %717 = vst [vmem:[#allocation2 + $0xe9] sm:$0x1] %v3798_v56  ;;  %718 = vst [vmem:[#allocation2 + $0x101] sm:$0x1] %v3798_v56  ;;  %3439 = vmatprep.subr.bf16.mxu1 %v3438_v62  ;;  %v3450_v7 = vpack.c.bf16 %v2693_v6, %v2692_v5  ;;  %v2695_v9 = vld [vmem:[#allocation9 + $0x58] sm:$0xff]  ;;  %v2696_v11 = vld [vmem:[#allocation9 + $0x60] sm:$0xff] }
  0x9c   : > { %719 = vst [vmem:[#allocation2 + $0x119] sm:$0x1] %v3798_v56  ;;  %720 = vst [vmem:[#allocation2 + $0x131] sm:$0x1] %v3798_v56  ;;  %v3454_v10 = vpack.c.bf16 %v2695_v9, %v2694_v8  ;;  %v2697_v12 = vld [vmem:[#allocation9 + $0x68] sm:$0xff]  ;;  %v2698_v14 = vld [vmem:[#allocation9 + $0x70] sm:$0xff] }
  0x9d   : > { %3425 = vmatpush3.bf16.msra.mxu0 %v3422_v18  ;;  %721 = vst [vmem:[#allocation2 + $0x149] sm:$0x1] %v3798_v56  ;;  %722 = vst [vmem:[#allocation2 + $0x161] sm:$0x1] %v3798_v56  ;;  %v3458_v13 = vpack.c.bf16 %v2697_v12, %v2696_v11  ;;  %v2699_v15 = vld [vmem:[#allocation9 + $0x78] sm:$0xff] }
  0x9e   : > { %3427 = vmatprep.subr.bf16.mxu0 %v3426_v21  ;;  %723 = vst [vmem:[#allocation2 + $0x179] sm:$0x1] %v3798_v56  ;;  %724 = vst [vmem:[#allocation2 + $0x191] sm:$0x1] %v3798_v56  ;;  %3441 = vmatpush3.bf16.msra.mxu1 %v3438_v62  ;;  %v3462_v16 = vpack.c.bf16 %v2699_v15, %v2698_v14  ;;  %v4099_v17 = vld [vmem:[#allocation8 + $0x1] ss:$0 sm:$0xff] }
  0x9f   : > { %3443 = vmatprep.subr.bf16.mxu1 %v3442_v1  ;;  %v759_v18 = vld [vmem:[#allocation2 + $0x10] sm:$0x3]  ;;  %v4104_v19 = vld [vmem:[%s5665_s2] ss:$0 sm:$0xff]  ;;  %v879_v20 = vmul.f32 0.0, %v4099_v17 }
  0xa0   : > { %v4107_v22 = vld [vmem:[#allocation8 + $0x2] ss:$0 sm:$0xff]  ;;  %v881_v23 = vmul.f32 %v4099_v17, %v759_v18  ;;  %v4122_v57 = vld [vmem:[#allocation8 + $0x4] ss:$0 sm:$0xff]  ;;  %v4124_v58 = vld [vmem:[#allocation8 + $0x5] ss:$0 sm:$0xff] }
  0xa1   : > { %3429 = vmatpush3.bf16.msra.mxu0 %v3426_v21  ;;  %v4128_v63 = vld [vmem:[#allocation8 + $0x3] ss:$0 sm:$0xff] }
  0xa2   : > { %3431 = vmatprep.subr.bf16.mxu0 %v3430_v24  ;;  %3445 = vmatpush3.bf16.msra.mxu1 %v3442_v1 }
  0xa3   : > { %3447 = vmatprep.subr.bf16.mxu1 %v3446_v4 }
  0xa5   : > { %3433 = vmatpush3.bf16.msra.mxu0 %v3430_v24 }
  0xa6   : > { %3449 = vmatpush3.bf16.msra.mxu1 %v3446_v4 }
  0xa7   : > { %3451 = vmatprep.subr.bf16.mxu1 %v3450_v7 }
  0xa8   : > { %3275 = vmatmul.mubr.f32.vlgmr.msra.gmra.mrb[0].mxu0 %v342_v25 }
  0xa9   : > { %3277 = vmatprep.mubr.f32.mxu0 %v343_v26 }
  0xaa   : > { %3453 = vmatpush3.bf16.msra.mxu1 %v3450_v7 }
  0xab   : > { %3455 = vmatprep.subr.bf16.mxu1 %v3454_v10 }
  0xac   : > { %3278 = vmatmul.mubr.f32.gmra.mrb[2].mxu0 %v344_v27 }
  0xad   : > { %3280 = vmatprep.mubr.f32.mxu0 %v345_v28  ;;  %v4112_v28 = vld [vmem:[#allocation8] ss:$0 sm:$0xff] }
  0xae   : > { %3457 = vmatpush3.bf16.msra.mxu1 %v3454_v10 }
  0xaf   : > { %3459 = vmatprep.subr.bf16.mxu1 %v3458_v13 }
  0xb0   : > { %3281 = vmatmul.mubr.f32.gmra.mrb[4].mxu0 %v346_v29  ;;  %v976_v29 = vrot.slane %v879_v20, 1 }
  0xb1   : > { %3283 = vmatprep.mubr.f32.mxu0 %v347_v30  ;;  %v1125_v30 = vmul.f32 0.0, %v4107_v22 }
  0xb2   : > { %3461 = vmatpush3.bf16.msra.mxu1 %v3458_v13 }
  0xb3   : > { %3463 = vmatprep.subr.bf16.mxu1 %v3462_v16 }
  0xb4   : > { %3284 = vmatmul.mubr.f32.gmra.mrb[6].mxu0 %v348_v31 }
  0xb5   : > { %3286 = vmatprep.mubr.f32.mxu0 %v349_v32 }
  0xb6   : > { %3465 = vmatpush3.bf16.msra.mxu1 %v3462_v16 }
  0xb8   : > { %3287 = vmatmul.mubr.f32.gmra.mrb[8].mxu0 %v350_v33  ;;  %v979_v33 = vrot.slane %v881_v23, 1  ;;  %v4156_v23 = vld [vmem:[#allocation8 + $0x6] ss:$0 sm:$0xff] }
  0xb9   : > { %3289 = vmatprep.mubr.f32.mxu0 %v351_v34  ;;  %v1127_v34 = vmul.f32 %v4107_v22, %v759_v18 }
  0xbc   : > { %3290 = vmatmul.mubr.f32.gmra.mrb[10].mxu0 %v352_v35 }
  0xbd   : > { %3292 = vmatprep.mubr.f32.mxu0 %v353_v36 }
  0xc0   : > { %3293 = vmatmul.mubr.f32.gmra.mrb[12].mxu0 %v354_v37 }
  0xc1   : > { %3295 = vmatprep.mubr.f32.mxu0 %v355_v38 }
  0xc4   : > { %3296 = vmatmul.mubr.f32.gmra.mrb[14].mxu0 %v356_v39 }
  0xc5   : > { %3298 = vmatprep.mubr.f32.mxu0 %v357_v40  ;;  %v810_v40 = vmul.f32 0.0, %v4112_v28 }
  0xc8   : > { %3299 = vmatmul.mubr.f32.gmra.mrb[16].mxu0 %v358_v41 }
  0xc9   : > { %3301 = vmatprep.mubr.f32.mxu0 %v359_v42  ;;  %v1222_v42 = vrot.slane %v1125_v30, 2 }
  0xcc   : > { %3302 = vmatmul.mubr.f32.gmra.mrb[18].mxu0 %v360_v43 }
  0xcd   : > { %3304 = vmatprep.mubr.f32.mxu0 %v361_v44 }
  0xd0   : > { %3305 = vmatmul.mubr.f32.gmra.mrb[20].mxu0 %v362_v45  ;;  %v980_v45 = vsel %vm975_vm0, %v976_v29, %v979_v33 }
  0xd1   : > { %3307 = vmatprep.mubr.f32.mxu0 %v363_v46  ;;  %v1225_v46 = vrot.slane %v1127_v34, 2 }
  0xd3   : > { %v1226_v59 = vsel %vm1221_vm1, %v1222_v42, %v1225_v46 }
  0xd4   : > { %3308 = vmatmul.mubr.f32.gmra.mrb[22].mxu0 %v364_v47 }
  0xd5   : > { %3310 = vmatprep.mubr.f32.mxu0 %v365_v48 }
  0xd8   : > { %3311 = vmatmul.mubr.f32.gmra.mrb[24].mxu0 %v366_v49 }
  0xd9   : > { %3313 = vmatprep.mubr.f32.mxu0 %v367_v50 }
  0xdc   : > { %3314 = vmatmul.mubr.f32.gmra.mrb[26].mxu0 %v368_v51 }
  0xdd   : > { %3316 = vmatprep.mubr.f32.mxu0 %v369_v52  ;;  %v1088_v52 = vadd.f32 %v976_v29, %v810_v40 }
  0xdf   : > { %v1334_v2 = vadd.f32 %v1222_v42, %v1088_v52 }
  0xe0   : > { %3317 = vmatmul.mubr.f32.gmra.mrb[28].mxu0 %v370_v53 }
  0xe1   : > { %3319 = vmatprep.mubr.f32.mxu0 %v371_v54  ;;  %v1089_v54 = vadd.f32 %v980_v45, %v810_v40 }
  0xe3   : > { %v4135_v7 = vadd.f32 %v1226_v59, %v1089_v54 }
  0xe4   : > { %3320 = vmatmul.mubr.f32.gmra.mrb[30].mxu0 %v372_v55 }
 0x17b   : > { %v3276_v21 = vpop.f32.mrb[0].mxu0 }
 0x17c   : > { %v468_v24 = vadd.f32 %v3276_v21, %v4104_v19  ;;  %v462_v25 = vpop.f32.mrb[1].mxu0 }
 0x17d   : > { %v463_v26 = vadd.f32 %v4104_v19, %v462_v25 }
 0x17e   : > { %v622_v27 = vmax.f32 %v468_v24, 0.0  ;;  %v4158_v24 = vld [vmem:[#allocation8 + $0x7] ss:$0 sm:$0xff] }
 0x17f   : > { %v621_v31 = vmax.f32 %v463_v26, 0.0  ;;  %v3279_v32 = vpop.f32.mrb[2].mxu0 }
 0x180   : > { %v654_v35 = vmin.f32 %v622_v27, 6.0  ;;  %v478_v36 = vadd.f32 %v3279_v32, %v4104_v19  ;;  %v472_v37 = vpop.f32.mrb[3].mxu0 }
 0x181   : > { %v653_v38 = vmin.f32 %v621_v31, 6.0  ;;  %v473_v39 = vadd.f32 %v4104_v19, %v472_v37 }
 0x182   : > { %726 = vst [vmem:[#allocation2 + $0x21] sm:$0xff] %v654_v35  ;;  %v624_v41 = vmax.f32 %v478_v36, 0.0 }
 0x183   : > { %725 = vst [vmem:[#allocation2 + $0x19] sm:$0xff] %v653_v38  ;;  %v623_v43 = vmax.f32 %v473_v39, 0.0  ;;  %v3282_v44 = vpop.f32.mrb[4].mxu0 }
 0x184   : > { %v656_v47 = vmin.f32 %v624_v41, 6.0  ;;  %v488_v48 = vadd.f32 %v3282_v44, %v4104_v19  ;;  %v482_v49 = vpop.f32.mrb[5].mxu0  ;;  %v4174_v41 = vld [vmem:[#allocation8 + $0x8] ss:$0 sm:$0xff] }
 0x185   : > { %v655_v50 = vmin.f32 %v623_v43, 6.0  ;;  %v483_v51 = vadd.f32 %v4104_v19, %v482_v49 }
 0x186   : > { %728 = vst [vmem:[#allocation2 + $0x39] sm:$0xff] %v656_v47  ;;  %v626_v53 = vmax.f32 %v488_v48, 0.0 }
 0x187   : > { %727 = vst [vmem:[#allocation2 + $0x31] sm:$0xff] %v655_v50  ;;  %v625_v55 = vmax.f32 %v483_v51, 0.0  ;;  %v3285_v56 = vpop.f32.mrb[6].mxu0 }
 0x188   : > { %v658_v60 = vmin.f32 %v626_v53, 6.0  ;;  %v498_v61 = vadd.f32 %v3285_v56, %v4104_v19  ;;  %v492_v62 = vpop.f32.mrb[7].mxu0 }
 0x189   : > { %v657_v0 = vmin.f32 %v625_v55, 6.0  ;;  %v493_v1 = vadd.f32 %v4104_v19, %v492_v62  ;;  %v1368_v3 = vld [vmem:[#allocation2 + $0x28] sm:$0x3] }
 0x18a   : > { %730 = vst [vmem:[#allocation2 + $0x51] sm:$0xff] %v658_v60  ;;  %v628_v4 = vmax.f32 %v498_v61, 0.0  ;;  %v4131_v5 = vld [vmem:[#allocation2 + $0x18] sm:$0xff]  ;;  %v4133_v6 = vld [vmem:[#allocation2 + $0x20] sm:$0xff]  ;;  %v4138_v8 = vmul.f32 %v4122_v57, %v1368_v3  ;;  %v4141_v9 = vmul.f32 %v4124_v58, %v1368_v3 }
 0x18b   : > { %729 = vst [vmem:[#allocation2 + $0x49] sm:$0xff] %v657_v0  ;;  %v627_v10 = vmax.f32 %v493_v1, 0.0  ;;  %v3288_v11 = vpop.f32.mrb[8].mxu0  ;;  %v1419_v12 = vmul.f32 %v4128_v63, %v4131_v5  ;;  %v1488_v13 = vmul.f32 %v4122_v57, %v4131_v5  ;;  %v1489_v14 = vmul.f32 %v4122_v57, %v4133_v6 }
 0x18c   : > { %v660_v15 = vmin.f32 %v628_v4, 6.0  ;;  %v508_v16 = vadd.f32 %v3288_v11, %v4104_v19  ;;  %v502_v18 = vpop.f32.mrb[9].mxu0  ;;  %v1733_v20 = vmul.f32 %v4124_v58, %v4131_v5  ;;  %v4154_v21 = vmul.f32 %v4124_v58, %v4133_v6 }
 0x18d   : > { %v659_v25 = vmin.f32 %v627_v10, 6.0  ;;  %v503_v26 = vadd.f32 %v4104_v19, %v502_v18  ;;  %v1451_v27 = vadd.f32 %v1419_v12, %v1334_v2  ;;  %v1584_v29 = vrot.slane %v1488_v13, 1 }
 0x18e   : > { %732 = vst [vmem:[#allocation2 + $0x69] sm:$0xff] %v660_v15  ;;  %v630_v30 = vmax.f32 %v508_v16, 0.0  ;;  %v1585_v31 = vrot.slane %v1489_v14, 1  ;;  %v1829_v32 = vrot.slane %v1733_v20, 2  ;;  %v1830_v33 = vrot.slane %v4154_v21, 2  ;;  %v4162_v34 = vld [vmem:[#allocation2 + $0x30] sm:$0xff] }
 0x18f   : > { %v4164_v35 = vld [vmem:[#allocation2 + $0x38] sm:$0xff]  ;;  %731 = vst [vmem:[#allocation2 + $0x61] sm:$0xff] %v659_v25  ;;  %v629_v36 = vmax.f32 %v503_v26, 0.0  ;;  %v3291_v37 = vpop.f32.mrb[10].mxu0  ;;  %v2027_v38 = vmul.f32 %v4156_v23, %v4162_v34  ;;  %v2096_v39 = vmul.f32 %v4158_v24, %v4162_v34  ;;  %v2341_v53 = vmul.f32 %v4174_v41, %v4162_v34  ;;  %v1976_v16 = vld [vmem:[#allocation2 + $0x40] sm:$0x3] }
 0x190   : > { %v4172_v40 = vmul.f32 %v4158_v24, %v4164_v35  ;;  %v662_v42 = vmin.f32 %v630_v30, 6.0  ;;  %v518_v43 = vadd.f32 %v3291_v37, %v4104_v19  ;;  %v512_v44 = vpop.f32.mrb[11].mxu0  ;;  %v1586_v45 = vsel %vm975_vm0, %v1584_v29, %v1585_v31 }
 0x191   : > { %v1831_v46 = vsel %vm1221_vm1, %v1829_v32, %v1830_v33  ;;  %v661_v47 = vmin.f32 %v629_v36, 6.0  ;;  %v513_v48 = vadd.f32 %v4104_v19, %v512_v44  ;;  %v1696_v49 = vadd.f32 %v1586_v45, %v1451_v27 }
 0x192   : > { %v2192_v50 = vrot.slane %v2096_v39, 1  ;;  %734 = vst [vmem:[#allocation2 + $0x81] sm:$0xff] %v662_v42  ;;  %v632_v51 = vmax.f32 %v518_v43, 0.0  ;;  %v2193_v52 = vrot.slane %v4172_v40, 1  ;;  %v4185_v54 = vmul.f32 %v4174_v41, %v4164_v35 }
 0x193   : > { %733 = vst [vmem:[#allocation2 + $0x79] sm:$0xff] %v661_v47  ;;  %v631_v55 = vmax.f32 %v513_v48, 0.0  ;;  %v3294_v56 = vpop.f32.mrb[12].mxu0  ;;  %v1941_v59 = vadd.f32 %v1831_v46, %v1696_v49  ;;  %v1420_v60 = vmul.f32 %v4128_v63, %v4133_v6  ;;  %v1587_v61 = vrot.slane %v4138_v8, 1 }
 0x194   : > { %v664_v62 = vmin.f32 %v632_v51, 6.0  ;;  %v528_v0 = vadd.f32 %v3294_v56, %v4104_v19  ;;  %v522_v1 = vpop.f32.mrb[13].mxu0  ;;  %v2194_v2 = vsel %vm975_vm0, %v2192_v50, %v2193_v52  ;;  %v2437_v3 = vrot.slane %v2341_v53, 2 }
 0x195   : > { %v663_v4 = vmin.f32 %v631_v55, 6.0  ;;  %v523_v10 = vadd.f32 %v4104_v19, %v522_v1  ;;  %v2059_v11 = vadd.f32 %v2027_v38, %v1941_v59  ;;  %v2438_v12 = vrot.slane %v4185_v54, 2 }
 0x196   : > { %736 = vst [vmem:[#allocation2 + $0x99] sm:$0xff] %v664_v62  ;;  %v634_v13 = vmax.f32 %v528_v0, 0.0  ;;  %v1452_v14 = vadd.f32 %v1420_v60, %v4135_v7  ;;  %v1588_v15 = vsel %vm975_vm0, %v1585_v31, %v1587_v61  ;;  %v1832_v8 = vrot.slane %v4141_v9, 2  ;;  %v4204_v7 = vld [vmem:[%s5667_s4] ss:$0 sm:$0xff] }
 0x197   : > { %735 = vst [vmem:[#allocation2 + $0x91] sm:$0xff] %v663_v4  ;;  %v633_v18 = vmax.f32 %v523_v10, 0.0  ;;  %v3297_v20 = vpop.f32.mrb[14].mxu0  ;;  %v2304_v21 = vadd.f32 %v2194_v2, %v2059_v11  ;;  %v2439_v25 = vsel %vm1221_vm1, %v2437_v3, %v2438_v12  ;;  %v2028_v26 = vmul.f32 %v4156_v23, %v4164_v35 }
 0x198   : > { %v666_v27 = vmin.f32 %v634_v13, 6.0  ;;  %v538_v29 = vadd.f32 %v3297_v20, %v4104_v19  ;;  %v532_v30 = vpop.f32.mrb[15].mxu0  ;;  %v1697_v9 = vadd.f32 %v1588_v15, %v1452_v14  ;;  %v1833_v31 = vsel %vm1221_vm1, %v1830_v33, %v1832_v8 }
 0x199   : > { %v665_v32 = vmin.f32 %v633_v18, 6.0  ;;  %v533_v36 = vadd.f32 %v4104_v19, %v532_v30  ;;  %v2549_v37 = vadd.f32 %v2439_v25, %v2304_v21  ;;  %v2098_v38 = vmul.f32 %v4158_v24, %v1976_v16 }
 0x19a   : > { %738 = vst [vmem:[#allocation2 + $0xb1] sm:$0xff] %v666_v27  ;;  %v636_v39 = vmax.f32 %v538_v29, 0.0  ;;  %v1942_v40 = vadd.f32 %v1833_v31, %v1697_v9  ;;  %v2343_v42 = vmul.f32 %v4174_v41, %v1976_v16  ;;  %v812_v43 = vmul.f32 %v4112_v28, %v4131_v5 }
 0x19b   : > { %737 = vst [vmem:[#allocation2 + $0xa9] sm:$0xff] %v665_v32  ;;  %v635_v44 = vmax.f32 %v533_v36, 0.0  ;;  %v3300_v45 = vpop.f32.mrb[16].mxu0  ;;  %v2588_v46 = vadd.f32 %v4204_v7, %v2549_v37  ;;  %v2195_v33 = vrot.slane %v2098_v38, 1  ;;  %v882_v47 = vmul.f32 %v4099_v17, %v4131_v5 }
 0x19c   : > { %v668_v48 = vmin.f32 %v636_v39, 6.0  ;;  %v548_v49 = vadd.f32 %v3300_v45, %v4104_v19  ;;  %v542_v50 = vpop.f32.mrb[17].mxu0  ;;  %v2060_v51 = vadd.f32 %v2028_v26, %v1942_v40  ;;  %v2440_v53 = vrot.slane %v2343_v42, 2  ;;  %v762_v39 = vld [vmem:[#allocation2 + $0x28] sm:$0x3] }
 0x19d   : > { %v667_v54 = vmin.f32 %v635_v44, 6.0  ;;  %v543_v55 = vadd.f32 %v4104_v19, %v542_v50  ;;  %v2620_v56 = vmax.f32 %v2588_v46, 0.0  ;;  %v2196_v59 = vsel %vm975_vm0, %v2193_v52, %v2195_v33  ;;  %v4250_v45 = vld [vmem:[#allocation2 + $0x48] sm:$0xff] }
 0x19e   : > { %740 = vst [vmem:[#allocation2 + $0xc9] sm:$0xff] %v668_v48  ;;  %v638_v60 = vmax.f32 %v548_v49, 0.0  ;;  %v2305_v61 = vadd.f32 %v2196_v59, %v2060_v51  ;;  %v2441_v62 = vsel %vm1221_vm1, %v2438_v12, %v2440_v53  ;;  %v4221_v0 = vmul.f32 %v4099_v17, %v4133_v6  ;;  %v4253_v49 = vld [vmem:[#allocation2 + $0x50] sm:$0xff] }
 0x19f   : > { %739 = vst [vmem:[#allocation2 + $0xc1] sm:$0xff] %v667_v54  ;;  %v637_v1 = vmax.f32 %v543_v55, 0.0  ;;  %v3303_v2 = vpop.f32.mrb[18].mxu0  ;;  %v2652_v3 = vmin.f32 %v2620_v56, 6.0  ;;  %v981_v4 = vrot.slane %v882_v47, 1  ;;  %v1128_v10 = vmul.f32 %v4107_v22, %v4131_v5 }
 0x1a0   : > { %v670_v11 = vmin.f32 %v638_v60, 6.0  ;;  %v558_v52 = vadd.f32 %v3303_v2, %v4104_v19  ;;  %v552_v13 = vpop.f32.mrb[19].mxu0  ;;  %v2550_v14 = vadd.f32 %v2441_v62, %v2305_v61  ;;  %v982_v15 = vrot.slane %v4221_v0, 1 }
 0x1a1   : > { %v669_v12 = vmin.f32 %v637_v1, 6.0  ;;  %v553_v8 = vadd.f32 %v4104_v19, %v552_v13  ;;  %3354 = vmatprep.mubr.f32.mxu1 %v2652_v3  ;;  %v4230_v16 = vmul.f32 %v4107_v22, %v4133_v6  ;;  %v1227_v18 = vrot.slane %v1128_v10, 2 }
 0x1a2   : > { %742 = vst [vmem:[#allocation2 + $0xe1] sm:$0xff] %v670_v11  ;;  %v640_v20 = vmax.f32 %v558_v52, 0.0  ;;  %v2589_v5 = vadd.f32 %v4204_v7, %v2550_v14  ;;  %v983_v21 = vsel %vm975_vm0, %v981_v4, %v982_v15  ;;  %v1421_v25 = vmul.f32 %v4128_v63, %v4162_v34 }
 0x1a3   : > { %741 = vst [vmem:[#allocation2 + $0xd9] sm:$0xff] %v669_v12  ;;  %v639_v26 = vmax.f32 %v553_v8, 0.0  ;;  %v3306_v27 = vpop.f32.mrb[20].mxu0  ;;  %v1090_v29 = vadd.f32 %v983_v21, %v812_v43  ;;  %v1228_v30 = vrot.slane %v4230_v16, 2  ;;  %v1491_v9 = vmul.f32 %v4122_v57, %v4162_v34 }
 0x1a4   : > { %v672_v31 = vmin.f32 %v640_v20, 6.0  ;;  %v2621_v32 = vmax.f32 %v2589_v5, 0.0  ;;  %v568_v36 = vadd.f32 %v3306_v27, %v4104_v19  ;;  %v562_v37 = vpop.f32.mrb[21].mxu0  ;;  %v4244_v38 = vmul.f32 %v4122_v57, %v4164_v35  ;;  %v1371_v20 = vld [vmem:[#allocation2 + $0x40] sm:$0x3] }
 0x1a5   : > { %v671_v40 = vmin.f32 %v639_v26, 6.0  ;;  %v563_v42 = vadd.f32 %v4104_v19, %v562_v37  ;;  %v1229_v43 = vsel %vm1221_vm1, %v1227_v18, %v1228_v30  ;;  %v1589_v44 = vrot.slane %v1491_v9, 1 }
 0x1a6   : > { %744 = vst [vmem:[#allocation2 + $0xf9] sm:$0xff] %v672_v31  ;;  %v2653_v46 = vmin.f32 %v2621_v32, 6.0  ;;  %v642_v33 = vmax.f32 %v568_v36, 0.0  ;;  %v1336_v47 = vadd.f32 %v1229_v43, %v1090_v29  ;;  %v1590_v48 = vrot.slane %v4244_v38, 1  ;;  %v1979_v36 = vld [vmem:[#allocation2 + $0x58] sm:$0x3] }
 0x1a7   : > { %743 = vst [vmem:[#allocation2 + $0xf1] sm:$0xff] %v671_v40  ;;  %v641_v50 = vmax.f32 %v563_v42, 0.0  ;;  %v1736_v51 = vmul.f32 %v4124_v58, %v4162_v34  ;;  %v1737_v53 = vmul.f32 %v4124_v58, %v4164_v35  ;;  %v3309_v54 = vpop.f32.mrb[22].mxu0  ;;  %v884_v55 = vmul.f32 %v4099_v17, %v762_v39 }
 0x1a8   : > { %3355 = vmatmul.mubr.f32.vlgmr.msra.gmra.mrb[0].mxu1 %v2653_v46  ;;  %v674_v56 = vmin.f32 %v642_v33, 6.0  ;;  %v1453_v59 = vadd.f32 %v1421_v25, %v1336_v47  ;;  %v1591_v60 = vsel %vm975_vm0, %v1589_v44, %v1590_v48  ;;  %v2099_v61 = vmul.f32 %v4158_v24, %v4250_v45  ;;  %v572_v62 = vpop.f32.mrb[23].mxu0 }
 0x1a9   : > { %v673_v1 = vmin.f32 %v641_v50, 6.0  ;;  %v1834_v2 = vrot.slane %v1736_v51, 2  ;;  %v1835_v3 = vrot.slane %v1737_v53, 2  ;;  %v4267_v4 = vmul.f32 %v4158_v24, %v4253_v49 }
 0x1aa   : > { %746 = vst [vmem:[#allocation2 + $0x111] sm:$0xff] %v674_v56  ;;  %v1698_v10 = vadd.f32 %v1591_v60, %v1453_v59  ;;  %v2197_v11 = vrot.slane %v2099_v61, 1  ;;  %v2344_v52 = vmul.f32 %v4174_v41, %v4250_v45  ;;  %v4273_v13 = vmul.f32 %v4174_v41, %v4253_v49 }
 0x1ab   : > { %745 = vst [vmem:[#allocation2 + $0x109] sm:$0xff] %v673_v1  ;;  %v1836_v14 = vsel %vm1221_vm1, %v1834_v2, %v1835_v3  ;;  %v2029_v12 = vmul.f32 %v4156_v23, %v4250_v45  ;;  %v2198_v8 = vrot.slane %v4267_v4, 1  ;;  %v578_v18 = vadd.f32 %v3309_v54, %v4104_v19  ;;  %v4280_v5 = vpop.f32.mrb[24].mxu0 }
 0x1ac   : > { %v1943_v21 = vadd.f32 %v1836_v14, %v1698_v10  ;;  %v2442_v25 = vrot.slane %v2344_v52, 2  ;;  %v2443_v26 = vrot.slane %v4273_v13, 2  ;;  %v984_v27 = vrot.slane %v884_v55, 1  ;;  %v4283_v29 = vpop.f32.mrb[25].mxu0 }
 0x1ad   : > { %v644_v9 = vmax.f32 %v578_v18, 0.0  ;;  %v813_v31 = vmul.f32 %v4112_v28, %v4133_v6  ;;  %v1130_v32 = vmul.f32 %v4107_v22, %v762_v39  ;;  %v2199_v40 = vsel %vm975_vm0, %v2197_v11, %v2198_v8 }
 0x1ae   : > { %v2061_v37 = vadd.f32 %v2029_v12, %v1943_v21  ;;  %v985_v42 = vsel %vm975_vm0, %v982_v15, %v984_v27  ;;  %v1493_v43 = vmul.f32 %v4122_v57, %v1371_v20  ;;  %v1738_v47 = vmul.f32 %v4124_v58, %v1371_v20 }
 0x1af   : > { %v676_v44 = vmin.f32 %v644_v9, 6.0  ;;  %v1091_v46 = vadd.f32 %v985_v42, %v813_v31  ;;  %v1230_v33 = vrot.slane %v1130_v32, 2  ;;  %v4294_v50 = vpop.f32.mrb[26].mxu0  ;;  %v2444_v39 = vsel %vm1221_vm1, %v2442_v25, %v2443_v26 }
 0x1b0   : > { %v2306_v6 = vadd.f32 %v2199_v40, %v2061_v37  ;;  %v1592_v51 = vrot.slane %v1493_v43, 1  ;;  %v2101_v53 = vmul.f32 %v4158_v24, %v1979_v36  ;;  %v4298_v54 = vpop.f32.mrb[27].mxu0  ;;  %v1837_v15 = vrot.slane %v1738_v47, 2  ;;  %v4343_v43 = vld [vmem:[#allocation2 + $0x60] sm:$0xff] }
 0x1b1   : > { %748 = vst [vmem:[#allocation2 + $0x129] sm:$0xff] %v676_v44  ;;  %v1231_v0 = vsel %vm1221_vm1, %v1228_v30, %v1230_v33  ;;  %v2346_v55 = vmul.f32 %v4174_v41, %v1979_v36  ;;  %v573_v56 = vadd.f32 %v4104_v19, %v572_v62  ;;  %v1422_v61 = vmul.f32 %v4128_v63, %v4164_v35 }
 0x1b2   : > { %v2551_v59 = vadd.f32 %v2444_v39, %v2306_v6  ;;  %v1337_v60 = vadd.f32 %v1231_v0, %v1091_v46  ;;  %v2030_v1 = vmul.f32 %v4156_v23, %v4253_v49  ;;  %v1593_v2 = vsel %vm975_vm0, %v1590_v48, %v1592_v51  ;;  %v4355_v6 = vld [vmem:[#allocation2 + $0x68] sm:$0xff] }
 0x1b3   : > { %v1838_v16 = vsel %vm1221_vm1, %v1835_v3, %v1837_v15  ;;  %v2200_v30 = vrot.slane %v2101_v53, 1  ;;  %v643_v4 = vmax.f32 %v573_v56, 0.0  ;;  %v4313_v10 = vpop.f32.mrb[28].mxu0  ;;  %v2445_v52 = vrot.slane %v2346_v55, 2 }
 0x1b4   : > { %v2590_v62 = vadd.f32 %v4204_v7, %v2551_v59  ;;  %v1454_v11 = vadd.f32 %v1422_v61, %v1337_v60  ;;  %v885_v13 = vmul.f32 %v4099_v17, %v4162_v34  ;;  %v4318_v14 = vpop.f32.mrb[29].mxu0  ;;  %v814_v38 = vmul.f32 %v4112_v28, %v4162_v34 }
 0x1b5   : > { %v675_v12 = vmin.f32 %v643_v4, 6.0  ;;  %v4324_v48 = vmul.f32 %v4099_v17, %v4164_v35  ;;  %v1131_v3 = vmul.f32 %v4107_v22, %v4162_v34  ;;  %v4330_v25 = vmul.f32 %v4107_v22, %v4164_v35 }
 0x1b6   : > { %v2622_v18 = vmax.f32 %v2590_v62, 0.0  ;;  %v1699_v20 = vadd.f32 %v1593_v2, %v1454_v11  ;;  %v986_v21 = vrot.slane %v885_v13, 1  ;;  %v2201_v27 = vsel %vm975_vm0, %v2198_v8, %v2200_v30  ;;  %v765_v2 = vld [vmem:[#allocation2 + $0x40] sm:$0x3] }
 0x1b7   : > { %747 = vst [vmem:[#allocation2 + $0x121] sm:$0xff] %v675_v12  ;;  %v987_v9 = vrot.slane %v4324_v48, 1  ;;  %v1232_v31 = vrot.slane %v1131_v3, 2  ;;  %v1494_v32 = vmul.f32 %v4122_v57, %v4250_v45  ;;  %v4336_v36 = vpop.f32.mrb[30].mxu0  ;;  %v1233_v40 = vrot.slane %v4330_v25, 2 }
 0x1b8   : > { %v2654_v37 = vmin.f32 %v2622_v18, 6.0  ;;  %v1944_v34 = vadd.f32 %v1838_v16, %v1699_v20  ;;  %v4341_v42 = vmul.f32 %v4122_v57, %v4253_v49  ;;  %v4345_v8 = vpop.f32.mrb[31].mxu0  ;;  %v2446_v44 = vsel %vm1221_vm1, %v2443_v26, %v2445_v52  ;;  %v1374_v20 = vld [vmem:[#allocation2 + $0x58] sm:$0x3] }
 0x1b9   : > { %v988_v46 = vsel %vm975_vm0, %v986_v21, %v987_v9  ;;  %v1739_v33 = vmul.f32 %v4124_v58, %v4250_v45  ;;  %v4353_v47 = vmul.f32 %v4124_v58, %v4253_v49  ;;  %v1423_v53 = vmul.f32 %v4128_v63, %v4250_v45 }
 0x1ba   : > { %3357 = vmatprep.mubr.f32.mxu1 %v2654_v37  ;;  %v2062_v39 = vadd.f32 %v2030_v1, %v1944_v34  ;;  %v1092_v51 = vadd.f32 %v988_v46, %v814_v38  ;;  %v1594_v0 = vrot.slane %v1494_v32, 1  ;;  %v1234_v26 = vsel %vm1221_vm1, %v1232_v31, %v1233_v40 }
 0x1bb   : > { %v1595_v15 = vrot.slane %v4341_v42, 1  ;;  %v1839_v55 = vrot.slane %v1739_v33, 2  ;;  %v2102_v56 = vmul.f32 %v4158_v24, %v4343_v43  ;;  %v1840_v61 = vrot.slane %v4353_v47, 2  ;;  %v1982_v47 = vld [vmem:[#allocation2 + $0x70] sm:$0x3] }
 0x1bc   : > { %v2307_v59 = vadd.f32 %v2201_v27, %v2062_v39  ;;  %v1338_v60 = vadd.f32 %v1234_v26, %v1092_v51  ;;  %v4366_v1 = vmul.f32 %v4158_v24, %v4355_v6  ;;  %v2031_v16 = vmul.f32 %v4156_v23, %v4343_v43 }
 0x1bd   : > { %v2202_v30 = vrot.slane %v2102_v56, 1  ;;  %v2347_v4 = vmul.f32 %v4174_v41, %v4343_v43  ;;  %v4374_v62 = vmul.f32 %v4174_v41, %v4355_v6  ;;  %v588_v12 = vadd.f32 %v4280_v5, %v4104_v19 }
 0x1be   : > { %v2552_v11 = vadd.f32 %v2446_v44, %v2307_v59  ;;  %v1455_v52 = vadd.f32 %v1423_v53, %v1338_v60  ;;  %v2203_v13 = vrot.slane %v4366_v1, 1  ;;  %v1596_v38 = vsel %vm975_vm0, %v1594_v0, %v1595_v15 }
 0x1bf   : > { %v2447_v48 = vrot.slane %v2347_v4, 2  ;;  %v2448_v3 = vrot.slane %v4374_v62, 2  ;;  %v887_v18 = vmul.f32 %v4099_v17, %v765_v2  ;;  %v1841_v27 = vsel %vm1221_vm1, %v1839_v55, %v1840_v61 }
 0x1c0   : > { %v2591_v21 = vadd.f32 %v4204_v7, %v2552_v11  ;;  %v1700_v25 = vadd.f32 %v1596_v38, %v1455_v52  ;;  %v646_v31 = vmax.f32 %v588_v12, 0.0  ;;  %v2204_v32 = vsel %vm975_vm0, %v2202_v30, %v2203_v13 }
 0x1c1   : > { %v815_v37 = vmul.f32 %v4112_v28, %v4164_v35  ;;  %v989_v5 = vrot.slane %v887_v18, 1  ;;  %v1133_v34 = vmul.f32 %v4107_v22, %v765_v2  ;;  %v1496_v33 = vmul.f32 %v4122_v57, %v1374_v20 }
 0x1c2   : > { %v2623_v42 = vmax.f32 %v2591_v21, 0.0  ;;  %v1945_v44 = vadd.f32 %v1841_v27, %v1700_v25  ;;  %v678_v46 = vmin.f32 %v646_v31, 6.0  ;;  %v2449_v39 = vsel %vm1221_vm1, %v2447_v48, %v2448_v3 }
 0x1c3   : > { %v990_v51 = vsel %vm975_vm0, %v987_v9, %v989_v5  ;;  %v1235_v53 = vrot.slane %v1133_v34, 2  ;;  %v1741_v0 = vmul.f32 %v4124_v58, %v1374_v20  ;;  %v1597_v56 = vrot.slane %v1496_v33, 1 }
 0x1c4   : > { %v2655_v26 = vmin.f32 %v2623_v42, 6.0  ;;  %v2063_v35 = vadd.f32 %v2031_v16, %v1945_v44  ;;  %750 = vst [vmem:[#allocation2 + $0x141] sm:$0xff] %v678_v46  ;;  %v1093_v55 = vadd.f32 %v990_v51, %v815_v37  ;;  %v2104_v1 = vmul.f32 %v4158_v24, %v1982_v47 }
 0x1c5   : > { %v1236_v59 = vsel %vm1221_vm1, %v1233_v40, %v1235_v53  ;;  %v1842_v60 = vrot.slane %v1741_v0, 2  ;;  %v2349_v2 = vmul.f32 %v4174_v41, %v1982_v47  ;;  %v1424_v9 = vmul.f32 %v4128_v63, %v4253_v49  ;;  %v4436_v53 = vld [vmem:[#allocation2 + $0x78] sm:$0xff] }
 0x1c6   : > { %3358 = vmatmul.mubr.f32.gmra.mrb[2].mxu1 %v2655_v26  ;;  %v2308_v30 = vadd.f32 %v2204_v32, %v2063_v35  ;;  %v1339_v4 = vadd.f32 %v1236_v59, %v1093_v55  ;;  %v583_v11 = vadd.f32 %v4104_v19, %v4283_v29  ;;  %v1598_v16 = vsel %vm975_vm0, %v1595_v15, %v1597_v56  ;;  %v4438_v56 = vld [vmem:[#allocation2 + $0x80] sm:$0xff] }
 0x1c7   : > { %v1843_v52 = vsel %vm1221_vm1, %v1840_v61, %v1842_v60  ;;  %v2032_v40 = vmul.f32 %v4156_v23, %v4355_v6  ;;  %v2205_v12 = vrot.slane %v2104_v1, 1  ;;  %v888_v20 = vmul.f32 %v4099_v17, %v4250_v45 }
 0x1c8   : > { %v2553_v38 = vadd.f32 %v2449_v39, %v2308_v30  ;;  %v1456_v48 = vadd.f32 %v1424_v9, %v1339_v4  ;;  %v645_v18 = vmax.f32 %v583_v11, 0.0  ;;  %v2450_v21 = vrot.slane %v2349_v2, 2 }
 0x1c9   : > { %v816_v25 = vmul.f32 %v4112_v28, %v4250_v45  ;;  %v4411_v29 = vmul.f32 %v4099_v17, %v4253_v49  ;;  %v1134_v15 = vmul.f32 %v4107_v22, %v4250_v45  ;;  %v991_v32 = vrot.slane %v888_v20, 1 }
 0x1ca   : > { %v2592_v61 = vadd.f32 %v4204_v7, %v2553_v38  ;;  %v1701_v27 = vadd.f32 %v1598_v16, %v1456_v48  ;;  %v677_v31 = vmin.f32 %v645_v18, 6.0  ;;  %v2206_v37 = vsel %vm975_vm0, %v2203_v13, %v2205_v12  ;;  %v768_v38 = vld [vmem:[#allocation2 + $0x58] sm:$0x3] }
 0x1cb   : > { %v992_v5 = vrot.slane %v4411_v29, 1  ;;  %v4420_v34 = vmul.f32 %v4107_v22, %v4253_v49  ;;  %v1237_v42 = vrot.slane %v1134_v15, 2  ;;  %v1497_v45 = vmul.f32 %v4122_v57, %v4343_v43 }
 0x1cc   : > { %v2624_v44 = vmax.f32 %v2592_v61, 0.0  ;;  %v1946_v46 = vadd.f32 %v1843_v52, %v1701_v27  ;;  %749 = vst [vmem:[#allocation2 + $0x139] sm:$0xff] %v677_v31  ;;  %v4426_v33 = vmul.f32 %v4122_v57, %v4355_v6  ;;  %v1742_v39 = vmul.f32 %v4124_v58, %v4343_v43 }
 0x1cd   : > { %v993_v47 = vsel %vm975_vm0, %v991_v32, %v992_v5  ;;  %v1238_v13 = vrot.slane %v4420_v34, 2  ;;  %v4434_v51 = vmul.f32 %v4124_v58, %v4355_v6  ;;  %v1599_v55 = vrot.slane %v1497_v45, 1  ;;  %v1377_v32 = vld [vmem:[#allocation2 + $0x70] sm:$0x3] }
 0x1ce   : > { %v2656_v0 = vmin.f32 %v2624_v44, 6.0  ;;  %v2064_v26 = vadd.f32 %v2032_v40, %v1946_v46  ;;  %v1094_v35 = vadd.f32 %v993_v47, %v816_v25  ;;  %v1600_v60 = vrot.slane %v4426_v33, 1 }
 0x1cf   : > { %v1239_v59 = vsel %vm1221_vm1, %v1237_v42, %v1238_v13  ;;  %v1844_v1 = vrot.slane %v1742_v39, 2  ;;  %v1845_v2 = vrot.slane %v4434_v51, 2  ;;  %v1425_v9 = vmul.f32 %v4128_v63, %v4343_v43 }
 0x1d0   : > { %3360 = vmatprep.mubr.f32.mxu1 %v2656_v0  ;;  %v2309_v30 = vadd.f32 %v2206_v37, %v2064_v26  ;;  %v1340_v4 = vadd.f32 %v1239_v59, %v1094_v35  ;;  %v2105_v11 = vmul.f32 %v4158_v24, %v4436_v53  ;;  %v2451_v16 = vsel %vm1221_vm1, %v2448_v3, %v2450_v21  ;;  %v1985_v26 = vld [vmem:[#allocation2 + $0x88] sm:$0x3] }
 0x1d1   : > { %v2033_v52 = vmul.f32 %v4156_v23, %v4436_v53  ;;  %v4454_v40 = vmul.f32 %v4158_v24, %v4438_v56  ;;  %v2350_v12 = vmul.f32 %v4174_v41, %v4436_v53  ;;  %v4460_v25 = vmul.f32 %v4174_v41, %v4438_v56 }
 0x1d2   : > { %v2554_v48 = vadd.f32 %v2451_v16, %v2309_v30  ;;  %v1457_v18 = vadd.f32 %v1425_v9, %v1340_v4  ;;  %v2207_v20 = vrot.slane %v2105_v11, 1  ;;  %v1601_v62 = vsel %vm975_vm0, %v1599_v55, %v1600_v60 }
 0x1d3   : > { %v1846_v3 = vsel %vm1221_vm1, %v1844_v1, %v1845_v2  ;;  %v2208_v21 = vrot.slane %v4454_v40, 1  ;;  %v598_v29 = vadd.f32 %v4294_v50, %v4104_v19  ;;  %v2452_v27 = vrot.slane %v2350_v12, 2 }
 0x1d4   : > { %v2593_v15 = vadd.f32 %v4204_v7, %v2554_v48  ;;  %v1702_v61 = vadd.f32 %v1601_v62, %v1457_v18  ;;  %v890_v31 = vmul.f32 %v4099_v17, %v768_v38  ;;  %v2453_v37 = vrot.slane %v4460_v25, 2 }
 0x1d5   : > { %v648_v34 = vmax.f32 %v598_v29, 0.0  ;;  %v817_v42 = vmul.f32 %v4112_v28, %v4253_v49  ;;  %v1136_v44 = vmul.f32 %v4107_v22, %v768_v38  ;;  %v2209_v33 = vsel %vm975_vm0, %v2207_v20, %v2208_v21 }
 0x1d6   : > { %v2625_v46 = vmax.f32 %v2593_v15, 0.0  ;;  %v1947_v45 = vadd.f32 %v1846_v3, %v1702_v61  ;;  %v994_v50 = vrot.slane %v890_v31, 1  ;;  %v1499_v51 = vmul.f32 %v4122_v57, %v1377_v32 }
 0x1d7   : > { %v680_v47 = vmin.f32 %v648_v34, 6.0  ;;  %v1240_v39 = vrot.slane %v1136_v44, 2  ;;  %v1744_v0 = vmul.f32 %v4124_v58, %v1377_v32  ;;  %v1426_v49 = vmul.f32 %v4128_v63, %v4355_v6 }
 0x1d8   : > { %v2657_v35 = vmin.f32 %v2625_v46, 6.0  ;;  %v2065_v55 = vadd.f32 %v2033_v52, %v1947_v45  ;;  %v995_v59 = vsel %vm975_vm0, %v992_v5, %v994_v50  ;;  %v1602_v4 = vrot.slane %v1499_v51, 1  ;;  %v4522_v51 = vld [vmem:[#allocation2 + $0x98] sm:$0xff] }
 0x1d9   : > { %752 = vst [vmem:[#allocation2 + $0x159] sm:$0xff] %v680_v47  ;;  %v1095_v1 = vadd.f32 %v995_v59, %v817_v42  ;;  %v1241_v30 = vsel %vm1221_vm1, %v1238_v13, %v1240_v39  ;;  %v1847_v9 = vrot.slane %v1744_v0, 2  ;;  %v2107_v16 = vmul.f32 %v4158_v24, %v1985_v26 }
 0x1da   : > { %3361 = vmatmul.mubr.f32.gmra.mrb[4].mxu1 %v2657_v35  ;;  %v2310_v11 = vadd.f32 %v2209_v33, %v2065_v55  ;;  %v2352_v40 = vmul.f32 %v4174_v41, %v1985_v26  ;;  %v593_v52 = vadd.f32 %v4104_v19, %v4298_v54  ;;  %v2454_v5 = vsel %vm1221_vm1, %v2452_v27, %v2453_v37 }
 0x1db   : > { %v1341_v12 = vadd.f32 %v1241_v30, %v1095_v1  ;;  %v1603_v38 = vsel %vm975_vm0, %v1600_v60, %v1602_v4  ;;  %v2034_v13 = vmul.f32 %v4156_v23, %v4438_v56  ;;  %v1848_v18 = vsel %vm1221_vm1, %v1845_v2, %v1847_v9 }
 0x1dc   : > { %v2555_v48 = vadd.f32 %v2454_v5, %v2310_v11  ;;  %v2210_v20 = vrot.slane %v2107_v16, 1  ;;  %v647_v62 = vmax.f32 %v593_v52, 0.0  ;;  %v891_v29 = vmul.f32 %v4099_v17, %v4343_v43  ;;  %v771_v5 = vld [vmem:[#allocation2 + $0x70] sm:$0x3] }
 0x1dd   : > { %v1458_v3 = vadd.f32 %v1426_v49, %v1341_v12  ;;  %v4495_v19 = vmul.f32 %v4099_v17, %v4355_v6  ;;  %v1137_v54 = vmul.f32 %v4107_v22, %v4343_v43  ;;  %v2455_v15 = vrot.slane %v2352_v40, 2 }
 0x1de   : > { %v2594_v60 = vadd.f32 %v4204_v7, %v2555_v48  ;;  %v679_v61 = vmin.f32 %v647_v62, 6.0  ;;  %v818_v2 = vmul.f32 %v4112_v28, %v4343_v43  ;;  %v996_v31 = vrot.slane %v891_v29, 1  ;;  %v4557_v48 = vld [vmem:[%s5665_s2] ss:$0 sm:$0xff] }
 0x1df   : > { %v1703_v27 = vadd.f32 %v1603_v38, %v1458_v3  ;;  %v997_v32 = vrot.slane %v4495_v19, 1  ;;  %v4505_v34 = vmul.f32 %v4107_v22, %v4355_v6  ;;  %v2211_v42 = vsel %vm975_vm0, %v2208_v21, %v2210_v20  ;;  %v4518_v22 = vld [vmem:[#allocation2 + $0x90] sm:$0xff] }
 0x1e0   : > { %v2626_v17 = vmax.f32 %v2594_v60, 0.0  ;;  %751 = vst [vmem:[#allocation2 + $0x151] sm:$0xff] %v679_v61  ;;  %v1242_v44 = vrot.slane %v1137_v54, 2  ;;  %v1500_v46 = vmul.f32 %v4122_v57, %v4436_v53  ;;  %v4516_v33 = vmul.f32 %v4122_v57, %v4438_v56  ;;  %v1380_v54 = vld [vmem:[#allocation2 + $0x88] sm:$0x3] }
 0x1e1   : > { %v1948_v45 = vadd.f32 %v1848_v18, %v1703_v27  ;;  %v998_v28 = vsel %vm975_vm0, %v996_v31, %v997_v32  ;;  %v1243_v43 = vrot.slane %v4505_v34, 2  ;;  %v1745_v39 = vmul.f32 %v4124_v58, %v4436_v53 }
 0x1e2   : > { %v2658_v50 = vmin.f32 %v2626_v17, 6.0  ;;  %v1096_v21 = vadd.f32 %v998_v28, %v818_v2  ;;  %v1604_v47 = vrot.slane %v1500_v46, 1  ;;  %v1605_v35 = vrot.slane %v4516_v33, 1  ;;  %v4566_v2 = vld [vmem:[#allocation8 + $0x1] ss:$0 sm:$0xff] }
 0x1e3   : > { %v2066_v0 = vadd.f32 %v2034_v13, %v1948_v45  ;;  %v1244_v26 = vsel %vm1221_vm1, %v1242_v44, %v1243_v43  ;;  %v4530_v55 = vmul.f32 %v4124_v58, %v4438_v56  ;;  %v2456_v59 = vsel %vm1221_vm1, %v2453_v37, %v2455_v15  ;;  %v4572_v17 = vld [vmem:[#allocation8] ss:$0 sm:$0xff]  ;;  %v4576_v44 = vld [vmem:[#allocation8 + $0x2] ss:$0 sm:$0xff]  ;;  %v1988_v45 = vld [vmem:[#allocation2 + $0xa0] sm:$0x3] }
 0x1e4   : > { %3363 = vmatprep.mubr.f32.mxu1 %v2658_v50  ;;  %v1342_v49 = vadd.f32 %v1244_v26, %v1096_v21  ;;  %v1427_v1 = vmul.f32 %v4128_v63, %v4436_v53  ;;  %v2108_v30 = vmul.f32 %v4158_v24, %v4518_v22  ;;  %v1849_v9 = vrot.slane %v1745_v39, 2 }
 0x1e5   : > { %v2311_v4 = vadd.f32 %v2211_v42, %v2066_v0  ;;  %v1850_v11 = vrot.slane %v4530_v55, 2  ;;  %v4542_v16 = vmul.f32 %v4158_v24, %v4522_v51  ;;  %v2353_v25 = vmul.f32 %v4174_v41, %v4518_v22 }
 0x1e6   : > { %v1459_v40 = vadd.f32 %v1427_v1, %v1342_v49  ;;  %v2212_v52 = vrot.slane %v2108_v30, 1  ;;  %v4548_v37 = vmul.f32 %v4174_v41, %v4522_v51  ;;  %v1606_v38 = vsel %vm975_vm0, %v1604_v47, %v1605_v35 }
 0x1e7   : > { %v2556_v12 = vadd.f32 %v2456_v59, %v2311_v4  ;;  %v2213_v13 = vrot.slane %v4542_v16, 1  ;;  %v608_v18 = vadd.f32 %v4557_v48, %v4313_v10  ;;  %v2035_v62 = vmul.f32 %v4156_v23, %v4518_v22 }
 0x1e8   : > { %v1704_v20 = vadd.f32 %v1606_v38, %v1459_v40  ;;  %v2457_v3 = vrot.slane %v2353_v25, 2  ;;  %v2458_v29 = vrot.slane %v4548_v37, 2  ;;  %v1851_v15 = vsel %vm1221_vm1, %v1849_v9, %v1850_v11 }
 0x1e9   : > { %v2595_v60 = vadd.f32 %v4204_v7, %v2556_v12  ;;  %v650_v61 = vmax.f32 %v608_v18, 0.0  ;;  %v893_v27 = vmul.f32 %v4566_v2, %v771_v5  ;;  %v2214_v10 = vsel %vm975_vm0, %v2212_v52, %v2213_v13 }
 0x1ea   : > { %v1949_v31 = vadd.f32 %v1851_v15, %v1704_v20  ;;  %v819_v42 = vmul.f32 %v4572_v17, %v4355_v6  ;;  %v1139_v46 = vmul.f32 %v4576_v44, %v771_v5  ;;  %v1502_v47 = vmul.f32 %v4122_v57, %v1380_v54 }
 0x1eb   : > { %v2627_v28 = vmax.f32 %v2595_v60, 0.0  ;;  %v682_v50 = vmin.f32 %v650_v61, 6.0  ;;  %v999_v21 = vrot.slane %v893_v27, 1  ;;  %v2459_v0 = vsel %vm1221_vm1, %v2457_v3, %v2458_v29 }
 0x1ec   : > { %v2067_v39 = vadd.f32 %v2035_v62, %v1949_v31  ;;  %v1245_v26 = vrot.slane %v1139_v46, 2  ;;  %v1747_v55 = vmul.f32 %v4124_v58, %v1380_v54  ;;  %v1607_v49 = vrot.slane %v1502_v47, 1  ;;  %v4633_v46 = vld [vmem:[#allocation8 + $0x5] ss:$0 sm:$0xff] }
 0x1ed   : > { %v2659_v59 = vmin.f32 %v2627_v28, 6.0  ;;  %754 = vst [vmem:[#allocation2 + $0x171] sm:$0xff] %v682_v50  ;;  %v1000_v6 = vsel %vm975_vm0, %v997_v32, %v999_v21  ;;  %v2110_v1 = vmul.f32 %v4158_v24, %v1988_v45  ;;  %v1428_v57 = vmul.f32 %v4128_v63, %v4438_v56  ;;  %v4639_v28 = vld [vmem:[#allocation2 + $0xb0] sm:$0xff] }
 0x1ee   : > { %v2312_v30 = vadd.f32 %v2214_v10, %v2067_v39  ;;  %v1097_v4 = vadd.f32 %v1000_v6, %v819_v42  ;;  %v1852_v9 = vrot.slane %v1747_v55, 2  ;;  %v1246_v58 = vsel %vm1221_vm1, %v1243_v43, %v1245_v26  ;;  %v4647_v39 = vld [vmem:[#allocation8 + $0x3] ss:$0 sm:$0xff] }
 0x1ef   : > { %3364 = vmatmul.mubr.f32.gmra.mrb[6].mxu1 %v2659_v59  ;;  %v2036_v40 = vmul.f32 %v4156_v23, %v4522_v51  ;;  %v2355_v19 = vmul.f32 %v4174_v41, %v1988_v45  ;;  %v603_v32 = vadd.f32 %v4557_v48, %v4318_v14  ;;  %v1608_v63 = vsel %vm975_vm0, %v1605_v35, %v1607_v49  ;;  %v4637_v45 = vld [vmem:[#allocation2 + $0xa8] sm:$0xff]  ;;  %v4654_v49 = vld [vmem:[#allocation8 + $0x7] ss:$0 sm:$0xff] }
 0x1f0   : > { %v2557_v24 = vadd.f32 %v2459_v0, %v2312_v30  ;;  %v1343_v52 = vadd.f32 %v1246_v58, %v1097_v4  ;;  %v2215_v25 = vrot.slane %v2110_v1, 1  ;;  %v1853_v5 = vsel %vm1221_vm1, %v1850_v11, %v1852_v9 }
 0x1f1   : > { %v649_v34 = vmax.f32 %v603_v32, 0.0  ;;  %v820_v43 = vmul.f32 %v4572_v17, %v4436_v53  ;;  %v894_v23 = vmul.f32 %v4566_v2, %v4436_v53  ;;  %v4609_v14 = vmul.f32 %v4566_v2, %v4438_v56  ;;  %v4666_v32 = vld [vmem:[#allocation8 + $0x6] ss:$0 sm:$0xff] }
 0x1f2   : > { %v2596_v12 = vadd.f32 %v4204_v7, %v2557_v24  ;;  %v1460_v38 = vadd.f32 %v1428_v57, %v1343_v52  ;;  %v1140_v33 = vmul.f32 %v4576_v44, %v4436_v53  ;;  %v2460_v35 = vrot.slane %v2355_v19, 2  ;;  %v4622_v53 = vld [vmem:[#allocation8 + $0x4] ss:$0 sm:$0xff] }
 0x1f3   : > { %v681_v18 = vmin.f32 %v649_v34, 6.0  ;;  %v1001_v11 = vrot.slane %v894_v23, 1  ;;  %v4615_v20 = vmul.f32 %v4576_v44, %v4438_v56  ;;  %v1002_v54 = vrot.slane %v4609_v14, 1 }
 0x1f4   : > { %v2628_v62 = vmax.f32 %v2596_v12, 0.0  ;;  %v1705_v3 = vadd.f32 %v1608_v63, %v1460_v38  ;;  %v1247_v60 = vrot.slane %v1140_v33, 2  ;;  %v2216_v15 = vsel %vm975_vm0, %v2213_v13, %v2215_v25  ;;  %v1383_v25 = vld [vmem:[#allocation2 + $0xa0] sm:$0x3] }
 0x1f5   : > { %753 = vst [vmem:[#allocation2 + $0x169] sm:$0xff] %v681_v18  ;;  %v1248_v61 = vrot.slane %v4615_v20, 2  ;;  %v1503_v27 = vmul.f32 %v4622_v53, %v4518_v22  ;;  %v4628_v31 = vmul.f32 %v4622_v53, %v4522_v51  ;;  %v1003_v16 = vsel %vm975_vm0, %v1001_v11, %v1002_v54 }
 0x1f6   : > { %v2660_v10 = vmin.f32 %v2628_v62, 6.0  ;;  %v1950_v42 = vadd.f32 %v1853_v5, %v1705_v3  ;;  %v1748_v13 = vmul.f32 %v4633_v46, %v4518_v22  ;;  %v2461_v50 = vsel %vm1221_vm1, %v2458_v29, %v2460_v35  ;;  %v1991_v35 = vld [vmem:[#allocation2 + $0xb8] sm:$0x3] }
 0x1f7   : > { %v1098_v21 = vadd.f32 %v1003_v16, %v820_v43  ;;  %v1249_v47 = vsel %vm1221_vm1, %v1247_v60, %v1248_v61  ;;  %v1429_v0 = vmul.f32 %v4647_v39, %v4518_v22  ;;  %v1609_v55 = vrot.slane %v1503_v27, 1 }
 0x1f8   : > { %3366 = vmatprep.mubr.f32.mxu1 %v2660_v10  ;;  %v2068_v26 = vadd.f32 %v2036_v40, %v1950_v42  ;;  %v1610_v59 = vrot.slane %v4628_v31, 1  ;;  %v1749_v37 = vmul.f32 %v4633_v46, %v4522_v51  ;;  %v1854_v29 = vrot.slane %v1748_v13, 2  ;;  %v774_v40 = vld [vmem:[#allocation2 + $0x88] sm:$0x3] }
 0x1f9   : > { %v1344_v6 = vadd.f32 %v1249_v47, %v1098_v21  ;;  %v2111_v1 = vmul.f32 %v4654_v49, %v4637_v45  ;;  %v2112_v30 = vmul.f32 %v4654_v49, %v4639_v28  ;;  %v2356_v9 = vmul.f32 %v4174_v41, %v4637_v45 }
 0x1fa   : > { %v2313_v4 = vadd.f32 %v2216_v15, %v2068_v26  ;;  %v1855_v57 = vrot.slane %v1749_v37, 2  ;;  %v4664_v58 = vmul.f32 %v4174_v41, %v4639_v28  ;;  %v2037_v24 = vmul.f32 %v4666_v32, %v4637_v45 }
 0x1fb   : > { %v1461_v19 = vadd.f32 %v1429_v0, %v1344_v6  ;;  %v2217_v52 = vrot.slane %v2111_v1, 1  ;;  %v2218_v63 = vrot.slane %v2112_v30, 1  ;;  %v1611_v34 = vsel %vm975_vm0, %v1609_v55, %v1610_v59 }
 0x1fc   : > { %v2558_v5 = vadd.f32 %v2461_v50, %v2313_v4  ;;  %v2462_v43 = vrot.slane %v2356_v9, 2  ;;  %v2463_v23 = vrot.slane %v4664_v58, 2  ;;  %v821_v41 = vmul.f32 %v4572_v17, %v4438_v56  ;;  %v4699_v4 = vld [vmem:[#allocation8 + $0x8] ss:$0 sm:$0xff] }
 0x1fd   : > { %v1706_v12 = vadd.f32 %v1611_v34, %v1461_v19  ;;  %v896_v38 = vmul.f32 %v4566_v2, %v774_v40  ;;  %v1142_v33 = vmul.f32 %v4576_v44, %v774_v40  ;;  %v1856_v11 = vsel %vm1221_vm1, %v1854_v29, %v1855_v57 }
 0x1fe   : > { %v2597_v18 = vadd.f32 %v4204_v7, %v2558_v5  ;;  %v2219_v62 = vsel %vm975_vm0, %v2217_v52, %v2218_v63  ;;  %v1505_v3 = vmul.f32 %v4622_v53, %v1383_v25  ;;  %v1750_v31 = vmul.f32 %v4633_v46, %v1383_v25 }
 0x1ff   : > { %v1951_v60 = vadd.f32 %v1856_v11, %v1706_v12  ;;  %v1004_v15 = vrot.slane %v896_v38, 1  ;;  %v1250_v27 = vrot.slane %v1142_v33, 2  ;;  %v2464_v56 = vsel %vm1221_vm1, %v2462_v43, %v2463_v23 }
 0x200   : > { %v2629_v10 = vmax.f32 %v2597_v18, 0.0  ;;  %v1612_v42 = vrot.slane %v1505_v3, 1  ;;  %v2113_v16 = vmul.f32 %v4654_v49, %v1991_v35  ;;  %v1430_v21 = vmul.f32 %v4647_v39, %v4522_v51 }
 0x201   : > { %v2069_v13 = vadd.f32 %v2037_v24, %v1951_v60  ;;  %v1005_v50 = vsel %vm975_vm0, %v1002_v54, %v1004_v15  ;;  %v1857_v47 = vrot.slane %v1750_v31, 2  ;;  %v2038_v55 = vmul.f32 %v4666_v32, %v4639_v28  ;;  %v4733_v31 = vld [vmem:[#allocation2 + $0xc8] sm:$0xff] }
 0x202   : > { %v2661_v0 = vmin.f32 %v2629_v10, 6.0  ;;  %v1099_v26 = vadd.f32 %v1005_v50, %v821_v41  ;;  %v2220_v37 = vrot.slane %v2113_v16, 1  ;;  %v1251_v29 = vsel %vm1221_vm1, %v1248_v61, %v1250_v27 }
 0x203   : > { %v2314_v6 = vadd.f32 %v2219_v62, %v2069_v13  ;;  %v1613_v1 = vsel %vm975_vm0, %v1610_v59, %v1612_v42  ;;  %v618_v14 = vadd.f32 %v4557_v48, %v4336_v36  ;;  %v1858_v30 = vsel %vm1221_vm1, %v1855_v57, %v1857_v47  ;;  %v4729_v62 = vld [vmem:[#allocation2 + $0xc0] sm:$0xff] }
 0x204   : > { %3367 = vmatmul.mubr.f32.gmra.mrb[8].mxu1 %v2661_v0  ;;  %v1345_v54 = vadd.f32 %v1251_v29, %v1099_v26  ;;  %v2358_v9 = vmul.f32 %v4699_v4, %v1991_v35  ;;  %v613_v40 = vadd.f32 %v4557_v48, %v4345_v8  ;;  %v2221_v20 = vsel %vm975_vm0, %v2218_v63, %v2220_v37 }
 0x205   : > { %v2559_v19 = vadd.f32 %v2464_v56, %v2314_v6  ;;  %v652_v61 = vmax.f32 %v618_v14, 0.0  ;;  %v897_v59 = vmul.f32 %v4566_v2, %v4518_v22  ;;  %v4709_v52 = vmul.f32 %v4566_v2, %v4522_v51  ;;  %v777_v6 = vld [vmem:[#allocation2 + $0xa0] sm:$0x3] }
 0x206   : > { %v1462_v24 = vadd.f32 %v1430_v21, %v1345_v54  ;;  %v651_v36 = vmax.f32 %v613_v40, 0.0  ;;  %v1143_v57 = vmul.f32 %v4576_v44, %v4518_v22  ;;  %v822_v8 = vmul.f32 %v4572_v17, %v4518_v22  ;;  %v1386_v40 = vld [vmem:[#allocation2 + $0xb8] sm:$0x3] }
 0x207   : > { %v2598_v25 = vadd.f32 %v4204_v7, %v2559_v19  ;;  %v684_v5 = vmin.f32 %v652_v61, 6.0  ;;  %v1006_v48 = vrot.slane %v897_v59, 1  ;;  %v1007_v43 = vrot.slane %v4709_v52, 1 }
 0x208   : > { %v1707_v63 = vadd.f32 %v1613_v1, %v1462_v24  ;;  %v683_v34 = vmin.f32 %v651_v36, 6.0  ;;  %v4719_v12 = vmul.f32 %v4576_v44, %v4522_v51  ;;  %v2465_v38 = vrot.slane %v2358_v9, 2  ;;  %v4764_v24 = vld [vmem:[%s5667_s4] ss:$0 sm:$0xff] }
 0x209   : > { %v2630_v41 = vmax.f32 %v2598_v25, 0.0  ;;  %756 = vst [vmem:[#allocation2 + $0x189] sm:$0xff] %v684_v5  ;;  %v1252_v33 = vrot.slane %v1143_v57, 2  ;;  %v1506_v7 = vmul.f32 %v4622_v53, %v4637_v45  ;;  %v1008_v22 = vsel %vm975_vm0, %v1006_v48, %v1007_v43  ;;  %v1994_v5 = vld [vmem:[#allocation2 + $0xd0] sm:$0x3] }
 0x20a   : > { %v1952_v35 = vadd.f32 %v1858_v30, %v1707_v63  ;;  %755 = vst [vmem:[#allocation2 + $0x181] sm:$0xff] %v683_v34  ;;  %v1253_v18 = vrot.slane %v4719_v12, 2  ;;  %v4727_v11 = vmul.f32 %v4622_v53, %v4639_v28  ;;  %v1100_v60 = vadd.f32 %v1008_v22, %v822_v8 }
 0x20b   : > { %v2662_v3 = vmin.f32 %v2630_v41, 6.0  ;;  %v1614_v15 = vrot.slane %v1506_v7, 1  ;;  %v1751_v27 = vmul.f32 %v4633_v46, %v4637_v45  ;;  %v1752_v16 = vmul.f32 %v4633_v46, %v4639_v28 }
 0x20c   : > { %v2070_v10 = vadd.f32 %v2038_v55, %v1952_v35  ;;  %v1254_v56 = vsel %vm1221_vm1, %v1252_v33, %v1253_v18  ;;  %v1615_v42 = vrot.slane %v4727_v11, 1  ;;  %v1431_v50 = vmul.f32 %v4647_v39, %v4637_v45 }
 0x20d   : > { %3369 = vmatprep.mubr.f32.mxu1 %v2662_v3  ;;  %v1346_v13 = vadd.f32 %v1254_v56, %v1100_v60  ;;  %v1859_v21 = vrot.slane %v1751_v27, 2  ;;  %v2114_v47 = vmul.f32 %v4654_v49, %v4729_v62  ;;  %v2466_v26 = vsel %vm1221_vm1, %v2463_v23, %v2465_v38 }
 0x20e   : > { %v2315_v0 = vadd.f32 %v2221_v20, %v2070_v10  ;;  %v1860_v55 = vrot.slane %v1752_v16, 2  ;;  %v2115_v37 = vmul.f32 %v4654_v49, %v4733_v31  ;;  %v2359_v14 = vmul.f32 %v4699_v4, %v4729_v62 }
 0x20f   : > { %v1463_v29 = vadd.f32 %v1431_v50, %v1346_v13  ;;  %v2222_v1 = vrot.slane %v2114_v47, 1  ;;  %v4752_v54 = vmul.f32 %v4699_v4, %v4733_v31  ;;  %v1616_v9 = vsel %vm975_vm0, %v1614_v15, %v1615_v42 }
 0x210   : > { %v2560_v30 = vadd.f32 %v2466_v26, %v2315_v0  ;;  %v2039_v58 = vmul.f32 %v4666_v32, %v4729_v62  ;;  %v2223_v23 = vrot.slane %v2115_v37, 1  ;;  %v1861_v20 = vsel %vm1221_vm1, %v1859_v21, %v1860_v55 }
 0x211   : > { %v1708_v19 = vadd.f32 %v1616_v9, %v1463_v29  ;;  %v823_v61 = vmul.f32 %v4572_v17, %v4522_v51  ;;  %v899_v59 = vmul.f32 %v4566_v2, %v777_v6  ;;  %v2467_v52 = vrot.slane %v2359_v14, 2 }
 0x212   : > { %v2599_v36 = vadd.f32 %v4764_v24, %v2560_v30  ;;  %v2468_v57 = vrot.slane %v4752_v54, 2  ;;  %v1145_v25 = vmul.f32 %v4576_v44, %v777_v6  ;;  %v2224_v48 = vsel %vm975_vm0, %v2222_v1, %v2223_v23 }
 0x213   : > { %v1953_v8 = vadd.f32 %v1861_v20, %v1708_v19  ;;  %v1009_v63 = vrot.slane %v899_v59, 1  ;;  %v1508_v51 = vmul.f32 %v4622_v53, %v1386_v40  ;;  %v1432_v41 = vmul.f32 %v4647_v39, %v4639_v28  ;;  %v4812_v59 = vld [vmem:[#allocation2 + $0xd8] sm:$0xff] }
 0x214   : > { %v2631_v34 = vmax.f32 %v2599_v36, 0.0  ;;  %v1255_v12 = vrot.slane %v1145_v25, 2  ;;  %v1753_v38 = vmul.f32 %v4633_v46, %v1386_v40  ;;  %v2116_v22 = vmul.f32 %v4654_v49, %v1994_v5 }
 0x215   : > { %v2071_v33 = vadd.f32 %v2039_v58, %v1953_v8  ;;  %v1010_v7 = vsel %vm975_vm0, %v1007_v43, %v1009_v63  ;;  %v1617_v35 = vrot.slane %v1508_v51, 1  ;;  %v2469_v3 = vsel %vm1221_vm1, %v2467_v52, %v2468_v57  ;;  %v4815_v8 = vld [vmem:[#allocation2 + $0xe0] sm:$0xff] }
 0x216   : > { %v2663_v11 = vmin.f32 %v2631_v34, 6.0  ;;  %v1101_v60 = vadd.f32 %v1010_v7, %v823_v61  ;;  %v1862_v15 = vrot.slane %v1753_v38, 2  ;;  %v1256_v10 = vsel %vm1221_vm1, %v1253_v18, %v1255_v12 }
 0x217   : > { %v2316_v27 = vadd.f32 %v2224_v48, %v2071_v33  ;;  %v2225_v56 = vrot.slane %v2116_v22, 1  ;;  %v2361_v16 = vmul.f32 %v4699_v4, %v1994_v5  ;;  %v1618_v43 = vsel %vm975_vm0, %v1615_v42, %v1617_v35 }
 0x218   : > { %3370 = vmatmul.mubr.f32.gmra.mrb[10].mxu1 %v2663_v11  ;;  %v1347_v13 = vadd.f32 %v1256_v10, %v1101_v60  ;;  %v2040_v50 = vmul.f32 %v4666_v32, %v4733_v31  ;;  %v900_v21 = vmul.f32 %v4566_v2, %v4637_v45  ;;  %v1863_v0 = vsel %vm1221_vm1, %v1860_v55, %v1862_v15 }
 0x219   : > { %v2561_v47 = vadd.f32 %v2469_v3, %v2316_v27  ;;  %v824_v26 = vmul.f32 %v4572_v17, %v4637_v45  ;;  %v4791_v18 = vmul.f32 %v4566_v2, %v4639_v28  ;;  %v1146_v42 = vmul.f32 %v4576_v44, %v4637_v45  ;;  %v780_v3 = vld [vmem:[#allocation2 + $0xb8] sm:$0x3] }
 0x21a   : > { %v1464_v37 = vadd.f32 %v1432_v41, %v1347_v13  ;;  %v1011_v6 = vrot.slane %v900_v21, 1  ;;  %v4797_v29 = vmul.f32 %v4576_v44, %v4639_v28  ;;  %v2226_v55 = vsel %vm975_vm0, %v2223_v23, %v2225_v56  ;;  %v1389_v56 = vld [vmem:[#allocation2 + $0xd0] sm:$0x3] }
 0x21b   : > { %v2600_v1 = vadd.f32 %v4764_v24, %v2561_v47  ;;  %v2470_v14 = vrot.slane %v2361_v16, 2  ;;  %v1012_v30 = vrot.slane %v4791_v18, 1  ;;  %v1257_v58 = vrot.slane %v1146_v42, 2 }
 0x21c   : > { %v1709_v9 = vadd.f32 %v1618_v43, %v1464_v37  ;;  %v1258_v40 = vrot.slane %v4797_v29, 2  ;;  %v1509_v19 = vmul.f32 %v4622_v53, %v4729_v62  ;;  %v4808_v61 = vmul.f32 %v4622_v53, %v4733_v31 }
 0x21d   : > { %v2632_v20 = vmax.f32 %v2600_v1, 0.0  ;;  %v1013_v45 = vsel %vm975_vm0, %v1011_v6, %v1012_v30  ;;  %v1754_v23 = vmul.f32 %v4633_v46, %v4729_v62  ;;  %v1755_v51 = vmul.f32 %v4633_v46, %v4733_v31  ;;  %v1997_v6 = vld [vmem:[#allocation2 + $0xe8] sm:$0x3] }
 0x21e   : > { %v1954_v36 = vadd.f32 %v1863_v0, %v1709_v9  ;;  %v1102_v52 = vadd.f32 %v1013_v45, %v824_v26  ;;  %v1259_v25 = vsel %vm1221_vm1, %v1257_v58, %v1258_v40  ;;  %v1619_v5 = vrot.slane %v1509_v19, 1 }
 0x21f   : > { %v2664_v48 = vmin.f32 %v2632_v20, 6.0  ;;  %v1620_v63 = vrot.slane %v4808_v61, 1  ;;  %v1864_v34 = vrot.slane %v1754_v23, 2  ;;  %v1433_v38 = vmul.f32 %v4647_v39, %v4729_v62 }
 0x220   : > { %v2072_v12 = vadd.f32 %v2040_v50, %v1954_v36  ;;  %v1348_v41 = vadd.f32 %v1259_v25, %v1102_v52  ;;  %v2117_v33 = vmul.f32 %v4654_v49, %v4812_v59  ;;  %v2471_v7 = vsel %vm1221_vm1, %v2468_v57, %v2470_v14 }
 0x221   : > { %3372 = vmatprep.mubr.f32.mxu1 %v2664_v48  ;;  %v1865_v35 = vrot.slane %v1755_v51, 2  ;;  %v2118_v22 = vmul.f32 %v4654_v49, %v4815_v8  ;;  %v2362_v11 = vmul.f32 %v4699_v4, %v4812_v59  ;;  %v4833_v10 = vmul.f32 %v4699_v4, %v4815_v8 }
 0x222   : > { %v2317_v60 = vadd.f32 %v2226_v55, %v2072_v12  ;;  %v1465_v15 = vadd.f32 %v1433_v38, %v1348_v41  ;;  %v2227_v27 = vrot.slane %v2117_v33, 1  ;;  %v1621_v54 = vsel %vm975_vm0, %v1619_v5, %v1620_v63 }
 0x223   : > { %v1866_v57 = vsel %vm1221_vm1, %v1864_v34, %v1865_v35  ;;  %v2041_v16 = vmul.f32 %v4666_v32, %v4812_v59  ;;  %v2228_v13 = vrot.slane %v2118_v22, 1  ;;  %v2472_v21 = vrot.slane %v2362_v11, 2 }
 0x224   : > { %v2562_v43 = vadd.f32 %v2471_v7, %v2317_v60  ;;  %v1710_v50 = vadd.f32 %v1621_v54, %v1465_v15  ;;  %v902_v47 = vmul.f32 %v4566_v2, %v780_v3  ;;  %v2473_v0 = vrot.slane %v4833_v10, 2 }
 0x225   : > { %v825_v26 = vmul.f32 %v4572_v17, %v4639_v28  ;;  %v1148_v18 = vmul.f32 %v4576_v44, %v780_v3  ;;  %v1511_v37 = vmul.f32 %v4622_v53, %v1389_v56  ;;  %v2229_v1 = vsel %vm975_vm0, %v2227_v27, %v2228_v13 }
 0x226   : > { %v2601_v42 = vadd.f32 %v4764_v24, %v2562_v43  ;;  %v1955_v29 = vadd.f32 %v1866_v57, %v1710_v50  ;;  %v1014_v55 = vrot.slane %v902_v47, 1  ;;  %v1434_v9 = vmul.f32 %v4647_v39, %v4733_v31  ;;  %v4888_v47 = vld [vmem:[#allocation2 + $0xf0] sm:$0xff] }
 0x227   : > { %v1260_v14 = vrot.slane %v1148_v18, 2  ;;  %v1622_v58 = vrot.slane %v1511_v37, 1  ;;  %v1756_v19 = vmul.f32 %v4633_v46, %v1389_v56  ;;  %v2119_v61 = vmul.f32 %v4654_v49, %v1997_v6 }
 0x228   : > { %v2633_v20 = vmax.f32 %v2601_v42, 0.0  ;;  %v2073_v28 = vadd.f32 %v2041_v16, %v1955_v29  ;;  %v1015_v45 = vsel %vm975_vm0, %v1012_v30, %v1014_v55  ;;  %v2474_v23 = vsel %vm1221_vm1, %v2472_v21, %v2473_v0  ;;  %v4891_v42 = vld [vmem:[#allocation2 + $0xf8] sm:$0xff] }
 0x229   : > { %v1103_v36 = vadd.f32 %v1015_v45, %v825_v26  ;;  %v1261_v52 = vsel %vm1221_vm1, %v1258_v40, %v1260_v14  ;;  %v1867_v25 = vrot.slane %v1756_v19, 2  ;;  %v2230_v51 = vrot.slane %v2119_v61, 1 }
 0x22a   : > { %v2665_v5 = vmin.f32 %v2633_v20, 6.0  ;;  %v2318_v48 = vadd.f32 %v2229_v1, %v2073_v28  ;;  %v2364_v34 = vmul.f32 %v4699_v4, %v1997_v6  ;;  %v1623_v41 = vsel %vm975_vm0, %v1620_v63, %v1622_v58 }
 0x22b   : > { %v1349_v12 = vadd.f32 %v1261_v52, %v1103_v36  ;;  %v2042_v30 = vmul.f32 %v4666_v32, %v4815_v8  ;;  %v903_v38 = vmul.f32 %v4566_v2, %v4729_v62  ;;  %v1868_v7 = vsel %vm1221_vm1, %v1865_v35, %v1867_v25  ;;  %v783_v36 = vld [vmem:[#allocation2 + $0xd0] sm:$0x3] }
 0x22c   : > { %3373 = vmatmul.mubr.f32.gmra.mrb[12].mxu1 %v2665_v5  ;;  %v2563_v33 = vadd.f32 %v2474_v23, %v2318_v48  ;;  %v826_v40 = vmul.f32 %v4572_v17, %v4729_v62  ;;  %v4867_v22 = vmul.f32 %v4566_v2, %v4733_v31  ;;  %v1149_v63 = vmul.f32 %v4576_v44, %v4729_v62 }
 0x22d   : > { %v1466_v11 = vadd.f32 %v1434_v9, %v1349_v12  ;;  %v1016_v3 = vrot.slane %v903_v38, 1  ;;  %v4873_v60 = vmul.f32 %v4576_v44, %v4733_v31  ;;  %v2231_v35 = vsel %vm975_vm0, %v2228_v13, %v2230_v51  ;;  %v1392_v51 = vld [vmem:[#allocation2 + $0xe8] sm:$0x3] }
 0x22e   : > { %v2602_v15 = vadd.f32 %v4764_v24, %v2563_v33  ;;  %v2475_v27 = vrot.slane %v2364_v34, 2  ;;  %v1017_v56 = vrot.slane %v4867_v22, 1  ;;  %v1262_v57 = vrot.slane %v1149_v63, 2 }
 0x22f   : > { %v1711_v54 = vadd.f32 %v1623_v41, %v1466_v11  ;;  %v1263_v16 = vrot.slane %v4873_v60, 2  ;;  %v1512_v43 = vmul.f32 %v4622_v53, %v4812_v59  ;;  %v4884_v21 = vmul.f32 %v4622_v53, %v4815_v8 }
 0x230   : > { %v2634_v50 = vmax.f32 %v2602_v15, 0.0  ;;  %v1018_v62 = vsel %vm975_vm0, %v1016_v3, %v1017_v56  ;;  %v1757_v13 = vmul.f32 %v4633_v46, %v4812_v59  ;;  %v1758_v55 = vmul.f32 %v4633_v46, %v4815_v8  ;;  %v2000_v3 = vld [vmem:[#allocation2 + $0x100] sm:$0x3] }
 0x231   : > { %v1956_v26 = vadd.f32 %v1868_v7, %v1711_v54  ;;  %v1104_v18 = vadd.f32 %v1018_v62, %v826_v40  ;;  %v1264_v37 = vsel %vm1221_vm1, %v1262_v57, %v1263_v16  ;;  %v1624_v6 = vrot.slane %v1512_v43, 1 }
 0x232   : > { %v2666_v29 = vmin.f32 %v2634_v50, 6.0  ;;  %v1625_v1 = vrot.slane %v4884_v21, 1  ;;  %v1869_v14 = vrot.slane %v1757_v13, 2  ;;  %v1435_v19 = vmul.f32 %v4647_v39, %v4812_v59 }
 0x233   : > { %v2074_v9 = vadd.f32 %v2042_v30, %v1956_v26  ;;  %v1350_v58 = vadd.f32 %v1264_v37, %v1104_v18  ;;  %v2120_v20 = vmul.f32 %v4654_v49, %v4888_v47  ;;  %v2476_v28 = vsel %vm1221_vm1, %v2473_v0, %v2475_v27 }
 0x234   : > { %3375 = vmatprep.mubr.f32.mxu1 %v2666_v29  ;;  %v1870_v45 = vrot.slane %v1758_v55, 2  ;;  %v2121_v61 = vmul.f32 %v4654_v49, %v4891_v42  ;;  %v2365_v23 = vmul.f32 %v4699_v4, %v4888_v47  ;;  %v4909_v48 = vmul.f32 %v4699_v4, %v4891_v42 }
 0x235   : > { %v2319_v52 = vadd.f32 %v2231_v35, %v2074_v9  ;;  %v1467_v25 = vadd.f32 %v1435_v19, %v1350_v58  ;;  %v2232_v5 = vrot.slane %v2120_v20, 1  ;;  %v1626_v10 = vsel %vm975_vm0, %v1624_v6, %v1625_v1 }
 0x236   : > { %v1871_v0 = vsel %vm1221_vm1, %v1869_v14, %v1870_v45  ;;  %v2043_v34 = vmul.f32 %v4666_v32, %v4888_v47  ;;  %v2233_v12 = vrot.slane %v2121_v61, 1  ;;  %v2477_v38 = vrot.slane %v2365_v23, 2 }
 0x237   : > { %v2564_v41 = vadd.f32 %v2476_v28, %v2319_v52  ;;  %v1712_v30 = vadd.f32 %v1626_v10, %v1467_v25  ;;  %v905_v33 = vmul.f32 %v4566_v2, %v783_v36  ;;  %v2478_v7 = vrot.slane %v4909_v48, 2 }
 0x238   : > { %v827_v40 = vmul.f32 %v4572_v17, %v4733_v31  ;;  %v1151_v22 = vmul.f32 %v4576_v44, %v783_v36  ;;  %v1514_v11 = vmul.f32 %v4622_v53, %v1392_v51  ;;  %v2234_v15 = vsel %vm975_vm0, %v2232_v5, %v2233_v12 }
 0x239   : > { %v2603_v63 = vadd.f32 %v4764_v24, %v2564_v41  ;;  %v1957_v60 = vadd.f32 %v1871_v0, %v1712_v30  ;;  %v1019_v35 = vrot.slane %v905_v33, 1  ;;  %v1436_v54 = vmul.f32 %v4647_v39, %v4815_v8  ;;  %v4964_v33 = vld [vmem:[#allocation2 + $0x108] sm:$0xff] }
 0x23a   : > { %v1265_v27 = vrot.slane %v1151_v22, 2  ;;  %v1627_v57 = vrot.slane %v1514_v11, 1  ;;  %v1759_v43 = vmul.f32 %v4633_v46, %v1392_v51  ;;  %v2122_v21 = vmul.f32 %v4654_v49, %v2000_v3 }
 0x23b   : > { %v2635_v50 = vmax.f32 %v2603_v63, 0.0  ;;  %v2075_v31 = vadd.f32 %v2043_v34, %v1957_v60  ;;  %v1020_v62 = vsel %vm975_vm0, %v1017_v56, %v1019_v35  ;;  %v2479_v13 = vsel %vm1221_vm1, %v2477_v38, %v2478_v7  ;;  %v4967_v63 = vld [vmem:[#allocation2 + $0x110] sm:$0xff] }
 0x23c   : > { %v1105_v26 = vadd.f32 %v1020_v62, %v827_v40  ;;  %v1266_v18 = vsel %vm1221_vm1, %v1263_v16, %v1265_v27  ;;  %v1872_v37 = vrot.slane %v1759_v43, 2  ;;  %v2235_v55 = vrot.slane %v2122_v21, 1 }
 0x23d   : > { %v2667_v6 = vmin.f32 %v2635_v50, 6.0  ;;  %v2320_v29 = vadd.f32 %v2234_v15, %v2075_v31  ;;  %v2367_v14 = vmul.f32 %v4699_v4, %v2000_v3  ;;  %v1628_v58 = vsel %vm975_vm0, %v1625_v1, %v1627_v57 }
 0x23e   : > { %v1351_v9 = vadd.f32 %v1266_v18, %v1105_v26  ;;  %v2044_v56 = vmul.f32 %v4666_v32, %v4891_v42  ;;  %v906_v19 = vmul.f32 %v4566_v2, %v4812_v59  ;;  %v1873_v28 = vsel %vm1221_vm1, %v1870_v45, %v1872_v37  ;;  %v786_v26 = vld [vmem:[#allocation2 + $0xe8] sm:$0x3] }
 0x23f   : > { %3376 = vmatmul.mubr.f32.gmra.mrb[14].mxu1 %v2667_v6  ;;  %v2565_v20 = vadd.f32 %v2479_v13, %v2320_v29  ;;  %v828_v16 = vmul.f32 %v4572_v17, %v4812_v59  ;;  %v4943_v61 = vmul.f32 %v4566_v2, %v4815_v8  ;;  %v1152_v1 = vmul.f32 %v4576_v44, %v4812_v59 }
 0x240   : > { %v1468_v23 = vadd.f32 %v1436_v54, %v1351_v9  ;;  %v1021_v36 = vrot.slane %v906_v19, 1  ;;  %v4949_v52 = vmul.f32 %v4576_v44, %v4815_v8  ;;  %v2236_v45 = vsel %vm975_vm0, %v2233_v12, %v2235_v55  ;;  %v1395_v55 = vld [vmem:[#allocation2 + $0x100] sm:$0x3] }
 0x241   : > { %v2604_v25 = vadd.f32 %v4764_v24, %v2565_v20  ;;  %v2480_v5 = vrot.slane %v2367_v14, 2  ;;  %v1022_v51 = vrot.slane %v4943_v61, 1  ;;  %v1267_v0 = vrot.slane %v1152_v1, 2 }
 0x242   : > { %v1713_v10 = vadd.f32 %v1628_v58, %v1468_v23  ;;  %v1268_v34 = vrot.slane %v4949_v52, 2  ;;  %v1515_v41 = vmul.f32 %v4622_v53, %v4888_v47  ;;  %v4960_v38 = vmul.f32 %v4622_v53, %v4891_v42 }
 0x243   : > { %v2636_v30 = vmax.f32 %v2604_v25, 0.0  ;;  %v1023_v59 = vsel %vm975_vm0, %v1021_v36, %v1022_v51  ;;  %v1760_v12 = vmul.f32 %v4633_v46, %v4888_v47  ;;  %v1761_v35 = vmul.f32 %v4633_v46, %v4891_v42  ;;  %v2003_v36 = vld [vmem:[#allocation2 + $0x118] sm:$0x3] }
 0x244   : > { %v1958_v40 = vadd.f32 %v1873_v28, %v1713_v10  ;;  %v1106_v22 = vadd.f32 %v1023_v59, %v828_v16  ;;  %v1269_v11 = vsel %vm1221_vm1, %v1267_v0, %v1268_v34  ;;  %v1629_v3 = vrot.slane %v1515_v41, 1 }
 0x245   : > { %v2668_v60 = vmin.f32 %v2636_v30, 6.0  ;;  %v1630_v15 = vrot.slane %v4960_v38, 1  ;;  %v1874_v27 = vrot.slane %v1760_v12, 2  ;;  %v1437_v43 = vmul.f32 %v4647_v39, %v4888_v47 }
 0x246   : > { %v2076_v54 = vadd.f32 %v2044_v56, %v1958_v40  ;;  %v1352_v57 = vadd.f32 %v1269_v11, %v1106_v22  ;;  %v2123_v50 = vmul.f32 %v4654_v49, %v4964_v33  ;;  %v2481_v31 = vsel %vm1221_vm1, %v2478_v7, %v2480_v5 }
 0x247   : > { %3378 = vmatprep.mubr.f32.mxu1 %v2668_v60  ;;  %v1875_v62 = vrot.slane %v1761_v35, 2  ;;  %v2124_v21 = vmul.f32 %v4654_v49, %v4967_v63  ;;  %v2368_v13 = vmul.f32 %v4699_v4, %v4964_v33  ;;  %v4985_v29 = vmul.f32 %v4699_v4, %v4967_v63 }
 0x248   : > { %v2321_v18 = vadd.f32 %v2236_v45, %v2076_v54  ;;  %v1469_v37 = vadd.f32 %v1437_v43, %v1352_v57  ;;  %v2237_v6 = vrot.slane %v2123_v50, 1  ;;  %v1631_v48 = vsel %vm975_vm0, %v1629_v3, %v1630_v15 }
 0x249   : > { %v1876_v7 = vsel %vm1221_vm1, %v1874_v27, %v1875_v62  ;;  %v2045_v14 = vmul.f32 %v4666_v32, %v4964_v33  ;;  %v2238_v9 = vrot.slane %v2124_v21, 1  ;;  %v2482_v19 = vrot.slane %v2368_v13, 2 }
 0x24a   : > { %v2566_v58 = vadd.f32 %v2481_v31, %v2321_v18  ;;  %v1714_v56 = vadd.f32 %v1631_v48, %v1469_v37  ;;  %v908_v20 = vmul.f32 %v4566_v2, %v786_v26  ;;  %v2483_v28 = vrot.slane %v4985_v29, 2 }
 0x24b   : > { %v829_v16 = vmul.f32 %v4572_v17, %v4815_v8  ;;  %v1154_v61 = vmul.f32 %v4576_v44, %v786_v26  ;;  %v1517_v23 = vmul.f32 %v4622_v53, %v1395_v55  ;;  %v2239_v25 = vsel %vm975_vm0, %v2237_v6, %v2238_v9 }
 0x24c   : > { %v2605_v1 = vadd.f32 %v4764_v24, %v2566_v58  ;;  %v1959_v52 = vadd.f32 %v1876_v7, %v1714_v56  ;;  %v1024_v45 = vrot.slane %v908_v20, 1  ;;  %v1438_v10 = vmul.f32 %v4647_v39, %v4891_v42  ;;  %v5040_v20 = vld [vmem:[#allocation2 + $0x120] sm:$0xff] }
 0x24d   : > { %v1270_v5 = vrot.slane %v1154_v61, 2  ;;  %v1632_v0 = vrot.slane %v1517_v23, 1  ;;  %v1762_v41 = vmul.f32 %v4633_v46, %v1395_v55  ;;  %v2125_v38 = vmul.f32 %v4654_v49, %v2003_v36 }
 0x24e   : > { %v2637_v30 = vmax.f32 %v2605_v1, 0.0  ;;  %v2077_v8 = vadd.f32 %v2045_v14, %v1959_v52  ;;  %v1025_v59 = vsel %vm975_vm0, %v1022_v51, %v1024_v45  ;;  %v2484_v12 = vsel %vm1221_vm1, %v2482_v19, %v2483_v28  ;;  %v5043_v1 = vld [vmem:[#allocation2 + $0x128] sm:$0xff] }
 0x24f   : > { %v1107_v40 = vadd.f32 %v1025_v59, %v829_v16  ;;  %v1271_v22 = vsel %vm1221_vm1, %v1268_v34, %v1270_v5  ;;  %v1877_v11 = vrot.slane %v1762_v41, 2  ;;  %v2240_v35 = vrot.slane %v2125_v38, 1 }
 0x250   : > { %v2669_v3 = vmin.f32 %v2637_v30, 6.0  ;;  %v2322_v60 = vadd.f32 %v2239_v25, %v2077_v8  ;;  %v2370_v27 = vmul.f32 %v4699_v4, %v2003_v36  ;;  %v1633_v57 = vsel %vm975_vm0, %v1630_v15, %v1632_v0 }
 0x251   : > { %v1353_v54 = vadd.f32 %v1271_v22, %v1107_v40  ;;  %v2046_v51 = vmul.f32 %v4666_v32, %v4967_v63  ;;  %v909_v43 = vmul.f32 %v4566_v2, %v4888_v47  ;;  %v1878_v31 = vsel %vm1221_vm1, %v1875_v62, %v1877_v11  ;;  %v789_v40 = vld [vmem:[#allocation2 + $0x100] sm:$0x3] }
 0x252   : > { %3379 = vmatmul.mubr.f32.gmra.mrb[16].mxu1 %v2669_v3  ;;  %v2567_v50 = vadd.f32 %v2484_v12, %v2322_v60  ;;  %v830_v34 = vmul.f32 %v4572_v17, %v4888_v47  ;;  %v5019_v21 = vmul.f32 %v4566_v2, %v4891_v42  ;;  %v1155_v15 = vmul.f32 %v4576_v44, %v4888_v47 }
 0x253   : > { %v1470_v13 = vadd.f32 %v1438_v10, %v1353_v54  ;;  %v1026_v26 = vrot.slane %v909_v43, 1  ;;  %v5025_v18 = vmul.f32 %v4576_v44, %v4891_v42  ;;  %v2241_v62 = vsel %vm975_vm0, %v2238_v9, %v2240_v35  ;;  %v1398_v35 = vld [vmem:[#allocation2 + $0x118] sm:$0x3] }
 0x254   : > { %v2606_v37 = vadd.f32 %v4764_v24, %v2567_v50  ;;  %v2485_v6 = vrot.slane %v2370_v27, 2  ;;  %v1027_v55 = vrot.slane %v5019_v21, 1  ;;  %v1272_v7 = vrot.slane %v1155_v15, 2 }
 0x255   : > { %v1715_v48 = vadd.f32 %v1633_v57, %v1470_v13  ;;  %v1273_v14 = vrot.slane %v5025_v18, 2  ;;  %v1518_v58 = vmul.f32 %v4622_v53, %v4964_v33  ;;  %v5036_v19 = vmul.f32 %v4622_v53, %v4967_v63 }
 0x256   : > { %v2638_v56 = vmax.f32 %v2606_v37, 0.0  ;;  %v1028_v47 = vsel %vm975_vm0, %v1026_v26, %v1027_v55  ;;  %v1763_v9 = vmul.f32 %v4633_v46, %v4964_v33  ;;  %v1764_v45 = vmul.f32 %v4633_v46, %v4967_v63  ;;  %v2006_v26 = vld [vmem:[#allocation2 + $0x130] sm:$0x3] }
 0x257   : > { %v1960_v16 = vadd.f32 %v1878_v31, %v1715_v48  ;;  %v1108_v61 = vadd.f32 %v1028_v47, %v830_v34  ;;  %v1274_v23 = vsel %vm1221_vm1, %v1272_v7, %v1273_v14  ;;  %v1634_v36 = vrot.slane %v1518_v58, 1 }
 0x258   : > { %v2670_v52 = vmin.f32 %v2638_v56, 6.0  ;;  %v1635_v25 = vrot.slane %v5036_v19, 1  ;;  %v1879_v5 = vrot.slane %v1763_v9, 2  ;;  %v1439_v41 = vmul.f32 %v4647_v39, %v4964_v33 }
 0x259   : > { %v2078_v10 = vadd.f32 %v2046_v51, %v1960_v16  ;;  %v1354_v0 = vadd.f32 %v1274_v23, %v1108_v61  ;;  %v2126_v30 = vmul.f32 %v4654_v49, %v5040_v20  ;;  %v2486_v8 = vsel %vm1221_vm1, %v2483_v28, %v2485_v6 }
 0x25a   : > { %3381 = vmatprep.mubr.f32.mxu1 %v2670_v52  ;;  %v1880_v59 = vrot.slane %v1764_v45, 2  ;;  %v2127_v38 = vmul.f32 %v4654_v49, %v5043_v1  ;;  %v2371_v12 = vmul.f32 %v4699_v4, %v5040_v20  ;;  %v5061_v60 = vmul.f32 %v4699_v4, %v5043_v1 }
 0x25b   : > { %v2323_v22 = vadd.f32 %v2241_v62, %v2078_v10  ;;  %v1471_v11 = vadd.f32 %v1439_v41, %v1354_v0  ;;  %v2242_v3 = vrot.slane %v2126_v30, 1  ;;  %v1636_v29 = vsel %vm975_vm0, %v1634_v36, %v1635_v25  ;;  %v5093_v41 = vld [vmem:[#allocation8] ss:$0 sm:$0xff] }
 0x25c   : > { %v1881_v28 = vsel %vm1221_vm1, %v1879_v5, %v1880_v59  ;;  %v2047_v27 = vmul.f32 %v4666_v32, %v5040_v20  ;;  %v2243_v54 = vrot.slane %v2127_v38, 1  ;;  %v2487_v43 = vrot.slane %v2371_v12, 2  ;;  %v5088_v5 = vld [vmem:[#allocation8 + $0x1] ss:$0 sm:$0xff]  ;;  %v5101_v12 = vld [vmem:[#allocation8 + $0x2] ss:$0 sm:$0xff] }
 0x25d   : > { %v2568_v57 = vadd.f32 %v2486_v8, %v2323_v22  ;;  %v1716_v51 = vadd.f32 %v1636_v29, %v1471_v11  ;;  %v911_v50 = vmul.f32 %v4566_v2, %v789_v40  ;;  %v2488_v31 = vrot.slane %v5061_v60, 2 }
 0x25e   : > { %v831_v34 = vmul.f32 %v4572_v17, %v4891_v42  ;;  %v1157_v21 = vmul.f32 %v4576_v44, %v789_v40  ;;  %v1520_v13 = vmul.f32 %v4622_v53, %v1398_v35  ;;  %v2244_v37 = vsel %vm975_vm0, %v2242_v3, %v2243_v54 }
 0x25f   : > { %v2607_v15 = vadd.f32 %v4764_v24, %v2568_v57  ;;  %v1961_v18 = vadd.f32 %v1881_v28, %v1716_v51  ;;  %v1029_v62 = vrot.slane %v911_v50, 1  ;;  %v1440_v2 = vmul.f32 %v4647_v39, %v4967_v63  ;;  %v5122_v50 = vld [vmem:[#allocation2 + $0x138] sm:$0xff] }
 0x260   : > { %v1275_v6 = vrot.slane %v1157_v21, 2  ;;  %v1637_v48 = vrot.slane %v1520_v13, 1  ;;  %v1765_v7 = vmul.f32 %v4633_v46, %v1398_v35  ;;  %v2128_v42 = vmul.f32 %v4654_v49, %v2006_v26 }
 0x261   : > { %v2639_v58 = vmax.f32 %v2607_v15, 0.0  ;;  %v2079_v17 = vadd.f32 %v2047_v27, %v1961_v18  ;;  %v1030_v44 = vsel %vm975_vm0, %v1027_v55, %v1029_v62  ;;  %v2489_v56 = vsel %vm1221_vm1, %v2487_v43, %v2488_v31  ;;  %v5127_v15 = vld [vmem:[#allocation2 + $0x140] sm:$0xff]  ;;  %v5130_v62 = vld [vmem:[#allocation8 + $0x5] ss:$0 sm:$0xff] }
 0x262   : > { %v1109_v47 = vadd.f32 %v1030_v44, %v831_v34  ;;  %v1276_v19 = vsel %vm1221_vm1, %v1273_v14, %v1275_v6  ;;  %v1882_v9 = vrot.slane %v1765_v7, 2  ;;  %v2245_v23 = vrot.slane %v2128_v42, 1 }
 0x263   : > { %v2671_v16 = vmin.f32 %v2639_v58, 6.0  ;;  %v2324_v61 = vadd.f32 %v2244_v37, %v2079_v17  ;;  %v2373_v36 = vmul.f32 %v4699_v4, %v2006_v26  ;;  %v1638_v45 = vsel %vm975_vm0, %v1635_v25, %v1637_v48 }
 0x264   : > { %v1355_v52 = vadd.f32 %v1276_v19, %v1109_v47  ;;  %v2048_v55 = vmul.f32 %v4666_v32, %v5043_v1  ;;  %v912_v10 = vmul.f32 %v5088_v5, %v4964_v33  ;;  %v1883_v14 = vsel %vm1221_vm1, %v1880_v59, %v1882_v9 }
 0x265   : > { %3382 = vmatmul.mubr.f32.gmra.mrb[18].mxu1 %v2671_v16  ;;  %v2569_v0 = vadd.f32 %v2489_v56, %v2324_v61  ;;  %v832_v30 = vmul.f32 %v5093_v41, %v4964_v33  ;;  %v5099_v25 = vmul.f32 %v5088_v5, %v4967_v63  ;;  %v1158_v40 = vmul.f32 %v5101_v12, %v4964_v33  ;;  %v792_v56 = vld [vmem:[#allocation2 + $0x118] sm:$0x3]  ;;  %v1401_v16 = vld [vmem:[#allocation2 + $0x130] sm:$0x3] }
 0x266   : > { %v1472_v8 = vadd.f32 %v1440_v2, %v1355_v52  ;;  %v1031_v38 = vrot.slane %v912_v10, 1  ;;  %v5107_v22 = vmul.f32 %v5101_v12, %v4967_v63  ;;  %v2246_v11 = vsel %vm975_vm0, %v2243_v54, %v2245_v23 }
 0x267   : > { %v2608_v59 = vadd.f32 %v4764_v24, %v2569_v0  ;;  %v2490_v3 = vrot.slane %v2373_v36, 2  ;;  %v1032_v35 = vrot.slane %v5099_v25, 1  ;;  %v1277_v28 = vrot.slane %v1158_v40, 2  ;;  %v2009_v25 = vld [vmem:[#allocation2 + $0x148] sm:$0x3] }
 0x268   : > { %v1717_v29 = vadd.f32 %v1638_v45, %v1472_v8  ;;  %v1278_v27 = vrot.slane %v5107_v22, 2  ;;  %v1521_v57 = vmul.f32 %v4622_v53, %v5040_v20  ;;  %v5118_v43 = vmul.f32 %v4622_v53, %v5043_v1 }
 0x269   : > { %v2640_v51 = vmax.f32 %v2608_v59, 0.0  ;;  %v1033_v33 = vsel %vm975_vm0, %v1031_v38, %v1032_v35  ;;  %v1766_v54 = vmul.f32 %v4633_v46, %v5040_v20  ;;  %v1767_v53 = vmul.f32 %v5130_v62, %v5043_v1 }
 0x26a   : > { %v1962_v34 = vadd.f32 %v1883_v14, %v1717_v29  ;;  %v1110_v21 = vadd.f32 %v1033_v33, %v832_v30  ;;  %v1279_v13 = vsel %vm1221_vm1, %v1277_v28, %v1278_v27  ;;  %v1639_v26 = vrot.slane %v1521_v57, 1  ;;  %v5158_v14 = vld [vmem:[#allocation8 + $0x4] ss:$0 sm:$0xff]  ;;  %v5169_v33 = vld [vmem:[#allocation8 + $0x7] ss:$0 sm:$0xff] }
 0x26b   : > { %v2672_v18 = vmin.f32 %v2640_v51, 6.0  ;;  %v1640_v37 = vrot.slane %v5118_v43, 1  ;;  %v1884_v46 = vrot.slane %v1766_v54, 2  ;;  %v1441_v48 = vmul.f32 %v4647_v39, %v5040_v20 }
 0x26c   : > { %v2080_v6 = vadd.f32 %v2048_v55, %v1962_v34  ;;  %v1356_v2 = vadd.f32 %v1279_v13, %v1110_v21  ;;  %v2129_v7 = vmul.f32 %v4654_v49, %v5122_v50  ;;  %v2491_v58 = vsel %vm1221_vm1, %v2488_v31, %v2490_v3 }
 0x26d   : > { %3384 = vmatprep.mubr.f32.mxu1 %v2672_v18  ;;  %v1885_v17 = vrot.slane %v1767_v53, 2  ;;  %v2130_v44 = vmul.f32 %v4654_v49, %v5127_v15  ;;  %v2374_v42 = vmul.f32 %v4699_v4, %v5122_v50  ;;  %v5147_v39 = vmul.f32 %v4699_v4, %v5127_v15 }
 0x26e   : > { %v2325_v47 = vadd.f32 %v2246_v11, %v2080_v6  ;;  %v1473_v19 = vadd.f32 %v1441_v48, %v1356_v2  ;;  %v2247_v9 = vrot.slane %v2129_v7, 1  ;;  %v1641_v60 = vsel %vm975_vm0, %v1639_v26, %v1640_v37  ;;  %v5163_v11 = vld [vmem:[#allocation8 + $0x3] ss:$0 sm:$0xff]  ;;  %v5180_v2 = vld [vmem:[#allocation8 + $0x6] ss:$0 sm:$0xff] }
 0x26f   : > { %v1886_v31 = vsel %vm1221_vm1, %v1884_v46, %v1885_v17  ;;  %v2049_v61 = vmul.f32 %v4666_v32, %v5122_v50  ;;  %v2248_v49 = vrot.slane %v2130_v44, 1  ;;  %v2492_v52 = vrot.slane %v2374_v42, 2 }
 0x270   : > { %v2570_v23 = vadd.f32 %v2491_v58, %v2325_v47  ;;  %v1718_v36 = vadd.f32 %v1641_v60, %v1473_v19  ;;  %v914_v45 = vmul.f32 %v5088_v5, %v792_v56  ;;  %v2493_v55 = vrot.slane %v5147_v39, 2  ;;  %v1404_v39 = vld [vmem:[#allocation2 + $0x148] sm:$0x3] }
 0x271   : > { %v833_v10 = vmul.f32 %v5093_v41, %v4967_v63  ;;  %v1160_v0 = vmul.f32 %v5101_v12, %v792_v56  ;;  %v1523_v30 = vmul.f32 %v5158_v14, %v1401_v16  ;;  %v2249_v38 = vsel %vm975_vm0, %v2247_v9, %v2248_v49 }
 0x272   : > { %v2609_v32 = vadd.f32 %v4764_v24, %v2570_v23  ;;  %v1963_v8 = vadd.f32 %v1886_v31, %v1718_v36  ;;  %v1034_v40 = vrot.slane %v914_v45, 1  ;;  %v1442_v3 = vmul.f32 %v5163_v11, %v5043_v1  ;;  %v5214_v45 = vld [vmem:[#allocation2 + $0x150] sm:$0xff] }
 0x273   : > { %v1280_v59 = vrot.slane %v1160_v0, 2  ;;  %v1642_v63 = vrot.slane %v1523_v30, 1  ;;  %v1768_v29 = vmul.f32 %v5130_v62, %v1401_v16  ;;  %v2131_v43 = vmul.f32 %v5169_v33, %v2009_v25 }
 0x274   : > { %v2641_v28 = vmax.f32 %v2609_v32, 0.0  ;;  %v2081_v57 = vadd.f32 %v2049_v61, %v1963_v8  ;;  %v1035_v51 = vsel %vm975_vm0, %v1032_v35, %v1034_v40  ;;  %v2494_v54 = vsel %vm1221_vm1, %v2492_v52, %v2493_v55  ;;  %v5219_v8 = vld [vmem:[#allocation2 + $0x158] sm:$0xff] }
 0x275   : > { %v1111_v34 = vadd.f32 %v1035_v51, %v833_v10  ;;  %v1281_v21 = vsel %vm1221_vm1, %v1278_v27, %v1280_v59  ;;  %v1887_v13 = vrot.slane %v1768_v29, 2  ;;  %v2250_v53 = vrot.slane %v2131_v43, 1 }
 0x276   : > { %v2673_v26 = vmin.f32 %v2641_v28, 6.0  ;;  %v2326_v18 = vadd.f32 %v2249_v38, %v2081_v57  ;;  %v2376_v46 = vmul.f32 %v4699_v4, %v2009_v25  ;;  %v1643_v6 = vsel %vm975_vm0, %v1640_v37, %v1642_v63 }
 0x277   : > { %v1357_v35 = vadd.f32 %v1281_v21, %v1111_v34  ;;  %v2050_v48 = vmul.f32 %v5180_v2, %v5127_v15  ;;  %v915_v7 = vmul.f32 %v5088_v5, %v5040_v20  ;;  %v1888_v27 = vsel %vm1221_vm1, %v1885_v17, %v1887_v13  ;;  %v5233_v34 = vld [vmem:[#allocation8 + $0x8] ss:$0 sm:$0xff]  ;;  %v795_v13 = vld [vmem:[#allocation2 + $0x130] sm:$0x3] }
 0x278   : > { %3385 = vmatmul.mubr.f32.gmra.mrb[20].mxu1 %v2673_v26  ;;  %v2571_v22 = vadd.f32 %v2494_v54, %v2326_v18  ;;  %v834_v58 = vmul.f32 %v5093_v41, %v5040_v20  ;;  %v5191_v4 = vmul.f32 %v5088_v5, %v5043_v1  ;;  %v1161_v42 = vmul.f32 %v5101_v12, %v5040_v20 }
 0x279   : > { %v1474_v37 = vadd.f32 %v1442_v3, %v1357_v35  ;;  %v1036_v44 = vrot.slane %v915_v7, 1  ;;  %v5197_v56 = vmul.f32 %v5101_v12, %v5043_v1  ;;  %v2251_v17 = vsel %vm975_vm0, %v2248_v49, %v2250_v53 }
 0x27a   : > { %v2610_v47 = vadd.f32 %v4764_v24, %v2571_v22  ;;  %v2495_v19 = vrot.slane %v2376_v46, 2  ;;  %v1037_v9 = vrot.slane %v5191_v4, 1  ;;  %v1282_v60 = vrot.slane %v1161_v42, 2 }
 0x27b   : > { %v1719_v16 = vadd.f32 %v1643_v6, %v1474_v37  ;;  %v1283_v31 = vrot.slane %v5197_v56, 2  ;;  %v1524_v61 = vmul.f32 %v5158_v14, %v5122_v50  ;;  %v5205_v23 = vpop.f32.mrb[0].mxu1  ;;  %v5210_v52 = vmul.f32 %v5158_v14, %v5127_v15  ;;  %v2012_v56 = vld [vmem:[#allocation2 + $0x160] sm:$0x3] }
 0x27c   : > { %v2642_v20 = vmax.f32 %v2610_v47, 0.0  ;;  %v1038_v36 = vsel %vm975_vm0, %v1036_v44, %v1037_v9  ;;  %v1769_v49 = vmul.f32 %v5130_v62, %v5122_v50  ;;  %v5216_v10 = vpop.f32.mrb[1].mxu1  ;;  %v1770_v59 = vmul.f32 %v5130_v62, %v5127_v15 }
 0x27d   : > { %v1964_v0 = vadd.f32 %v1888_v27, %v1719_v16  ;;  %v1112_v30 = vadd.f32 %v1038_v36, %v834_v58  ;;  %v1284_v25 = vsel %vm1221_vm1, %v1282_v60, %v1283_v31  ;;  %v1644_v32 = vrot.slane %v1524_v61, 1 }
 0x27e   : > { %v2674_v38 = vmin.f32 %v2642_v20, 6.0  ;;  %v1645_v40 = vrot.slane %v5210_v52, 1  ;;  %v1889_v3 = vrot.slane %v1769_v49, 2  ;;  %v1443_v28 = vmul.f32 %v5163_v11, %v5122_v50 }
 0x27f   : > { %v2082_v63 = vadd.f32 %v2050_v48, %v1964_v0  ;;  %v1358_v29 = vadd.f32 %v1284_v25, %v1112_v30  ;;  %v2132_v57 = vmul.f32 %v5169_v33, %v5214_v45  ;;  %v2496_v51 = vsel %vm1221_vm1, %v2493_v55, %v2495_v19 }
 0x280   : > { %3387 = vmatprep.mubr.f32.mxu1 %v2674_v38  ;;  %v1890_v43 = vrot.slane %v1770_v59, 2  ;;  %v2133_v54 = vmul.f32 %v5169_v33, %v5219_v8  ;;  %v2377_v21 = vmul.f32 %v5233_v34, %v5214_v45  ;;  %v5239_v46 = vmul.f32 %v5233_v34, %v5219_v8 }
 0x281   : > { %v2327_v26 = vadd.f32 %v2251_v17, %v2082_v63  ;;  %v1475_v18 = vadd.f32 %v1443_v28, %v1358_v29  ;;  %v2252_v53 = vrot.slane %v2132_v57, 1  ;;  %v1646_v55 = vsel %vm975_vm0, %v1644_v32, %v1645_v40 }
 0x282   : > { %v1891_v35 = vsel %vm1221_vm1, %v1889_v3, %v1890_v43  ;;  %v2051_v6 = vmul.f32 %v5180_v2, %v5214_v45  ;;  %v2253_v48 = vrot.slane %v2133_v54, 1  ;;  %v2497_v27 = vrot.slane %v2377_v21, 2 }
 0x283   : > { %v2572_v7 = vadd.f32 %v2496_v51, %v2327_v26  ;;  %v1720_v22 = vadd.f32 %v1646_v55, %v1475_v18  ;;  %v917_v58 = vmul.f32 %v5088_v5, %v795_v13  ;;  %v2498_v4 = vrot.slane %v5239_v46, 2 }
 0x284   : > { %v835_v37 = vmul.f32 %v5093_v41, %v5043_v1  ;;  %v1163_v44 = vmul.f32 %v5101_v12, %v795_v13  ;;  %v1526_v42 = vmul.f32 %v5158_v14, %v1404_v39  ;;  %v2254_v19 = vsel %vm975_vm0, %v2252_v53, %v2253_v48 }
 0x285   : > { %v2611_v47 = vadd.f32 %v4764_v24, %v2572_v7  ;;  %v1965_v17 = vadd.f32 %v1891_v35, %v1720_v22  ;;  %v1039_v16 = vrot.slane %v917_v58, 1  ;;  %v1444_v61 = vmul.f32 %v5163_v11, %v5127_v15 }
 0x286   : > { %v1285_v60 = vrot.slane %v1163_v44, 2  ;;  %v1647_v20 = vrot.slane %v1526_v42, 1  ;;  %v1771_v36 = vmul.f32 %v5130_v62, %v1404_v39  ;;  %v2134_v0 = vmul.f32 %v5169_v33, %v2012_v56  ;;  %v5299_v44 = vld [vmem:[#allocation2 + $0x168] sm:$0xff] }
 0x287   : > { %v2643_v52 = vmax.f32 %v2611_v47, 0.0  ;;  %v2083_v1 = vadd.f32 %v2051_v6, %v1965_v17  ;;  %v1040_v49 = vsel %vm975_vm0, %v1037_v9, %v1039_v16  ;;  %v2499_v24 = vsel %vm1221_vm1, %v2497_v27, %v2498_v4 }
 0x288   : > { %v1113_v30 = vadd.f32 %v1040_v49, %v835_v37  ;;  %v1286_v25 = vsel %vm1221_vm1, %v1283_v31, %v1285_v60  ;;  %v1892_v32 = vrot.slane %v1771_v36, 2  ;;  %v2255_v3 = vrot.slane %v2134_v0, 1 }
 0x289   : > { %v2675_v38 = vmin.f32 %v2643_v52, 6.0  ;;  %v2328_v59 = vadd.f32 %v2254_v19, %v2083_v1  ;;  %v2379_v63 = vmul.f32 %v5233_v34, %v2012_v56  ;;  %v1648_v28 = vsel %vm975_vm0, %v1645_v40, %v1647_v20  ;;  %v5302_v19 = vld [vmem:[#allocation2 + $0x170] sm:$0xff] }
 0x28a   : > { %v1359_v29 = vadd.f32 %v1286_v25, %v1113_v30  ;;  %v2052_v9 = vmul.f32 %v5180_v2, %v5219_v8  ;;  %v918_v57 = vmul.f32 %v5088_v5, %v5122_v50  ;;  %v1893_v54 = vsel %vm1221_vm1, %v1890_v43, %v1892_v32  ;;  %v5284_v43 = vld [vmem:[%s5667_s4] ss:$0 sm:$0xff]  ;;  %v798_v32 = vld [vmem:[#allocation2 + $0x148] sm:$0x3] }
 0x28b   : > { %3388 = vmatmul.mubr.f32.gmra.mrb[22].mxu1 %v2675_v38  ;;  %v2573_v51 = vadd.f32 %v2499_v24, %v2328_v59  ;;  %v836_v31 = vmul.f32 %v5093_v41, %v5122_v50  ;;  %v5273_v21 = vmul.f32 %v5088_v5, %v5127_v15  ;;  %v1164_v40 = vmul.f32 %v5101_v12, %v5122_v50 }
 0x28c   : > { %v1476_v13 = vadd.f32 %v1444_v61, %v1359_v29  ;;  %v1041_v26 = vrot.slane %v918_v57, 1  ;;  %v5279_v18 = vmul.f32 %v5101_v12, %v5127_v15  ;;  %v2256_v39 = vsel %vm975_vm0, %v2253_v48, %v2255_v3  ;;  %v1407_v29 = vld [vmem:[#allocation2 + $0x160] sm:$0x3] }
 0x28d   : > { %v2612_v53 = vadd.f32 %v5284_v43, %v2573_v51  ;;  %v2500_v55 = vrot.slane %v2379_v63, 2  ;;  %v1042_v35 = vrot.slane %v5273_v21, 1  ;;  %v1287_v7 = vrot.slane %v1164_v40, 2 }
 0x28e   : > { %v1721_v6 = vadd.f32 %v1648_v28, %v1476_v13  ;;  %v1288_v50 = vrot.slane %v5279_v18, 2  ;;  %v1527_v22 = vmul.f32 %v5158_v14, %v5214_v45  ;;  %v5295_v37 = vmul.f32 %v5158_v14, %v5219_v8  ;;  %v2015_v18 = vld [vmem:[#allocation2 + $0x178] sm:$0x3] }
 0x28f   : > { %v2644_v27 = vmax.f32 %v2612_v53, 0.0  ;;  %v1043_v58 = vsel %vm975_vm0, %v1041_v26, %v1042_v35  ;;  %v1772_v48 = vmul.f32 %v5130_v62, %v5214_v45  ;;  %v1773_v61 = vmul.f32 %v5130_v62, %v5219_v8 }
 0x290   : > { %v1966_v42 = vadd.f32 %v1893_v54, %v1721_v6  ;;  %v1114_v56 = vadd.f32 %v1043_v58, %v836_v31  ;;  %v1289_v47 = vsel %vm1221_vm1, %v1287_v7, %v1288_v50  ;;  %v1649_v17 = vrot.slane %v1527_v22, 1 }
 0x291   : > { %v2676_v16 = vmin.f32 %v2644_v27, 6.0  ;;  %v1650_v60 = vrot.slane %v5295_v37, 1  ;;  %v1894_v20 = vrot.slane %v1772_v48, 2  ;;  %v1445_v1 = vmul.f32 %v5163_v11, %v5214_v45 }
 0x292   : > { %v2084_v36 = vadd.f32 %v2052_v9, %v1966_v42  ;;  %v1360_v52 = vadd.f32 %v1289_v47, %v1114_v56  ;;  %v2135_v49 = vmul.f32 %v5169_v33, %v5299_v44  ;;  %v2501_v0 = vsel %vm1221_vm1, %v2498_v4, %v2500_v55 }
 0x293   : > { %3390 = vmatprep.mubr.f32.mxu1 %v2676_v16  ;;  %v1895_v24 = vrot.slane %v1773_v61, 2  ;;  %v2136_v30 = vmul.f32 %v5169_v33, %v5302_v19  ;;  %v2380_v25 = vmul.f32 %v5233_v34, %v5299_v44  ;;  %v5320_v63 = vmul.f32 %v5233_v34, %v5302_v19 }
 0x294   : > { %v2329_v38 = vadd.f32 %v2256_v39, %v2084_v36  ;;  %v1477_v59 = vadd.f32 %v1445_v1, %v1360_v52  ;;  %v2257_v3 = vrot.slane %v2135_v49, 1  ;;  %v1651_v46 = vsel %vm975_vm0, %v1649_v17, %v1650_v60 }
 0x295   : > { %v1896_v4 = vsel %vm1221_vm1, %v1894_v20, %v1895_v24  ;;  %v2053_v28 = vmul.f32 %v5180_v2, %v5299_v44  ;;  %v2258_v9 = vrot.slane %v2136_v30, 1  ;;  %v2502_v54 = vrot.slane %v2380_v25, 2 }
 0x296   : > { %v2574_v57 = vadd.f32 %v2501_v0, %v2329_v38  ;;  %v1722_v51 = vadd.f32 %v1651_v46, %v1477_v59  ;;  %v920_v31 = vmul.f32 %v5088_v5, %v798_v32  ;;  %v2503_v21 = vrot.slane %v5320_v63, 2 }
 0x297   : > { %v837_v13 = vmul.f32 %v5093_v41, %v5127_v15  ;;  %v1166_v26 = vmul.f32 %v5101_v12, %v798_v32  ;;  %v1529_v40 = vmul.f32 %v5158_v14, %v1407_v29  ;;  %v2259_v55 = vsel %vm975_vm0, %v2257_v3, %v2258_v9 }
 0x298   : > { %v2613_v53 = vadd.f32 %v5284_v43, %v2574_v57  ;;  %v1967_v39 = vadd.f32 %v1896_v4, %v1722_v51  ;;  %v1044_v6 = vrot.slane %v920_v31, 1  ;;  %v1446_v22 = vmul.f32 %v5163_v11, %v5219_v8 }
 0x299   : > { %v1290_v7 = vrot.slane %v1166_v26, 2  ;;  %v1652_v27 = vrot.slane %v1529_v40, 1  ;;  %v1774_v58 = vmul.f32 %v5130_v62, %v1407_v29  ;;  %v5337_v37 = vpop.f32.mrb[2].mxu1  ;;  %v2137_v56 = vmul.f32 %v5169_v33, %v2015_v18 }
 0x29a   : > { %v2645_v15 = vmax.f32 %v2613_v53, 0.0  ;;  %v2085_v48 = vadd.f32 %v2053_v28, %v1967_v39  ;;  %v1045_v42 = vsel %vm975_vm0, %v1042_v35, %v1044_v6  ;;  %v5341_v47 = vpop.f32.mrb[3].mxu1  ;;  %v2504_v17 = vsel %vm1221_vm1, %v2502_v54, %v2503_v21 }
 0x29b   : > { %v1115_v16 = vadd.f32 %v1045_v42, %v837_v13  ;;  %v1291_v61 = vsel %vm1221_vm1, %v1288_v50, %v1290_v7  ;;  %v1897_v20 = vrot.slane %v1774_v58, 2  ;;  %v2260_v1 = vrot.slane %v2137_v56, 1  ;;  %v5382_v7 = vld [vmem:[#allocation2 + $0x188] sm:$0xff] }
 0x29c   : > { %v2677_v36 = vmin.f32 %v2645_v15, 6.0  ;;  %v2330_v52 = vadd.f32 %v2259_v55, %v2085_v48  ;;  %v2382_v49 = vmul.f32 %v5233_v34, %v2015_v18  ;;  %v1653_v35 = vsel %vm975_vm0, %v1650_v60, %v1652_v27  ;;  %v5379_v18 = vld [vmem:[#allocation2 + $0x180] sm:$0xff] }
 0x29d   : > { %v1361_v0 = vadd.f32 %v1291_v61, %v1115_v16  ;;  %v2054_v30 = vmul.f32 %v5180_v2, %v5302_v19  ;;  %v921_v25 = vmul.f32 %v5088_v5, %v5214_v45  ;;  %v1898_v38 = vsel %vm1221_vm1, %v1895_v24, %v1897_v20 }
 0x29e   : > { %3391 = vmatmul.mubr.f32.gmra.mrb[24].mxu1 %v2677_v36  ;;  %v2575_v32 = vadd.f32 %v2504_v17, %v2330_v52  ;;  %v838_v50 = vmul.f32 %v5093_v41, %v5214_v45  ;;  %v5358_v59 = vmul.f32 %v5088_v5, %v5219_v8  ;;  %v1167_v60 = vmul.f32 %v5101_v12, %v5214_v45  ;;  %v801_v52 = vld [vmem:[#allocation2 + $0x160] sm:$0x3] }
 0x29f   : > { %v1478_v3 = vadd.f32 %v1446_v22, %v1361_v0  ;;  %v1046_v29 = vrot.slane %v921_v25, 1  ;;  %v5364_v46 = vmul.f32 %v5101_v12, %v5219_v8  ;;  %v2261_v24 = vsel %vm975_vm0, %v2258_v9, %v2260_v1 }
 0x2a0   : > { %v2614_v4 = vadd.f32 %v5284_v43, %v2575_v32  ;;  %v2505_v28 = vrot.slane %v2382_v49, 2  ;;  %v1047_v57 = vrot.slane %v5358_v59, 1  ;;  %v1292_v54 = vrot.slane %v1167_v60, 2 }
 0x2a1   : > { %v1723_v51 = vadd.f32 %v1653_v35, %v1478_v3  ;;  %v1293_v31 = vrot.slane %v5364_v46, 2  ;;  %v1530_v13 = vmul.f32 %v5158_v14, %v5299_v44  ;;  %v5375_v40 = vmul.f32 %v5158_v14, %v5302_v19 }
 0x2a2   : > { %v2646_v26 = vmax.f32 %v2614_v4, 0.0  ;;  %v1048_v45 = vsel %vm975_vm0, %v1046_v29, %v1047_v57  ;;  %v1775_v9 = vmul.f32 %v5130_v62, %v5299_v44  ;;  %v1776_v58 = vmul.f32 %v5130_v62, %v5302_v19 }
 0x2a3   : > { %v1968_v53 = vadd.f32 %v1898_v38, %v1723_v51  ;;  %v1116_v39 = vadd.f32 %v1048_v45, %v838_v50  ;;  %v1294_v55 = vsel %vm1221_vm1, %v1292_v54, %v1293_v31  ;;  %v1654_v6 = vrot.slane %v1530_v13, 1 }
 0x2a4   : > { %v2678_v22 = vmin.f32 %v2646_v26, 6.0  ;;  %v1655_v27 = vrot.slane %v5375_v40, 1  ;;  %v1899_v15 = vrot.slane %v1775_v9, 2  ;;  %v1447_v56 = vmul.f32 %v5163_v11, %v5299_v44 }
 0x2a5   : > { %v2086_v48 = vadd.f32 %v2054_v30, %v1968_v53  ;;  %v1362_v42 = vadd.f32 %v1294_v55, %v1116_v39  ;;  %v2138_v17 = vmul.f32 %v5169_v33, %v5379_v18  ;;  %v2506_v16 = vsel %vm1221_vm1, %v2503_v21, %v2505_v28  ;;  %v1410_v30 = vld [vmem:[#allocation2 + $0x178] sm:$0x3] }
 0x2a6   : > { %3393 = vmatprep.mubr.f32.mxu1 %v2678_v22  ;;  %v1900_v61 = vrot.slane %v1776_v58, 2  ;;  %v2139_v20 = vmul.f32 %v5169_v33, %v5382_v7  ;;  %v2383_v36 = vmul.f32 %v5233_v34, %v5379_v18  ;;  %v5400_v35 = vmul.f32 %v5233_v34, %v5382_v7 }
 0x2a7   : > { %v2331_v1 = vadd.f32 %v2261_v24, %v2086_v48  ;;  %v1479_v49 = vadd.f32 %v1447_v56, %v1362_v42  ;;  %v2262_v0 = vrot.slane %v2138_v17, 1  ;;  %v1656_v63 = vsel %vm975_vm0, %v1654_v6, %v1655_v27  ;;  %v2018_v24 = vld [vmem:[#allocation2 + $0x190] sm:$0x3] }
 0x2a8   : > { %v1901_v21 = vsel %vm1221_vm1, %v1899_v15, %v1900_v61  ;;  %v2055_v25 = vmul.f32 %v5180_v2, %v5379_v18  ;;  %v2263_v32 = vrot.slane %v2139_v20, 1  ;;  %v2507_v59 = vrot.slane %v2383_v36, 2 }
 0x2a9   : > { %v2576_v38 = vadd.f32 %v2506_v16, %v2331_v1  ;;  %v1724_v50 = vadd.f32 %v1656_v63, %v1479_v49  ;;  %v923_v3 = vmul.f32 %v5088_v5, %v801_v52  ;;  %v2508_v29 = vrot.slane %v5400_v35, 2 }
 0x2aa   : > { %v839_v60 = vmul.f32 %v5093_v41, %v5219_v8  ;;  %v1169_v46 = vmul.f32 %v5101_v12, %v801_v52  ;;  %v1532_v4 = vmul.f32 %v5158_v14, %v1410_v30  ;;  %v2264_v54 = vsel %vm975_vm0, %v2262_v0, %v2263_v32 }
 0x2ab   : > { %v2615_v28 = vadd.f32 %v5284_v43, %v2576_v38  ;;  %v1969_v51 = vadd.f32 %v1901_v21, %v1724_v50  ;;  %v1049_v13 = vrot.slane %v923_v3, 1  ;;  %v1448_v45 = vmul.f32 %v5163_v11, %v5302_v19 }
 0x2ac   : > { %v1295_v26 = vrot.slane %v1169_v46, 2  ;;  %v1657_v40 = vrot.slane %v1532_v4, 1  ;;  %v1777_v9 = vmul.f32 %v5130_v62, %v1410_v30  ;;  %v2140_v55 = vmul.f32 %v5169_v33, %v2018_v24 }
 0x2ad   : > { %v2647_v53 = vmax.f32 %v2615_v28, 0.0  ;;  %v2087_v8 = vadd.f32 %v2055_v25, %v1969_v51  ;;  %v1050_v39 = vsel %vm975_vm0, %v1047_v57, %v1049_v13  ;;  %v5419_v6 = vpop.f32.mrb[4].mxu1  ;;  %v2509_v22 = vsel %vm1221_vm1, %v2507_v59, %v2508_v29 }
 0x2ae   : > { %v1117_v58 = vadd.f32 %v1050_v39, %v839_v60  ;;  %v1296_v15 = vsel %vm1221_vm1, %v1293_v31, %v1295_v26  ;;  %v1902_v48 = vrot.slane %v1777_v9, 2  ;;  %v5425_v42 = vpop.f32.mrb[5].mxu1  ;;  %v2265_v16 = vrot.slane %v2140_v55, 1 }
 0x2af   : > { %v2679_v56 = vmin.f32 %v2647_v53, 6.0  ;;  %v2332_v17 = vadd.f32 %v2264_v54, %v2087_v8  ;;  %v2385_v20 = vmul.f32 %v5233_v34, %v2018_v24  ;;  %v1658_v36 = vsel %vm975_vm0, %v1655_v27, %v1657_v40  ;;  %v804_v8 = vld [vmem:[#allocation2 + $0x178] sm:$0x3] }
 0x2b0   : > { %v1363_v57 = vadd.f32 %v1296_v15, %v1117_v58  ;;  %v2056_v52 = vmul.f32 %v5180_v2, %v5382_v7  ;;  %v924_v1 = vmul.f32 %v5088_v5, %v5299_v44  ;;  %v1903_v31 = vsel %vm1221_vm1, %v1900_v61, %v1902_v48  ;;  %v3569_v58 = vld [vmem:[#allocation2] sm:$0xff] }
 0x2b1   : > { %3394 = vmatmul.mubr.f32.gmra.mrb[26].mxu1 %v2679_v56  ;;  %v2577_v49 = vadd.f32 %v2509_v22, %v2332_v17  ;;  %v840_v0 = vmul.f32 %v5093_v41, %v5299_v44  ;;  %v925_v30 = vmul.f32 %v5088_v5, %v5302_v19  ;;  %v1170_v27 = vmul.f32 %v5101_v12, %v5299_v44 }
 0x2b2   : > { %v1480_v63 = vadd.f32 %v1448_v45, %v1363_v57  ;;  %v1051_v21 = vrot.slane %v924_v1, 1  ;;  %v1171_v25 = vmul.f32 %v5101_v12, %v5302_v19  ;;  %v2266_v50 = vsel %vm975_vm0, %v2263_v32, %v2265_v16 }
 0x2b3   : > { %v2616_v38 = vadd.f32 %v5284_v43, %v2577_v49  ;;  %v2510_v59 = vrot.slane %v2385_v20, 2  ;;  %v1052_v61 = vrot.slane %v925_v30, 1  ;;  %v1297_v60 = vrot.slane %v1170_v27, 2 }
 0x2b4   : > { %v1725_v3 = vadd.f32 %v1658_v36, %v1480_v63  ;;  %v1298_v46 = vrot.slane %v1171_v25, 2  ;;  %v1533_v4 = vmul.f32 %v5158_v14, %v5379_v18  ;;  %v1534_v44 = vmul.f32 %v5158_v14, %v5382_v7 }
 0x2b5   : > { %v2648_v24 = vmax.f32 %v2616_v38, 0.0  ;;  %v1053_v28 = vsel %vm975_vm0, %v1051_v21, %v1052_v61  ;;  %v1778_v51 = vmul.f32 %v5130_v62, %v5379_v18  ;;  %v1779_v9 = vmul.f32 %v5130_v62, %v5382_v7 }
 0x2b6   : > { %v1970_v54 = vadd.f32 %v1903_v31, %v1725_v3  ;;  %v1118_v13 = vadd.f32 %v1053_v28, %v840_v0  ;;  %v1299_v32 = vsel %vm1221_vm1, %v1297_v60, %v1298_v46  ;;  %v1659_v26 = vrot.slane %v1533_v4, 1  ;;  %v2021_v31 = vld [vmem:[#allocation2 + $0x1a8] sm:$0x3] }
 0x2b7   : > { %v2680_v45 = vmin.f32 %v2648_v24, 6.0  ;;  %v1660_v40 = vrot.slane %v1534_v44, 1  ;;  %v1904_v53 = vrot.slane %v1778_v51, 2  ;;  %v1449_v22 = vmul.f32 %v5163_v11, %v5379_v18 }
 0x2b8   : > { %v2088_v39 = vadd.f32 %v2056_v52, %v1970_v54  ;;  %v1364_v55 = vadd.f32 %v1299_v32, %v1118_v13  ;;  %v5457_v15 = vmul.f32 %v3569_v58, %v5169_v33  ;;  %v2511_v48 = vsel %vm1221_vm1, %v2508_v29, %v2510_v59  ;;  %v1413_v52 = vld [vmem:[#allocation2 + $0x190] sm:$0x3] }
 0x2b9   : > { %3396 = vmatprep.mubr.f32.mxu1 %v2680_v45  ;;  %v1661_v56 = vsel %vm975_vm0, %v1659_v26, %v1660_v40  ;;  %v1905_v17 = vrot.slane %v1779_v9, 2  ;;  %v5464_v16 = vmul.f32 %v3569_v58, %v5233_v34  ;;  %v5467_v36 = vmul.f32 %v3569_v58, %v5180_v2 }
 0x2ba   : > { %v2333_v20 = vadd.f32 %v2266_v50, %v2088_v39  ;;  %v1481_v57 = vadd.f32 %v1449_v22, %v1364_v55  ;;  %v926_v18 = vmul.f32 %v5088_v5, %v804_v8  ;;  %v2267_v35 = vrot.slane %v5457_v15, 1  ;;  %v3572_v39 = vld [vmem:[%s4053_s8 + $0x18] sm:$0xff]  ;;  %v3573_v22 = vld [vmem:[%s4053_s8 + $0x10] sm:$0xff] }
 0x2bb   : > { %v1906_v1 = vsel %vm1221_vm1, %v1904_v53, %v1905_v17  ;;  %v841_v29 = vmul.f32 %v5093_v41, %v5302_v19  ;;  %v1172_v49 = vmul.f32 %v5101_v12, %v804_v8  ;;  %v2512_v63 = vrot.slane %v5464_v16, 2  ;;  %v5486_v19 = vld [vmem:[%s5669_s6] ss:$0 sm:$0xff] }
 0x2bc   : > { %v2578_v0 = vadd.f32 %v2511_v48, %v2333_v20  ;;  %v1726_v30 = vadd.f32 %v1661_v56, %v1481_v57  ;;  %v1054_v21 = vrot.slane %v926_v18, 1  ;;  %v1450_v5 = vmul.f32 %v5163_v11, %v5382_v7  ;;  %v3574_v48 = vld [vmem:[%s4053_s8 + $0x28] sm:$0xff]  ;;  %v3575_v57 = vld [vmem:[%s4053_s8 + $0x20] sm:$0xff] }
 0x2bd   : > { %v1300_v2 = vrot.slane %v1172_v49, 2  ;;  %v1535_v27 = vmul.f32 %v5158_v14, %v1413_v52  ;;  %v1780_v25 = vmul.f32 %v5130_v62, %v1413_v52  ;;  %v2143_v12 = vmul.f32 %v5169_v33, %v2021_v31 }
 0x2be   : > { %v2617_v38 = vadd.f32 %v5284_v43, %v2578_v0  ;;  %v1971_v50 = vadd.f32 %v1906_v1, %v1726_v30  ;;  %v1055_v41 = vsel %vm975_vm0, %v1052_v61, %v1054_v21  ;;  %v2388_v60 = vmul.f32 %v5233_v34, %v2021_v31  ;;  %v3577_v0 = vld [vmem:[%s4053_s8 + $0x30] sm:$0xff] }
 0x2bf   : > { %v1119_v59 = vadd.f32 %v1055_v41, %v841_v29  ;;  %v1662_v3 = vrot.slane %v1535_v27, 1  ;;  %v1907_v11 = vrot.slane %v1780_v25, 2  ;;  %v1301_v62 = vsel %vm1221_vm1, %v1298_v46, %v1300_v2  ;;  %v3570_v46 = vld [vmem:[%s4053_s8 + $0x8] sm:$0xff]  ;;  %v3576_v29 = vld [vmem:[%s4053_s8 + $0x38] sm:$0xff] }
 0x2c0   : > { %v2649_v7 = vmax.f32 %v2617_v38, 0.0  ;;  %v2089_v14 = vadd.f32 %v5467_v36, %v1971_v50  ;;  %v2270_v61 = vrot.slane %v2143_v12, 1  ;;  %v2779_v33 = vadd.f32 %v5205_v23, %v5486_v19  ;;  %v3578_v50 = vld [vmem:[%s4053_s8 + $0x48] sm:$0xff]  ;;  %v3579_v12 = vld [vmem:[%s4053_s8 + $0x40] sm:$0xff] }
 0x2c1   : > { %v1365_v4 = vadd.f32 %v1301_v62, %v1119_v59  ;;  %v1663_v44 = vsel %vm975_vm0, %v1660_v40, %v1662_v3  ;;  %v1908_v51 = vsel %vm1221_vm1, %v1905_v17, %v1907_v11  ;;  %v2774_v32 = vadd.f32 %v5486_v19, %v5216_v10  ;;  %v3571_v10 = vld [vmem:[%s4053_s8] sm:$0xff] }
 0x2c2   : > { %v2681_v24 = vmin.f32 %v2649_v7, 6.0  ;;  %v2334_v28 = vadd.f32 %v2267_v35, %v2089_v14  ;;  %v3365_v54 = vpop.f32.mrb[6].mxu1  ;;  %v2933_v34 = vadd.f32 %v3570_v46, %v2779_v33  ;;  %v2789_v23 = vadd.f32 %v5337_v37, %v5486_v19  ;;  %v3580_v14 = vld [vmem:[%s4053_s8 + $0x58] sm:$0xff] }
 0x2c3   : > { %v1482_v13 = vadd.f32 %v1450_v5, %v1365_v4  ;;  %v2803_v26 = vpop.f32.mrb[7].mxu1  ;;  %v2515_v40 = vrot.slane %v2388_v60, 2  ;;  %v2784_v9 = vadd.f32 %v5486_v19, %v5341_v47  ;;  %v2799_v53 = vadd.f32 %v5419_v6, %v5486_v19  ;;  %v3581_v60 = vld [vmem:[%s4053_s8 + $0x50] sm:$0xff] }
 0x2c4   : > { %3397 = vmatmul.mubr.f32.gmra.mrb[28].mxu1 %v2681_v24  ;;  %v2579_v45 = vadd.f32 %v2512_v63, %v2334_v28  ;;  %2965 = vst [vmem:[%s5510_s30 + $0x8] sm:$0xff] %v2933_v34  ;;  %v2932_v37 = vadd.f32 %v3571_v10, %v2774_v32  ;;  %v2935_v55 = vadd.f32 %v3572_v39, %v2789_v23  ;;  %v3586_v39 = vld [vmem:[%s4053_s8 + $0x88] sm:$0xff] }
 0x2c5   : > { %v1727_v8 = vadd.f32 %v1663_v44, %v1482_v13  ;;  %v2794_v47 = vadd.f32 %v5486_v19, %v5425_v42  ;;  %v2934_v58 = vadd.f32 %v3573_v22, %v2784_v9  ;;  %v2937_v56 = vadd.f32 %v3574_v48, %v2799_v53  ;;  %v3582_v44 = vld [vmem:[%s4053_s8 + $0x68] sm:$0xff] }
 0x2c6   : > { %v2618_v6 = vadd.f32 %v5284_v43, %v2579_v45  ;;  %v2809_v17 = vadd.f32 %v3365_v54, %v5486_v19  ;;  %2964 = vst [vmem:[%s5510_s30] sm:$0xff] %v2932_v37  ;;  %2967 = vst [vmem:[%s5510_s30 + $0x18] sm:$0xff] %v2935_v55  ;;  %v2804_v42 = vadd.f32 %v5486_v19, %v2803_v26  ;;  %v3583_v54 = vld [vmem:[%s4053_s8 + $0x60] sm:$0xff]  ;;  %v3584_v26 = vld [vmem:[%s4053_s8 + $0x78] sm:$0xff] }
 0x2c7   : > { %v1972_v20 = vadd.f32 %v1908_v51, %v1727_v8  ;;  %v2936_v18 = vadd.f32 %v3575_v57, %v2794_v47  ;;  %v2271_v1 = vsel %vm975_vm0, %v2267_v35, %v2270_v61  ;;  %2966 = vst [vmem:[%s5510_s30 + $0x10] sm:$0xff] %v2934_v58  ;;  %2969 = vst [vmem:[%s5510_s30 + $0x28] sm:$0xff] %v2937_v56  ;;  %v3587_v47 = vld [vmem:[%s4053_s8 + $0x80] sm:$0xff]  ;;  %v3589_v57 = vld [vmem:[%s4053_s8 + $0x90] sm:$0xff] }
 0x2c8   : > { %v2650_v52 = vmax.f32 %v2618_v6, 0.0  ;;  %v2939_v49 = vadd.f32 %v3576_v29, %v2809_v17  ;;  %v2938_v30 = vadd.f32 %v3577_v0, %v2804_v42  ;;  %v2516_v2 = vsel %vm1221_vm1, %v2512_v63, %v2515_v40  ;;  %v3585_v40 = vld [vmem:[%s4053_s8 + $0x70] sm:$0xff]  ;;  %v3588_v17 = vld [vmem:[%s4053_s8 + $0x98] sm:$0xff]  ;;  %v3591_v0 = vld [vmem:[%s4053_s8 + $0xa0] sm:$0xff] }
 0x2c9   : > { %v2090_v31 = vadd.f32 %v5467_v36, %v1972_v20  ;;  %2968 = vst [vmem:[%s5510_s30 + $0x20] sm:$0xff] %v2936_v18 }
 0x2ca   : > { %v2682_v21 = vmin.f32 %v2650_v52, 6.0  ;;  %2971 = vst [vmem:[%s5510_s30 + $0x38] sm:$0xff] %v2939_v49  ;;  %2970 = vst [vmem:[%s5510_s30 + $0x30] sm:$0xff] %v2938_v30  ;;  %v3590_v49 = vld [vmem:[%s4053_s8 + $0xa8] sm:$0xff] }
 0x2cb   : > { %v2335_v15 = vadd.f32 %v2271_v1, %v2090_v31 }
 0x2cc   : > { %3399 = vmatprep.mubr.f32.mxu1 %v2682_v21 }
 0x2cd   : > { %v2580_v35 = vadd.f32 %v2516_v2, %v2335_v15 }
 0x2cf   : > { %v2619_v5 = vadd.f32 %v5284_v43, %v2580_v35 }
 0x2d1   : > { %v2651_v36 = vmax.f32 %v2619_v5, 0.0  ;;  %v3592_v5 = vld [vmem:[%s4053_s8 + $0xb8] sm:$0xff] }
 0x2d3   : > { %v2683_v27 = vmin.f32 %v2651_v36, 6.0 }
 0x2d5   : > { %3400 = vmatmul.mubr.f32.gmra.mrb[30].mxu1 %v2683_v27  ;;  %v3593_v27 = vld [vmem:[%s4053_s8 + $0xb0] sm:$0xff] }
 0x2d7   : > { %v3368_v25 = vpop.f32.mrb[8].mxu1 }
 0x2d8   : > { %v2819_v16 = vadd.f32 %v3368_v25, %v5486_v19  ;;  %v2813_v38 = vpop.f32.mrb[9].mxu1 }
 0x2d9   : > { %v2814_v63 = vadd.f32 %v5486_v19, %v2813_v38 }
 0x2da   : > { %v2941_v41 = vadd.f32 %v3578_v50, %v2819_v16 }
 0x2db   : > { %v2940_v59 = vadd.f32 %v3579_v12, %v2814_v63 }
 0x2dc   : > { %2973 = vst [vmem:[%s5510_s30 + $0x48] sm:$0xff] %v2941_v41  ;;  %v3594_v41 = vld [vmem:[%s4053_s8 + $0xc8] sm:$0xff] }
 0x2dd   : > { %2972 = vst [vmem:[%s5510_s30 + $0x40] sm:$0xff] %v2940_v59  ;;  %v3595_v59 = vld [vmem:[%s4053_s8 + $0xc0] sm:$0xff] }
 0x2eb   : > { %v3371_v43 = vpop.f32.mrb[10].mxu1 }
 0x2ec   : > { %v2829_v3 = vadd.f32 %v3371_v43, %v5486_v19  ;;  %v2823_v11 = vpop.f32.mrb[11].mxu1 }
 0x2ed   : > { %v2824_v7 = vadd.f32 %v5486_v19, %v2823_v11 }
 0x2ee   : > { %v2943_v62 = vadd.f32 %v3580_v14, %v2829_v3 }
 0x2ef   : > { %v2942_v4 = vadd.f32 %v3581_v60, %v2824_v7 }
 0x2f0   : > { %2975 = vst [vmem:[%s5510_s30 + $0x58] sm:$0xff] %v2943_v62  ;;  %v3596_v62 = vld [vmem:[%s4053_s8 + $0xd8] sm:$0xff] }
 0x2f1   : > { %2974 = vst [vmem:[%s5510_s30 + $0x50] sm:$0xff] %v2942_v4  ;;  %v3597_v4 = vld [vmem:[%s4053_s8 + $0xd0] sm:$0xff] }
 0x2ff   : > { %v3374_v61 = vpop.f32.mrb[12].mxu1 }
 0x300   : > { %v2839_v33 = vadd.f32 %v3374_v61, %v5486_v19  ;;  %v2833_v24 = vpop.f32.mrb[13].mxu1 }
 0x301   : > { %v2834_v28 = vadd.f32 %v5486_v19, %v2833_v24 }
 0x302   : > { %v2945_v51 = vadd.f32 %v3582_v44, %v2839_v33 }
 0x303   : > { %v2944_v13 = vadd.f32 %v3583_v54, %v2834_v28 }
 0x304   : > { %2977 = vst [vmem:[%s5510_s30 + $0x68] sm:$0xff] %v2945_v51  ;;  %v3598_v51 = vld [vmem:[%s4053_s8 + $0xe8] sm:$0xff] }
 0x305   : > { %2976 = vst [vmem:[%s5510_s30 + $0x60] sm:$0xff] %v2944_v13  ;;  %v3599_v13 = vld [vmem:[%s4053_s8 + $0xe0] sm:$0xff] }
 0x312   : > { %v3377_v46 = vpop.f32.mrb[14].mxu1 }
 0x313   : > { %v2849_v34 = vadd.f32 %v3377_v46, %v5486_v19  ;;  %v2843_v32 = vpop.f32.mrb[15].mxu1 }
 0x314   : > { %v2844_v23 = vadd.f32 %v5486_v19, %v2843_v32 }
 0x315   : > { %v2947_v45 = vadd.f32 %v3584_v26, %v2849_v34 }
 0x316   : > { %v2946_v9 = vadd.f32 %v3585_v40, %v2844_v23 }
 0x317   : > { %2979 = vst [vmem:[%s5510_s30 + $0x78] sm:$0xff] %v2947_v45  ;;  %v3600_v45 = vld [vmem:[%s4053_s8 + $0xf8] sm:$0xff] }
 0x318   : > { %2978 = vst [vmem:[%s5510_s30 + $0x70] sm:$0xff] %v2946_v9  ;;  %v3601_v9 = vld [vmem:[%s4053_s8 + $0xf0] sm:$0xff] }
 0x325   : > { %v3380_v53 = vpop.f32.mrb[16].mxu1 }
 0x326   : > { %v2859_v8 = vadd.f32 %v3380_v53, %v5486_v19  ;;  %v2853_v10 = vpop.f32.mrb[17].mxu1 }
 0x327   : > { %v2854_v37 = vadd.f32 %v5486_v19, %v2853_v10 }
 0x328   : > { %v2949_v55 = vadd.f32 %v3586_v39, %v2859_v8 }
 0x329   : > { %v2948_v6 = vadd.f32 %v3587_v47, %v2854_v37 }
 0x32a   : > { %2981 = vst [vmem:[%s5510_s30 + $0x88] sm:$0xff] %v2949_v55 }
 0x32b   : > { %2980 = vst [vmem:[%s5510_s30 + $0x80] sm:$0xff] %v2948_v6 }
 0x338   : > { %v3383_v22 = vpop.f32.mrb[18].mxu1 }
 0x339   : > { %v2869_v58 = vadd.f32 %v3383_v22, %v5486_v19  ;;  %v2863_v48 = vpop.f32.mrb[19].mxu1 }
 0x33a   : > { %v2864_v56 = vadd.f32 %v5486_v19, %v2863_v48 }
 0x33b   : > { %v2951_v20 = vadd.f32 %v3588_v17, %v2869_v58 }
 0x33c   : > { %v2950_v18 = vadd.f32 %v3589_v57, %v2864_v56 }
 0x33d   : > { %2983 = vst [vmem:[%s5510_s30 + $0x98] sm:$0xff] %v2951_v20 }
 0x33e   : > { %2982 = vst [vmem:[%s5510_s30 + $0x90] sm:$0xff] %v2950_v18 }
 0x34b   : > { %v3386_v42 = vpop.f32.mrb[20].mxu1 }
 0x34c   : > { %v2879_v52 = vadd.f32 %v3386_v42, %v5486_v19  ;;  %v2873_v1 = vpop.f32.mrb[21].mxu1 }
 0x34d   : > { %v2874_v29 = vadd.f32 %v5486_v19, %v2873_v1 }
 0x34e   : > { %v2953_v31 = vadd.f32 %v3590_v49, %v2879_v52 }
 0x34f   : > { %v2952_v30 = vadd.f32 %v3591_v0, %v2874_v29 }
 0x350   : > { %2985 = vst [vmem:[%s5510_s30 + $0xa8] sm:$0xff] %v2953_v31 }
 0x351   : > { %2984 = vst [vmem:[%s5510_s30 + $0xa0] sm:$0xff] %v2952_v30 }
 0x35e   : > { %v3389_v21 = vpop.f32.mrb[22].mxu1 }
 0x35f   : > { %v2889_v2 = vadd.f32 %v3389_v21, %v5486_v19  ;;  %v2883_v15 = vpop.f32.mrb[23].mxu1 }
 0x360   : > { %v2884_v35 = vadd.f32 %v5486_v19, %v2883_v15 }
 0x361   : > { %v2955_v36 = vadd.f32 %v3592_v5, %v2889_v2 }
 0x362   : > { %v2954_v25 = vadd.f32 %v3593_v27, %v2884_v35 }
 0x363   : > { %2987 = vst [vmem:[%s5510_s30 + $0xb8] sm:$0xff] %v2955_v36 }
 0x364   : > { %2986 = vst [vmem:[%s5510_s30 + $0xb0] sm:$0xff] %v2954_v25 }
 0x371   : > { %v3392_v16 = vpop.f32.mrb[24].mxu1 }
 0x372   : > { %v2899_v38 = vadd.f32 %v3392_v16, %v5486_v19  ;;  %v2893_v63 = vpop.f32.mrb[25].mxu1 }
 0x373   : > { %v2894_v50 = vadd.f32 %v5486_v19, %v2893_v63 }
 0x374   : > { %v2957_v12 = vadd.f32 %v3594_v41, %v2899_v38 }
 0x375   : > { %v2956_v43 = vadd.f32 %v3595_v59, %v2894_v50 }
 0x376   : > { %2989 = vst [vmem:[%s5510_s30 + $0xc8] sm:$0xff] %v2957_v12 }
 0x377   : > { %2988 = vst [vmem:[%s5510_s30 + $0xc0] sm:$0xff] %v2956_v43 }
 0x384   : > { %v3395_v3 = vpop.f32.mrb[26].mxu1 }
 0x385   : > { %v2909_v11 = vadd.f32 %v3395_v3, %v5486_v19  ;;  %v2903_v7 = vpop.f32.mrb[27].mxu1 }
 0x386   : > { %v2904_v14 = vadd.f32 %v5486_v19, %v2903_v7 }
 0x387   : > { %v2959_v60 = vadd.f32 %v3596_v62, %v2909_v11 }
 0x388   : > { %v2958_v61 = vadd.f32 %v3597_v4, %v2904_v14 }
 0x389   : > { %2991 = vst [vmem:[%s5510_s30 + $0xd8] sm:$0xff] %v2959_v60 }
 0x38a   : > { %2990 = vst [vmem:[%s5510_s30 + $0xd0] sm:$0xff] %v2958_v61 }
 0x397   : > { %v3398_v33 = vpop.f32.mrb[28].mxu1 }
 0x398   : > { %v2919_v24 = vadd.f32 %v3398_v33, %v5486_v19  ;;  %v2913_v28 = vpop.f32.mrb[29].mxu1 }
 0x399   : > { %v2914_v44 = vadd.f32 %v5486_v19, %v2913_v28 }
 0x39a   : > { %v2961_v54 = vadd.f32 %v3598_v51, %v2919_v24 }
 0x39b   : > { %v2960_v46 = vadd.f32 %v3599_v13, %v2914_v44 }
 0x39c   : > { %2993 = vst [vmem:[%s5510_s30 + $0xe8] sm:$0xff] %v2961_v54 }
 0x39d   : > { %2992 = vst [vmem:[%s5510_s30 + $0xe0] sm:$0xff] %v2960_v46 }
 0x3a8   : > { %v3401_v34 = vpop.f32.mrb[30].mxu1 }
 0x3a9   : > { %v2929_v32 = vadd.f32 %v3401_v34, %v5486_v19  ;;  %v2923_v23 = vpop.f32.mrb[31].mxu1 }
 0x3aa   : > { %v2924_v26 = vadd.f32 %v5486_v19, %v2923_v23 }
 0x3ab   : > { %v2963_v40 = vadd.f32 %v3600_v45, %v2929_v32 }
 0x3ac   : > { %v2962_v53 = vadd.f32 %v3601_v9, %v2924_v26 }
 0x3ad   : > { %2995 = vst [vmem:[%s5510_s30 + $0xf8] sm:$0xff] %v2963_v40 }
 0x3ae   : > { %2994 = vst [vmem:[%s5510_s30 + $0xf0] sm:$0xff] %v2962_v53 }
 0x3af   : > { %3729 = shalt.err (!%p3726_p4)
}
 0x3b0   : > { %s3730_s8 = scalar_lea.hbm %s5614_s10, 4096  ;;  %s3734_s11 = scalar_lea.hbm %s5670_s7, 8192 }
 0x3b1   : > { %p3731_p9 = scmp.ne.s32.totalorder %s5614_s10, %s3730_s8  ;;  %p3735_p8 = scmp.lt.u32.totalorder %s5614_s10, %s5670_s7 }
 0x3b2   : > { %p3736_p13 = scmp.lt.u32.totalorder %s3734_s11, %s3730_s8  ;;  %p3738_p10 = scmp.lt.u32.totalorder %s3730_s8, %s5614_s10 }
 0x3b3   : > { %p3732_p0 = pnand %p3731_p9, %p3996_p5 }
 0x3b4   : > { %p3737_p6 = por %p3736_p13, %p3735_p8 }
 0x3b5   : > { %p3733_p11 = pneg %p3732_p0 }
 0x3b6   : > { %p3739_p3 = por %p3738_p10, %p3737_p6 }
 0x3b8   : > { %p3740_p7 = pnand %p3739_p3, %p3733_p11 }
 0x3ba   : > { %3743 = shalt.err (!%p3740_p7)
}
 0x3bb   : > { %s3800_s13 = smov 128   ;;  %s3801_s15 = smov 8  }
 0x3bc   : > { %3480 = dma.vmem_to_hbm [thread:$0]  (%p3996_p5), %s5616_s9, 4096, %s5614_s10, %s2997_s28, %s3800_s13, %s3800_s13, %s3801_s15  }
 0x3bd PF: > { %s5690_s14 = sld [smem:[#allocation16_spill]]  ;;  %s3025_s12 = sand.u32 1, %s3778_s24  }
 0x3be   : > { %p5692_p1 = scmp.ge.s32.totalorder %s3790_s27, 2  ;;  %s3026_s20 = scalar_lea.sflag [#allocation5], %s3025_s12 }
 0x3c3   : > { %p5691_p12 = scmp.ne.s32.totalorder %s5690_s14, 0 }
 0x3c5   : > { %p3497_p2 = pnand %p5692_p1, %p5691_p12 }
 0x3c7   : > { %3773 = dma.done.wait (!%p3497_p2), %s3026_s20, 4096  }
 0x3c8   : > { %3775 = vsyncadd (!%p3497_p2), %s3026_s20, 4294963200  ;;  %p22_p4 = scmp.ge.s32.totalorder %s3982_s22, 4   ;;  %s5693_s24 = smov %s3782_s25 }
 0x3c9   : > { %s5694_s25 = smov %s3786_s26  ;;  %s5695_s26 = smov %s3992_s18 }
 0x3ca   : > { %s5696_s27 = smov %s3982_s22  ;;  %24 = sbr.rel (!%p22_p4) target bundleno = 7 (0x7), region = 108 }
 0x3d1   :  { %3031 = vsyncpa [#allocation4], 1 }
 0x3d2   :  { %3033 = vsyncpa [#allocation4 + $0x1], 1 }
 0x3d3   :  { %3034 = vsyncpa [#allocation7], 1 }
 0x3d4   :  { %3035 = vsyncpa [#allocation10], 1 }
 0x3d5   :  { %3036 = vsyncpa [#allocation5], 1 }
 0x3d6   :  { %3038 = vsyncpa [#allocation5 + $0x1], 1 }

</bundles_post_ra>
